<compile_context>
chip_gen: v6e
topology: v6e:2x2x1
jax: 0.10.0
libtpu: 0.0.40
codegen_flags: <defaults>
</compile_context>

<pallas_src>
import functools

import jax
import jax.numpy as jnp
from jax.experimental import pallas as pl
from jax.experimental.pallas import tpu as pltpu


_VMEM_LIMIT_BYTES = 32 * 1024 * 1024   # explicit; fits v7x's smaller VMEM too
_NEG_SLOPE = 0.2
_IN_EPS = 1e-5


# ---------------------------------------------------------------------------
# Pallas kernels
# ---------------------------------------------------------------------------

def _conv_in_lrelu_kernel(x_ref, w_ref, b_ref, o_ref, *, apply_norm,
                          apply_act, eps, negative_slope):
    """Fused conv-as-GEMM + bias (+ InstanceNorm) (+ LeakyReLU), one batch.

    x_ref: (1, K, HW)   im2col patches (HW, the large dim, on the lane axis)
    w_ref: (Cout, K)    flattened PyTorch OIHW weight
    b_ref: (Cout, 1)
    o_ref: (1, Cout, HW)
    """
    x = x_ref[0]                                                     # (K, HW)
    y = jnp.dot(w_ref[...], x, preferred_element_type=jnp.float32)   # (Cout, HW)
    y = y + b_ref[...]
    if apply_norm:
        # InstanceNorm2d: per-(batch, channel) stats over HW; biased variance.
        mean = jnp.mean(y, axis=1, keepdims=True)                    # lane reduce
        cen = y - mean
        var = jnp.mean(cen * cen, axis=1, keepdims=True)
        y = cen * jax.lax.rsqrt(var + eps)
    if apply_act:
        y = jnp.where(y >= 0.0, y, negative_slope * y)
    o_ref[0] = y.astype(o_ref.dtype)


def _conv_in_lrelu_final_kernel(x_ref, w_ref, b_ref, w5_ref, b5_ref, o_ref, *,
                                eps, negative_slope):
    """Last (conv + InstanceNorm + LeakyReLU) fused with the final 4x4 'valid'
    conv that produces the single PatchGAN logit.

    x_ref:  (1, K, 16)  patches of the penultimate conv (4x4 spatial output)
    w_ref:  (C, K), b_ref: (C, 1)
    w5_ref: (C, 16)     final conv weight flattened over (kh, kw)
    b5_ref: (1, 1)
    o_ref:  (1, 1, 1)   one logit per batch element
    """
    x = x_ref[0]                                                     # (K, 16)
    y = jnp.dot(w_ref[...], x, preferred_element_type=jnp.float32)   # (C, 16)
    y = y + b_ref[...]
    mean = jnp.mean(y, axis=1, keepdims=True)
    cen = y - mean
    var = jnp.mean(cen * cen, axis=1, keepdims=True)
    y = cen * jax.lax.rsqrt(var + eps)
    y = jnp.where(y >= 0.0, y, negative_slope * y)
    # Conv2d(C, 1, 4, stride=1, pad=0) on a 4x4 map == full dot product.
    prod = y * w5_ref[...]                                           # (C, 16)
    s = jnp.sum(prod, axis=1, keepdims=True)                         # (C, 1)
    s = jnp.sum(s, axis=0, keepdims=True)                            # (1, 1)
    o_ref[0] = s + b5_ref[...]


# ---------------------------------------------------------------------------
# Plain-JAX glue: NCHW im2col with PyTorch (Cin, kh, kw) ordering
# ---------------------------------------------------------------------------

def im2col_nchw(x, k, stride, pad):
    """x: (B, C, H, W) -> patches (B, C*k*k, Ho*Wo); K ordered (C, kh, kw),
    matching w_oihw.reshape(Cout, C*k*k)."""
    B, C, H, W = x.shape
    if pad > 0:
        x = jnp.pad(x, ((0, 0), (0, 0), (pad, pad), (pad, pad)))
    Ho = (H + 2 * pad - k) // stride + 1
    Wo = (W + 2 * pad - k) // stride + 1
    taps = []
    for i in range(k):
        for j in range(k):
            taps.append(x[:, :, i:i + stride * Ho:stride,
                          j:j + stride * Wo:stride])
    patches = jnp.stack(taps, axis=2)               # (B, C, k*k, Ho, Wo)
    return patches.reshape(B, C * k * k, Ho * Wo), Ho, Wo


# ---------------------------------------------------------------------------
# Layer wrappers
# ---------------------------------------------------------------------------

def conv_layer(x_img, w_oihw, b, *, stride, pad, apply_norm, apply_act):
    """One Conv2d (+InstanceNorm) (+LeakyReLU) layer, fused in a single
    pallas_call with grid over batch.  x_img: (B, Cin, H, W) NCHW."""
    B = x_img.shape[0]
    Cout, Cin, kh, kw = w_oihw.shape
    patches, Ho, Wo = im2col_nchw(x_img, kh, stride, pad)   # (B, K, HW)
    K, HW = Cin * kh * kw, Ho * Wo
    w2d = w_oihw.reshape(Cout, K)
    b2d = b.reshape(Cout, 1)

    kern = functools.partial(_conv_in_lrelu_kernel, apply_norm=apply_norm,
                             apply_act=apply_act, eps=_IN_EPS,
                             negative_slope=_NEG_SLOPE)
    out = pl.pallas_call(
        kern,
        out_shape=jax.ShapeDtypeStruct((B, Cout, HW), jnp.float32),
        grid_spec=pltpu.PrefetchScalarGridSpec(
            num_scalar_prefetch=0,
            grid=(B,),
            in_specs=[
                pl.BlockSpec((1, K, HW), lambda bi: (bi, 0, 0)),
                pl.BlockSpec((Cout, K), lambda bi: (0, 0)),
                pl.BlockSpec((Cout, 1), lambda bi: (0, 0)),
            ],
            out_specs=pl.BlockSpec((1, Cout, HW), lambda bi: (bi, 0, 0)),
        ),
        compiler_params=pltpu.CompilerParams(
            dimension_semantics=("parallel",),
            vmem_limit_bytes=_VMEM_LIMIT_BYTES),
    )(patches, w2d, b2d)
    return out.reshape(B, Cout, Ho, Wo)


def conv_in_lrelu_final(x_img, w4, b4, w5, b5):
    """Last stride-2 conv + InstanceNorm + LeakyReLU fused with the final
    Conv2d(C, 1, 4, 1, 0).  Returns (B,) logits."""
    B = x_img.shape[0]
    C4out, C4in, kh, kw = w4.shape
    C5out, C5in, kh5, kw5 = w5.shape
    assert C5out == 1 and C5in == C4out
    patches, Ho, Wo = im2col_nchw(x_img, kh, 2, 1)          # (B, K, HW)
    # The final 4x4 valid conv must see exactly a (kh5, kw5) spatial map so the
    # reference's x.view(B, -1).squeeze(1) yields shape (B,).
    assert (Ho, Wo) == (kh5, kw5), (
        f"final conv expects {kh5}x{kw5} spatial input, got {Ho}x{Wo}; "
        "input H/W must be 128 for this architecture")
    K, HW = C4in * kh * kw, Ho * Wo
    w4_2d = w4.reshape(C4out, K)
    b4_2d = b4.reshape(C4out, 1)
    w5_2d = w5.reshape(C4out, kh5 * kw5)                    # (C, 16)
    b5_2d = b5.reshape(1, 1)

    kern = functools.partial(_conv_in_lrelu_final_kernel, eps=_IN_EPS,
                             negative_slope=_NEG_SLOPE)
    out = pl.pallas_call(
        kern,
        out_shape=jax.ShapeDtypeStruct((B, 1, 1), jnp.float32),
        grid_spec=pltpu.PrefetchScalarGridSpec(
            num_scalar_prefetch=0,
            grid=(B,),
            in_specs=[
                pl.BlockSpec((1, K, HW), lambda bi: (bi, 0, 0)),
                pl.BlockSpec((C4out, K), lambda bi: (0, 0)),
                pl.BlockSpec((C4out, 1), lambda bi: (0, 0)),
                pl.BlockSpec((C4out, HW), lambda bi: (0, 0)),
                pl.BlockSpec((1, 1), lambda bi: (0, 0)),
            ],
            out_specs=pl.BlockSpec((1, 1, 1), lambda bi: (bi, 0, 0)),
        ),
        compiler_params=pltpu.CompilerParams(
            dimension_semantics=("parallel",),
            vmem_limit_bytes=_VMEM_LIMIT_BYTES),
    )(patches, w4_2d, b4_2d, w5_2d, b5_2d)
    return out.reshape(B)


# ---------------------------------------------------------------------------
# _netD parameters and forward
# ---------------------------------------------------------------------------

def init_netd_params(key, nc, ndf):
    """Deterministic conv weights/biases, PyTorch-like uniform init."""
    layer_io = [
        (nc * 2, ndf), (ndf, ndf * 2), (ndf * 2, ndf * 4),
        (ndf * 4, ndf * 8), (ndf * 8, ndf * 16), (ndf * 16, 1),
    ]
    params = []
    for (cin, cout) in layer_io:
        key, kw_, kb_ = jax.random.split(key, 3)
        fan_in = cin * 4 * 4
        bound = 1.0 / jnp.sqrt(fan_in)
        w = jax.random.uniform(kw_, (cout, cin, 4, 4), jnp.float32,
                               -bound, bound)
        b = jax.random.uniform(kb_, (cout,), jnp.float32, -bound, bound)
        params.append((w, b))
    return params


def netd_forward(params, src, des):
    """src, des: NCHW float32 (B, nc, H, W).  Returns (B,) logits
    (reference has no Sigmoid; x.view(B,-1).squeeze(1) on a 1x1 patch)."""
    x = jnp.concatenate([src, des], axis=1)          # (B, 2*nc, H, W)

    # layer 0: conv -> LeakyReLU (no instance norm)
    w0, b0 = params[0]
    x = conv_layer(x, w0, b0, stride=2, pad=1, apply_norm=False,
                   apply_act=True)

    # layers 1..3: conv -> InstanceNorm -> LeakyReLU (each fused in one call)
    for (w, b) in params[1:4]:
        x = conv_layer(x, w, b, stride=2, pad=1, apply_norm=True,
                       apply_act=True)

    # layer 4 (conv -> IN -> LReLU) fused with final conv (stride 1, no pad)
    (w4, b4), (w5, b5) = params[4], params[5]
    return conv_in_lrelu_final(x, w4, b4, w5, b5)    # (B,)


# ---------------------------------------------------------------------------
# main
# ---------------------------------------------------------------------------

if __name__ == "__main__":
    # args: nc=2, ndf=4 (small synthetic config).  Spatial 128 is the minimum
    # for which 5 stride-2 convs + final 4x4 valid conv yield a 1x1 patch.
    nc, ndf = 2, 4
    B, H, W = 2, 128, 128

    key = jax.random.PRNGKey(0)
    kp, ks, kd = jax.random.split(key, 3)
    params = init_netd_params(kp, nc, ndf)
    src = jax.random.normal(ks, (B, nc, H, W), jnp.float32)
    des = jax.random.normal(kd, (B, nc, H, W), jnp.float32)

    fwd = jax.jit(netd_forward)
    out = fwd(params, src, des)
    out = jax.block_until_ready(out)
    assert out.shape == (B,), out.shape
    assert bool(jnp.all(jnp.isfinite(out)))
    print("KERNEL_OK")
</pallas_src>

<mosaic_0001>
module attributes {stable_mosaic.version = 11 : i64} {
  func.func @_conv_in_lrelu_kernel(%arg0: i32, %arg1: memref<1x64x4096xf32, #tpu.memory_space<vmem>>, %arg2: memref<4x64xf32, #tpu.memory_space<vmem>>, %arg3: memref<4x1xf32, #tpu.memory_space<vmem>>, %arg4: memref<1x4x4096xf32, #tpu.memory_space<vmem>>) attributes {dimension_semantics = [#tpu.dimension_semantics<parallel>], iteration_bounds = array<i64: 2>, scalar_prefetch = 0 : i64, scratch_operands = 0 : i64, tpu.core_type = #tpu.core_type<tc>, window_params = [{transform_indices = @transform_0, window_bounds = array<i64: 1, 64, 4096>}, {pipeline_mode = #tpu.pipeline_mode<synchronous>, transform_indices = @transform_1, window_bounds = array<i64: 4, 64>}, {pipeline_mode = #tpu.pipeline_mode<synchronous>, transform_indices = @transform_2, window_bounds = array<i64: 4, 1>}, {transform_indices = @transform_3, window_bounds = array<i64: 1, 4, 4096>}]} {
    %c0 = arith.constant 0 : index
    %c0_0 = arith.constant 0 : index
    %c0_1 = arith.constant 0 : index
    %0 = vector.load %arg1[%c0, %c0_0, %c0_1] : memref<1x64x4096xf32, #tpu.memory_space<vmem>>, vector<1x64x4096xf32>
    %1 = vector.shape_cast %0 : vector<1x64x4096xf32> to vector<64x4096xf32>
    %c0_2 = arith.constant 0 : index
    %c0_3 = arith.constant 0 : index
    %2 = vector.load %arg2[%c0_2, %c0_3] : memref<4x64xf32, #tpu.memory_space<vmem>>, vector<4x64xf32>
    %cst = arith.constant dense<0.000000e+00> : vector<4x4096xf32>
    %3 = tpu.matmul %2, %1, %cst {dimension_numbers = #tpu.dot_dimension_numbers<[1], [0], [0], [1], [0, 0, 1, 1], [], []>} : vector<4x64xf32>, vector<64x4096xf32>, vector<4x4096xf32> -> vector<4x4096xf32>
    %c0_4 = arith.constant 0 : index
    %c0_5 = arith.constant 0 : index
    %4 = vector.load %arg3[%c0_4, %c0_5] : memref<4x1xf32, #tpu.memory_space<vmem>>, vector<4x1xf32>
    %5 = vector.broadcast %4 : vector<4x1xf32> to vector<4x4096xf32>
    %6 = arith.addf %3, %5 : vector<4x4096xf32>
    %cst_6 = arith.constant 0.000000e+00 : f32
    %7 = vector.broadcast %cst_6 : f32 to vector<4x4096xf32>
    %8 = arith.cmpf oge, %6, %7 : vector<4x4096xf32>
    %cst_7 = arith.constant 2.000000e-01 : f32
    %9 = vector.broadcast %cst_7 : f32 to vector<4x4096xf32>
    %10 = arith.mulf %9, %6 : vector<4x4096xf32>
    %11 = arith.select %8, %6, %10 : vector<4x4096xi1>, vector<4x4096xf32>
    %c0_8 = arith.constant 0 : index
    %c0_9 = arith.constant 0 : index
    %c0_10 = arith.constant 0 : index
    %12 = vector.load %arg4[%c0_8, %c0_9, %c0_10] : memref<1x4x4096xf32, #tpu.memory_space<vmem>>, vector<1x4x4096xf32>
    %13 = vector.shape_cast %12 : vector<1x4x4096xf32> to vector<4x4096xf32>
    %14 = vector.shape_cast %11 : vector<4x4096xf32> to vector<1x4x4096xf32>
    tpu.vector_store %arg4[%c0_8, %c0_9, %c0_10], %14 {strides = array<i32>} : memref<1x4x4096xf32, #tpu.memory_space<vmem>>, vector<1x4x4096xf32>,
    return
  }
  func.func @transform_0(%arg0: i32) -> (i32, i32, i32) {
    %c0_i32 = arith.constant 0 : i32
    %c0_i32_0 = arith.constant 0 : i32
    %c0_i32_1 = arith.constant 0 : i32
    return %arg0, %c0_i32, %c0_i32_0 : i32, i32, i32
  }
  func.func @transform_1(%arg0: i32) -> (i32, i32) {
    %c0_i32 = arith.constant 0 : i32
    %c0_i32_0 = arith.constant 0 : i32
    %c0_i32_1 = arith.constant 0 : i32
    return %c0_i32, %c0_i32_0 : i32, i32
  }
  func.func @transform_2(%arg0: i32) -> (i32, i32) {
    %c0_i32 = arith.constant 0 : i32
    %c0_i32_0 = arith.constant 0 : i32
    %c0_i32_1 = arith.constant 0 : i32
    return %c0_i32, %c0_i32_0 : i32, i32
  }
  func.func @transform_3(%arg0: i32) -> (i32, i32, i32) {
    %c0_i32 = arith.constant 0 : i32
    %c0_i32_0 = arith.constant 0 : i32
    %c0_i32_1 = arith.constant 0 : i32
    return %arg0, %c0_i32, %c0_i32_0 : i32, i32, i32
  }
}

module attributes {stable_mosaic.version = 11 : i64} {
  func.func @_conv_in_lrelu_kernel(%arg0: i32, %arg1: memref<1x64x1024xf32, #tpu.memory_space<vmem>>, %arg2: memref<8x64xf32, #tpu.memory_space<vmem>>, %arg3: memref<8x1xf32, #tpu.memory_space<vmem>>, %arg4: memref<1x8x1024xf32, #tpu.memory_space<vmem>>) attributes {dimension_semantics = [#tpu.dimension_semantics<parallel>], iteration_bounds = array<i64: 2>, scalar_prefetch = 0 : i64, scratch_operands = 0 : i64, tpu.core_type = #tpu.core_type<tc>, window_params = [{transform_indices = @transform_0, window_bounds = array<i64: 1, 64, 1024>}, {pipeline_mode = #tpu.pipeline_mode<synchronous>, transform_indices = @transform_1, window_bounds = array<i64: 8, 64>}, {pipeline_mode = #tpu.pipeline_mode<synchronous>, transform_indices = @transform_2, window_bounds = array<i64: 8, 1>}, {transform_indices = @transform_3, window_bounds = array<i64: 1, 8, 1024>}]} {
    %c0 = arith.constant 0 : index
    %c0_0 = arith.constant 0 : index
    %c0_1 = arith.constant 0 : index
    %0 = vector.load %arg1[%c0, %c0_0, %c0_1] : memref<1x64x1024xf32, #tpu.memory_space<vmem>>, vector<1x64x1024xf32>
    %1 = vector.shape_cast %0 : vector<1x64x1024xf32> to vector<64x1024xf32>
    %c0_2 = arith.constant 0 : index
    %c0_3 = arith.constant 0 : index
    %2 = vector.load %arg2[%c0_2, %c0_3] : memref<8x64xf32, #tpu.memory_space<vmem>>, vector<8x64xf32>
    %cst = arith.constant dense<0.000000e+00> : vector<8x1024xf32>
    %3 = tpu.matmul %2, %1, %cst {dimension_numbers = #tpu.dot_dimension_numbers<[1], [0], [0], [1], [0, 0, 1, 1], [], []>} : vector<8x64xf32>, vector<64x1024xf32>, vector<8x1024xf32> -> vector<8x1024xf32>
    %c0_4 = arith.constant 0 : index
    %c0_5 = arith.constant 0 : index
    %4 = vector.load %arg3[%c0_4, %c0_5] : memref<8x1xf32, #tpu.memory_space<vmem>>, vector<8x1xf32>
    %5 = vector.broadcast %4 : vector<8x1xf32> to vector<8x1024xf32>
    %6 = arith.addf %3, %5 : vector<8x1024xf32>
    %cst_6 = arith.constant dense<0.000000e+00> : vector<8xf32>
    %7 = vector.multi_reduction <add>, %6, %cst_6 [1] : vector<8x1024xf32> to vector<8xf32>
    %8 = vector.shape_cast %7 : vector<8xf32> to vector<8x1xf32>
    %cst_7 = arith.constant 1.024000e+03 : f32
    %9 = vector.broadcast %cst_7 : f32 to vector<8x1xf32>
    %10 = arith.divf %8, %9 : vector<8x1xf32>
    %11 = vector.broadcast %10 : vector<8x1xf32> to vector<8x1024xf32>
    %12 = arith.subf %6, %11 : vector<8x1024xf32>
    %13 = arith.mulf %12, %12 : vector<8x1024xf32>
    %cst_8 = arith.constant dense<0.000000e+00> : vector<8xf32>
    %14 = vector.multi_reduction <add>, %13, %cst_8 [1] : vector<8x1024xf32> to vector<8xf32>
    %15 = vector.shape_cast %14 : vector<8xf32> to vector<8x1xf32>
    %cst_9 = arith.constant 1.024000e+03 : f32
    %16 = vector.broadcast %cst_9 : f32 to vector<8x1xf32>
    %17 = arith.divf %15, %16 : vector<8x1xf32>
    %cst_10 = arith.constant 9.99999974E-6 : f32
    %18 = vector.broadcast %cst_10 : f32 to vector<8x1xf32>
    %19 = arith.addf %17, %18 : vector<8x1xf32>
    %20 = math.rsqrt %19 : vector<8x1xf32>
    %21 = vector.broadcast %20 : vector<8x1xf32> to vector<8x1024xf32>
    %22 = arith.mulf %12, %21 : vector<8x1024xf32>
    %cst_11 = arith.constant 0.000000e+00 : f32
    %23 = vector.broadcast %cst_11 : f32 to vector<8x1024xf32>
    %24 = arith.cmpf oge, %22, %23 : vector<8x1024xf32>
    %cst_12 = arith.constant 2.000000e-01 : f32
    %25 = vector.broadcast %cst_12 : f32 to vector<8x1024xf32>
    %26 = arith.mulf %25, %22 : vector<8x1024xf32>
    %27 = arith.select %24, %22, %26 : vector<8x1024xi1>, vector<8x1024xf32>
    %c0_13 = arith.constant 0 : index
    %c0_14 = arith.constant 0 : index
    %c0_15 = arith.constant 0 : index
    %28 = vector.load %arg4[%c0_13, %c0_14, %c0_15] : memref<1x8x1024xf32, #tpu.memory_space<vmem>>, vector<1x8x1024xf32>
    %29 = vector.shape_cast %28 : vector<1x8x1024xf32> to vector<8x1024xf32>
    %30 = vector.shape_cast %27 : vector<8x1024xf32> to vector<1x8x1024xf32>
    tpu.vector_store %arg4[%c0_13, %c0_14, %c0_15], %30 {strides = array<i32>} : memref<1x8x1024xf32, #tpu.memory_space<vmem>>, vector<1x8x1024xf32>,
    return
  }
  func.func @transform_0(%arg0: i32) -> (i32, i32, i32) {
    %c0_i32 = arith.constant 0 : i32
    %c0_i32_0 = arith.constant 0 : i32
    %c0_i32_1 = arith.constant 0 : i32
    return %arg0, %c0_i32, %c0_i32_0 : i32, i32, i32
  }
  func.func @transform_1(%arg0: i32) -> (i32, i32) {
    %c0_i32 = arith.constant 0 : i32
    %c0_i32_0 = arith.constant 0 : i32
    %c0_i32_1 = arith.constant 0 : i32
    return %c0_i32, %c0_i32_0 : i32, i32
  }
  func.func @transform_2(%arg0: i32) -> (i32, i32) {
    %c0_i32 = arith.constant 0 : i32
    %c0_i32_0 = arith.constant 0 : i32
    %c0_i32_1 = arith.constant 0 : i32
    return %c0_i32, %c0_i32_0 : i32, i32
  }
  func.func @transform_3(%arg0: i32) -> (i32, i32, i32) {
    %c0_i32 = arith.constant 0 : i32
    %c0_i32_0 = arith.constant 0 : i32
    %c0_i32_1 = arith.constant 0 : i32
    return %arg0, %c0_i32, %c0_i32_0 : i32, i32, i32
  }
}

module attributes {stable_mosaic.version = 11 : i64} {
  func.func @_conv_in_lrelu_kernel(%arg0: i32, %arg1: memref<1x128x256xf32, #tpu.memory_space<vmem>>, %arg2: memref<16x128xf32, #tpu.memory_space<vmem>>, %arg3: memref<16x1xf32, #tpu.memory_space<vmem>>, %arg4: memref<1x16x256xf32, #tpu.memory_space<vmem>>) attributes {dimension_semantics = [#tpu.dimension_semantics<parallel>], iteration_bounds = array<i64: 2>, scalar_prefetch = 0 : i64, scratch_operands = 0 : i64, tpu.core_type = #tpu.core_type<tc>, window_params = [{transform_indices = @transform_0, window_bounds = array<i64: 1, 128, 256>}, {pipeline_mode = #tpu.pipeline_mode<synchronous>, transform_indices = @transform_1, window_bounds = array<i64: 16, 128>}, {pipeline_mode = #tpu.pipeline_mode<synchronous>, transform_indices = @transform_2, window_bounds = array<i64: 16, 1>}, {transform_indices = @transform_3, window_bounds = array<i64: 1, 16, 256>}]} {
    %c0 = arith.constant 0 : index
    %c0_0 = arith.constant 0 : index
    %c0_1 = arith.constant 0 : index
    %0 = vector.load %arg1[%c0, %c0_0, %c0_1] : memref<1x128x256xf32, #tpu.memory_space<vmem>>, vector<1x128x256xf32>
    %1 = vector.shape_cast %0 : vector<1x128x256xf32> to vector<128x256xf32>
    %c0_2 = arith.constant 0 : index
    %c0_3 = arith.constant 0 : index
    %2 = vector.load %arg2[%c0_2, %c0_3] : memref<16x128xf32, #tpu.memory_space<vmem>>, vector<16x128xf32>
    %cst = arith.constant dense<0.000000e+00> : vector<16x256xf32>
    %3 = tpu.matmul %2, %1, %cst {dimension_numbers = #tpu.dot_dimension_numbers<[1], [0], [0], [1], [0, 0, 1, 1], [], []>} : vector<16x128xf32>, vector<128x256xf32>, vector<16x256xf32> -> vector<16x256xf32>
    %c0_4 = arith.constant 0 : index
    %c0_5 = arith.constant 0 : index
    %4 = vector.load %arg3[%c0_4, %c0_5] : memref<16x1xf32, #tpu.memory_space<vmem>>, vector<16x1xf32>
    %5 = vector.broadcast %4 : vector<16x1xf32> to vector<16x256xf32>
    %6 = arith.addf %3, %5 : vector<16x256xf32>
    %cst_6 = arith.constant dense<0.000000e+00> : vector<16xf32>
    %7 = vector.multi_reduction <add>, %6, %cst_6 [1] : vector<16x256xf32> to vector<16xf32>
    %8 = vector.shape_cast %7 : vector<16xf32> to vector<16x1xf32>
    %cst_7 = arith.constant 2.560000e+02 : f32
    %9 = vector.broadcast %cst_7 : f32 to vector<16x1xf32>
    %10 = arith.divf %8, %9 : vector<16x1xf32>
    %11 = vector.broadcast %10 : vector<16x1xf32> to vector<16x256xf32>
    %12 = arith.subf %6, %11 : vector<16x256xf32>
    %13 = arith.mulf %12, %12 : vector<16x256xf32>
    %cst_8 = arith.constant dense<0.000000e+00> : vector<16xf32>
    %14 = vector.multi_reduction <add>, %13, %cst_8 [1] : vector<16x256xf32> to vector<16xf32>
    %15 = vector.shape_cast %14 : vector<16xf32> to vector<16x1xf32>
    %cst_9 = arith.constant 2.560000e+02 : f32
    %16 = vector.broadcast %cst_9 : f32 to vector<16x1xf32>
    %17 = arith.divf %15, %16 : vector<16x1xf32>
    %cst_10 = arith.constant 9.99999974E-6 : f32
    %18 = vector.broadcast %cst_10 : f32 to vector<16x1xf32>
    %19 = arith.addf %17, %18 : vector<16x1xf32>
    %20 = math.rsqrt %19 : vector<16x1xf32>
    %21 = vector.broadcast %20 : vector<16x1xf32> to vector<16x256xf32>
    %22 = arith.mulf %12, %21 : vector<16x256xf32>
    %cst_11 = arith.constant 0.000000e+00 : f32
    %23 = vector.broadcast %cst_11 : f32 to vector<16x256xf32>
    %24 = arith.cmpf oge, %22, %23 : vector<16x256xf32>
    %cst_12 = arith.constant 2.000000e-01 : f32
    %25 = vector.broadcast %cst_12 : f32 to vector<16x256xf32>
    %26 = arith.mulf %25, %22 : vector<16x256xf32>
    %27 = arith.select %24, %22, %26 : vector<16x256xi1>, vector<16x256xf32>
    %c0_13 = arith.constant 0 : index
    %c0_14 = arith.constant 0 : index
    %c0_15 = arith.constant 0 : index
    %28 = vector.load %arg4[%c0_13, %c0_14, %c0_15] : memref<1x16x256xf32, #tpu.memory_space<vmem>>, vector<1x16x256xf32>
    %29 = vector.shape_cast %28 : vector<1x16x256xf32> to vector<16x256xf32>
    %30 = vector.shape_cast %27 : vector<16x256xf32> to vector<1x16x256xf32>
    tpu.vector_store %arg4[%c0_13, %c0_14, %c0_15], %30 {strides = array<i32>} : memref<1x16x256xf32, #tpu.memory_space<vmem>>, vector<1x16x256xf32>,
    return
  }
  func.func @transform_0(%arg0: i32) -> (i32, i32, i32) {
    %c0_i32 = arith.constant 0 : i32
    %c0_i32_0 = arith.constant 0 : i32
    %c0_i32_1 = arith.constant 0 : i32
    return %arg0, %c0_i32, %c0_i32_0 : i32, i32, i32
  }
  func.func @transform_1(%arg0: i32) -> (i32, i32) {
    %c0_i32 = arith.constant 0 : i32
    %c0_i32_0 = arith.constant 0 : i32
    %c0_i32_1 = arith.constant 0 : i32
    return %c0_i32, %c0_i32_0 : i32, i32
  }
  func.func @transform_2(%arg0: i32) -> (i32, i32) {
    %c0_i32 = arith.constant 0 : i32
    %c0_i32_0 = arith.constant 0 : i32
    %c0_i32_1 = arith.constant 0 : i32
    return %c0_i32, %c0_i32_0 : i32, i32
  }
  func.func @transform_3(%arg0: i32) -> (i32, i32, i32) {
    %c0_i32 = arith.constant 0 : i32
    %c0_i32_0 = arith.constant 0 : i32
    %c0_i32_1 = arith.constant 0 : i32
    return %arg0, %c0_i32, %c0_i32_0 : i32, i32, i32
  }
}

module attributes {stable_mosaic.version = 11 : i64} {
  func.func @_conv_in_lrelu_kernel(%arg0: i32, %arg1: memref<1x256x64xf32, #tpu.memory_space<vmem>>, %arg2: memref<32x256xf32, #tpu.memory_space<vmem>>, %arg3: memref<32x1xf32, #tpu.memory_space<vmem>>, %arg4: memref<1x32x64xf32, #tpu.memory_space<vmem>>) attributes {dimension_semantics = [#tpu.dimension_semantics<parallel>], iteration_bounds = array<i64: 2>, scalar_prefetch = 0 : i64, scratch_operands = 0 : i64, tpu.core_type = #tpu.core_type<tc>, window_params = [{transform_indices = @transform_0, window_bounds = array<i64: 1, 256, 64>}, {pipeline_mode = #tpu.pipeline_mode<synchronous>, transform_indices = @transform_1, window_bounds = array<i64: 32, 256>}, {pipeline_mode = #tpu.pipeline_mode<synchronous>, transform_indices = @transform_2, window_bounds = array<i64: 32, 1>}, {transform_indices = @transform_3, window_bounds = array<i64: 1, 32, 64>}]} {
    %c0 = arith.constant 0 : index
    %c0_0 = arith.constant 0 : index
    %c0_1 = arith.constant 0 : index
    %0 = vector.load %arg1[%c0, %c0_0, %c0_1] : memref<1x256x64xf32, #tpu.memory_space<vmem>>, vector<1x256x64xf32>
    %1 = vector.shape_cast %0 : vector<1x256x64xf32> to vector<256x64xf32>
    %c0_2 = arith.constant 0 : index
    %c0_3 = arith.constant 0 : index
    %2 = vector.load %arg2[%c0_2, %c0_3] : memref<32x256xf32, #tpu.memory_space<vmem>>, vector<32x256xf32>
    %cst = arith.constant dense<0.000000e+00> : vector<32x64xf32>
    %3 = tpu.matmul %2, %1, %cst {dimension_numbers = #tpu.dot_dimension_numbers<[1], [0], [0], [1], [0, 0, 1, 1], [], []>} : vector<32x256xf32>, vector<256x64xf32>, vector<32x64xf32> -> vector<32x64xf32>
    %c0_4 = arith.constant 0 : index
    %c0_5 = arith.constant 0 : index
    %4 = vector.load %arg3[%c0_4, %c0_5] : memref<32x1xf32, #tpu.memory_space<vmem>>, vector<32x1xf32>
    %5 = vector.broadcast %4 : vector<32x1xf32> to vector<32x64xf32>
    %6 = arith.addf %3, %5 : vector<32x64xf32>
    %cst_6 = arith.constant dense<0.000000e+00> : vector<32xf32>
    %7 = vector.multi_reduction <add>, %6, %cst_6 [1] : vector<32x64xf32> to vector<32xf32>
    %8 = vector.shape_cast %7 : vector<32xf32> to vector<32x1xf32>
    %cst_7 = arith.constant 6.400000e+01 : f32
    %9 = vector.broadcast %cst_7 : f32 to vector<32x1xf32>
    %10 = arith.divf %8, %9 : vector<32x1xf32>
    %11 = vector.broadcast %10 : vector<32x1xf32> to vector<32x64xf32>
    %12 = arith.subf %6, %11 : vector<32x64xf32>
    %13 = arith.mulf %12, %12 : vector<32x64xf32>
    %cst_8 = arith.constant dense<0.000000e+00> : vector<32xf32>
    %14 = vector.multi_reduction <add>, %13, %cst_8 [1] : vector<32x64xf32> to vector<32xf32>
    %15 = vector.shape_cast %14 : vector<32xf32> to vector<32x1xf32>
    %cst_9 = arith.constant 6.400000e+01 : f32
    %16 = vector.broadcast %cst_9 : f32 to vector<32x1xf32>
    %17 = arith.divf %15, %16 : vector<32x1xf32>
    %cst_10 = arith.constant 9.99999974E-6 : f32
    %18 = vector.broadcast %cst_10 : f32 to vector<32x1xf32>
    %19 = arith.addf %17, %18 : vector<32x1xf32>
    %20 = math.rsqrt %19 : vector<32x1xf32>
    %21 = vector.broadcast %20 : vector<32x1xf32> to vector<32x64xf32>
    %22 = arith.mulf %12, %21 : vector<32x64xf32>
    %cst_11 = arith.constant 0.000000e+00 : f32
    %23 = vector.broadcast %cst_11 : f32 to vector<32x64xf32>
    %24 = arith.cmpf oge, %22, %23 : vector<32x64xf32>
    %cst_12 = arith.constant 2.000000e-01 : f32
    %25 = vector.broadcast %cst_12 : f32 to vector<32x64xf32>
    %26 = arith.mulf %25, %22 : vector<32x64xf32>
    %27 = arith.select %24, %22, %26 : vector<32x64xi1>, vector<32x64xf32>
    %c0_13 = arith.constant 0 : index
    %c0_14 = arith.constant 0 : index
    %c0_15 = arith.constant 0 : index
    %28 = vector.load %arg4[%c0_13, %c0_14, %c0_15] : memref<1x32x64xf32, #tpu.memory_space<vmem>>, vector<1x32x64xf32>
    %29 = vector.shape_cast %28 : vector<1x32x64xf32> to vector<32x64xf32>
    %30 = vector.shape_cast %27 : vector<32x64xf32> to vector<1x32x64xf32>
    tpu.vector_store %arg4[%c0_13, %c0_14, %c0_15], %30 {strides = array<i32>} : memref<1x32x64xf32, #tpu.memory_space<vmem>>, vector<1x32x64xf32>,
    return
  }
  func.func @transform_0(%arg0: i32) -> (i32, i32, i32) {
    %c0_i32 = arith.constant 0 : i32
    %c0_i32_0 = arith.constant 0 : i32
    %c0_i32_1 = arith.constant 0 : i32
    return %arg0, %c0_i32, %c0_i32_0 : i32, i32, i32
  }
  func.func @transform_1(%arg0: i32) -> (i32, i32) {
    %c0_i32 = arith.constant 0 : i32
    %c0_i32_0 = arith.constant 0 : i32
    %c0_i32_1 = arith.constant 0 : i32
    return %c0_i32, %c0_i32_0 : i32, i32
  }
  func.func @transform_2(%arg0: i32) -> (i32, i32) {
    %c0_i32 = arith.constant 0 : i32
    %c0_i32_0 = arith.constant 0 : i32
    %c0_i32_1 = arith.constant 0 : i32
    return %c0_i32, %c0_i32_0 : i32, i32
  }
  func.func @transform_3(%arg0: i32) -> (i32, i32, i32) {
    %c0_i32 = arith.constant 0 : i32
    %c0_i32_0 = arith.constant 0 : i32
    %c0_i32_1 = arith.constant 0 : i32
    return %arg0, %c0_i32, %c0_i32_0 : i32, i32, i32
  }
}

module attributes {stable_mosaic.version = 11 : i64} {
  func.func @_conv_in_lrelu_final_kernel(%arg0: i32, %arg1: memref<1x512x16xf32, #tpu.memory_space<vmem>>, %arg2: memref<64x512xf32, #tpu.memory_space<vmem>>, %arg3: memref<64x1xf32, #tpu.memory_space<vmem>>, %arg4: memref<64x16xf32, #tpu.memory_space<vmem>>, %arg5: memref<1x1xf32, #tpu.memory_space<vmem>>, %arg6: memref<1x1x1xf32, #tpu.memory_space<vmem>>) attributes {dimension_semantics = [#tpu.dimension_semantics<parallel>], iteration_bounds = array<i64: 2>, scalar_prefetch = 0 : i64, scratch_operands = 0 : i64, tpu.core_type = #tpu.core_type<tc>, window_params = [{transform_indices = @transform_0, window_bounds = array<i64: 1, 512, 16>}, {pipeline_mode = #tpu.pipeline_mode<synchronous>, transform_indices = @transform_1, window_bounds = array<i64: 64, 512>}, {pipeline_mode = #tpu.pipeline_mode<synchronous>, transform_indices = @transform_2, window_bounds = array<i64: 64, 1>}, {pipeline_mode = #tpu.pipeline_mode<synchronous>, transform_indices = @transform_3, window_bounds = array<i64: 64, 16>}, {pipeline_mode = #tpu.pipeline_mode<synchronous>, transform_indices = @transform_4, window_bounds = array<i64: 1, 1>}, {transform_indices = @transform_5, window_bounds = array<i64: 1, 1, 1>}]} {
    %c0 = arith.constant 0 : index
    %c0_0 = arith.constant 0 : index
    %c0_1 = arith.constant 0 : index
    %0 = vector.load %arg1[%c0, %c0_0, %c0_1] : memref<1x512x16xf32, #tpu.memory_space<vmem>>, vector<1x512x16xf32>
    %1 = vector.shape_cast %0 : vector<1x512x16xf32> to vector<512x16xf32>
    %c0_2 = arith.constant 0 : index
    %c0_3 = arith.constant 0 : index
    %2 = vector.load %arg2[%c0_2, %c0_3] : memref<64x512xf32, #tpu.memory_space<vmem>>, vector<64x512xf32>
    %cst = arith.constant dense<0.000000e+00> : vector<64x16xf32>
    %3 = tpu.matmul %2, %1, %cst {dimension_numbers = #tpu.dot_dimension_numbers<[1], [0], [0], [1], [0, 0, 1, 1], [], []>} : vector<64x512xf32>, vector<512x16xf32>, vector<64x16xf32> -> vector<64x16xf32>
    %c0_4 = arith.constant 0 : index
    %c0_5 = arith.constant 0 : index
    %4 = vector.load %arg3[%c0_4, %c0_5] : memref<64x1xf32, #tpu.memory_space<vmem>>, vector<64x1xf32>
    %5 = vector.broadcast %4 : vector<64x1xf32> to vector<64x16xf32>
    %6 = arith.addf %3, %5 : vector<64x16xf32>
    %cst_6 = arith.constant dense<0.000000e+00> : vector<64xf32>
    %7 = vector.multi_reduction <add>, %6, %cst_6 [1] : vector<64x16xf32> to vector<64xf32>
    %8 = vector.shape_cast %7 : vector<64xf32> to vector<64x1xf32>
    %cst_7 = arith.constant 1.600000e+01 : f32
    %9 = vector.broadcast %cst_7 : f32 to vector<64x1xf32>
    %10 = arith.divf %8, %9 : vector<64x1xf32>
    %11 = vector.broadcast %10 : vector<64x1xf32> to vector<64x16xf32>
    %12 = arith.subf %6, %11 : vector<64x16xf32>
    %13 = arith.mulf %12, %12 : vector<64x16xf32>
    %cst_8 = arith.constant dense<0.000000e+00> : vector<64xf32>
    %14 = vector.multi_reduction <add>, %13, %cst_8 [1] : vector<64x16xf32> to vector<64xf32>
    %15 = vector.shape_cast %14 : vector<64xf32> to vector<64x1xf32>
    %cst_9 = arith.constant 1.600000e+01 : f32
    %16 = vector.broadcast %cst_9 : f32 to vector<64x1xf32>
    %17 = arith.divf %15, %16 : vector<64x1xf32>
    %cst_10 = arith.constant 9.99999974E-6 : f32
    %18 = vector.broadcast %cst_10 : f32 to vector<64x1xf32>
    %19 = arith.addf %17, %18 : vector<64x1xf32>
    %20 = math.rsqrt %19 : vector<64x1xf32>
    %21 = vector.broadcast %20 : vector<64x1xf32> to vector<64x16xf32>
    %22 = arith.mulf %12, %21 : vector<64x16xf32>
    %cst_11 = arith.constant 0.000000e+00 : f32
    %23 = vector.broadcast %cst_11 : f32 to vector<64x16xf32>
    %24 = arith.cmpf oge, %22, %23 : vector<64x16xf32>
    %cst_12 = arith.constant 2.000000e-01 : f32
    %25 = vector.broadcast %cst_12 : f32 to vector<64x16xf32>
    %26 = arith.mulf %25, %22 : vector<64x16xf32>
    %27 = arith.select %24, %22, %26 : vector<64x16xi1>, vector<64x16xf32>
    %c0_13 = arith.constant 0 : index
    %c0_14 = arith.constant 0 : index
    %28 = vector.load %arg4[%c0_13, %c0_14] : memref<64x16xf32, #tpu.memory_space<vmem>>, vector<64x16xf32>
    %29 = arith.mulf %27, %28 : vector<64x16xf32>
    %cst_15 = arith.constant dense<0.000000e+00> : vector<64xf32>
    %30 = vector.multi_reduction <add>, %29, %cst_15 [1] : vector<64x16xf32> to vector<64xf32>
    %31 = vector.shape_cast %30 : vector<64xf32> to vector<64x1xf32>
    %cst_16 = arith.constant dense<0.000000e+00> : vector<1xf32>
    %32 = vector.multi_reduction <add>, %31, %cst_16 [0] : vector<64x1xf32> to vector<1xf32>
    %33 = vector.shape_cast %32 : vector<1xf32> to vector<1x1xf32>
    %c0_17 = arith.constant 0 : index
    %c0_18 = arith.constant 0 : index
    %34 = vector.load %arg5[%c0_17, %c0_18] : memref<1x1xf32, #tpu.memory_space<vmem>>, vector<1x1xf32>
    %35 = arith.addf %33, %34 : vector<1x1xf32>
    %c0_19 = arith.constant 0 : index
    %c0_20 = arith.constant 0 : index
    %c0_21 = arith.constant 0 : index
    %36 = vector.load %arg6[%c0_19, %c0_20, %c0_21] : memref<1x1x1xf32, #tpu.memory_space<vmem>>, vector<1x1x1xf32>
    %37 = vector.shape_cast %36 : vector<1x1x1xf32> to vector<1x1xf32>
    %38 = vector.shape_cast %35 : vector<1x1xf32> to vector<1x1x1xf32>
    tpu.vector_store %arg6[%c0_19, %c0_20, %c0_21], %38 {strides = array<i32>} : memref<1x1x1xf32, #tpu.memory_space<vmem>>, vector<1x1x1xf32>,
    return
  }
  func.func @transform_0(%arg0: i32) -> (i32, i32, i32) {
    %c0_i32 = arith.constant 0 : i32
    %c0_i32_0 = arith.constant 0 : i32
    %c0_i32_1 = arith.constant 0 : i32
    return %arg0, %c0_i32, %c0_i32_0 : i32, i32, i32
  }
  func.func @transform_1(%arg0: i32) -> (i32, i32) {
    %c0_i32 = arith.constant 0 : i32
    %c0_i32_0 = arith.constant 0 : i32
    %c0_i32_1 = arith.constant 0 : i32
    return %c0_i32, %c0_i32_0 : i32, i32
  }
  func.func @transform_2(%arg0: i32) -> (i32, i32) {
    %c0_i32 = arith.constant 0 : i32
    %c0_i32_0 = arith.constant 0 : i32
    %c0_i32_1 = arith.constant 0 : i32
    return %c0_i32, %c0_i32_0 : i32, i32
  }
  func.func @transform_3(%arg0: i32) -> (i32, i32) {
    %c0_i32 = arith.constant 0 : i32
    %c0_i32_0 = arith.constant 0 : i32
    %c0_i32_1 = arith.constant 0 : i32
    return %c0_i32, %c0_i32_0 : i32, i32
  }
  func.func @transform_4(%arg0: i32) -> (i32, i32) {
    %c0_i32 = arith.constant 0 : i32
    %c0_i32_0 = arith.constant 0 : i32
    %c0_i32_1 = arith.constant 0 : i32
    return %c0_i32, %c0_i32_0 : i32, i32
  }
  func.func @transform_5(%arg0: i32) -> (i32, i32, i32) {
    %c0_i32 = arith.constant 0 : i32
    %c0_i32_0 = arith.constant 0 : i32
    %c0_i32_1 = arith.constant 0 : i32
    return %arg0, %c0_i32, %c0_i32_0 : i32, i32, i32
  }
}

</mosaic_0001>

<bundles_post_ra>
// kernel: netd_forward.5
= control target key start
LH: loop header
LB: loop body
LE: loop exit
PB: predicated region body
PF: predicated region fallthrough
CT: control target
= control target key end

     0   :  { %s1875_s12 = smov 0   ;;  %s2262_s0 = inlined_call_operand.vmem [shape: f32[2,64,4096], index: 0, kind: input, shape index: {}]   ;;  %s2263_s1 = inlined_call_operand.vmem [shape: f32[4,64], index: 1, kind: input, shape index: {}]   ;;  %s2264_s2 = inlined_call_operand.vmem [shape: f32[4,1], index: 2, kind: input, shape index: {}]   ;;  %s2265_s3 = inlined_call_operand.vmem [shape: f32[2,4,4096], index: 3, kind: output, shape index: {}]  }
   0x1 LB: > { %s1805_s13 = sadd.s32 4294967295, %s1851_s12   ;;  %p1809_p0 = scmp.ge.s32.totalorder %s1851_s12, 1  ;;  %s1851_s12 = sphi %s1875_s12, %s13_s12  }
   0x2   : > { %p137_p1 = scmp.lt.s32.totalorder %s1851_s12, 3 }
   0x4   : > { %p138_p2 = pnand %p1809_p0, %p137_p1 }
   0x5   : > { %p161_p3 = scmp.lt.s32.totalorder (!%p138_p2), %s1805_s13, 1 }
   0x6   : > { %141 = sbr.rel (%p138_p2) target bundleno = 360 (0x168), region = 32 }
   0xb   : > { %v1853_v0 = vmov 0.0   ;;  %v428_v1 = vld [vmem:[%s2264_s2] sm:$0xf]  ;;  %s2267_s13 = smov (!%p161_p3, %s1805_s13), 1  ;;  %v1854_v2 = vmov 0   ;;  %vm434_vm0 = vcmask 523264  }
   0xc   : > { %502 = vmatprep.mubr.f32.mxu0 %v1853_v0  ;;  %573 = vmatprep.mubr.f32.mxu1 %v1853_v0  ;;  %s1832_s16 = sshll.u32 %s2267_s13, 11  ;;  %v1931_v35 = vld [vmem:[%s2263_s1] sm:$0xf]  ;;  %s1833_s22 = sshll.u32 %s2267_s13, 7 }
   0xd   : > { %1844 = vset.pattern.permute.xlu0 %v1854_v2  ;;  %s1894_s19 = scalar_lea.vmem %s2262_s0, %s1832_s16  ;;  %s2213_s25 = scalar_lea.vmem %s2265_s3, %s1833_s22 }
   0xe   : > { %431 = vperm.xlu0 %1844, %v428_v1   ;;  %v396_v3 = vld [vmem:[%s1894_s19 + $0x708] sm:$0xff]  ;;  %v398_v4 = vld [vmem:[%s1894_s19 + $0x718] sm:$0xff]  ;;  %v395_v5 = vld [vmem:[%s1894_s19 + $0x700] sm:$0xff] }
   0xf   : > { %454 = vmatprep.subr.mxu0 %v396_v3  ;;  %525 = vmatprep.subr.mxu1 %v398_v4  ;;  %v397_v6 = vld [vmem:[%s1894_s19 + $0x710] sm:$0xff]  ;;  %v364_v7 = vld [vmem:[%s1894_s19 + $0x608] sm:$0xff]  ;;  %v366_v8 = vld [vmem:[%s1894_s19 + $0x618] sm:$0xff] }
  0x10   : > { %455 = vmatpush1.msra.mxu0 %v395_v5  ;;  %526 = vmatpush1.msra.mxu1 %v397_v6  ;;  %v363_v9 = vld [vmem:[%s1894_s19 + $0x600] sm:$0xff]  ;;  %v365_v10 = vld [vmem:[%s1894_s19 + $0x610] sm:$0xff]  ;;  %v332_v11 = vld [vmem:[%s1894_s19 + $0x508] sm:$0xff] }
  0x11   : > { %456 = vmatprep.subr.mxu0 %v364_v7  ;;  %527 = vmatprep.subr.mxu1 %v366_v8  ;;  %v334_v12 = vld [vmem:[%s1894_s19 + $0x518] sm:$0xff]  ;;  %v331_v13 = vld [vmem:[%s1894_s19 + $0x500] sm:$0xff]  ;;  %v333_v14 = vld [vmem:[%s1894_s19 + $0x510] sm:$0xff] }
  0x12   : > { %457 = vmatpush1.msra.mxu0 %v363_v9  ;;  %528 = vmatpush1.msra.mxu1 %v365_v10  ;;  %v300_v15 = vld [vmem:[%s1894_s19 + $0x408] sm:$0xff]  ;;  %v302_v16 = vld [vmem:[%s1894_s19 + $0x418] sm:$0xff]  ;;  %v299_v17 = vld [vmem:[%s1894_s19 + $0x400] sm:$0xff] }
  0x13   : > { %458 = vmatprep.subr.mxu0 %v332_v11  ;;  %529 = vmatprep.subr.mxu1 %v334_v12  ;;  %v301_v18 = vld [vmem:[%s1894_s19 + $0x410] sm:$0xff]  ;;  %v268_v19 = vld [vmem:[%s1894_s19 + $0x308] sm:$0xff]  ;;  %v270_v20 = vld [vmem:[%s1894_s19 + $0x318] sm:$0xff] }
  0x14   : > { %459 = vmatpush1.msra.mxu0 %v331_v13  ;;  %530 = vmatpush1.msra.mxu1 %v333_v14  ;;  %v267_v21 = vld [vmem:[%s1894_s19 + $0x300] sm:$0xff]  ;;  %v269_v22 = vld [vmem:[%s1894_s19 + $0x310] sm:$0xff]  ;;  %v236_v23 = vld [vmem:[%s1894_s19 + $0x208] sm:$0xff] }
  0x15   : > { %460 = vmatprep.subr.mxu0 %v300_v15  ;;  %531 = vmatprep.subr.mxu1 %v302_v16  ;;  %v238_v24 = vld [vmem:[%s1894_s19 + $0x218] sm:$0xff]  ;;  %v235_v25 = vld [vmem:[%s1894_s19 + $0x200] sm:$0xff]  ;;  %v237_v26 = vld [vmem:[%s1894_s19 + $0x210] sm:$0xff] }
  0x16   : > { %461 = vmatpush1.msra.mxu0 %v299_v17  ;;  %532 = vmatpush1.msra.mxu1 %v301_v18  ;;  %v204_v27 = vld [vmem:[%s1894_s19 + $0x108] sm:$0xff]  ;;  %v206_v28 = vld [vmem:[%s1894_s19 + $0x118] sm:$0xff]  ;;  %v203_v29 = vld [vmem:[%s1894_s19 + $0x100] sm:$0xff] }
  0x17   : > { %462 = vmatprep.subr.mxu0 %v268_v19  ;;  %533 = vmatprep.subr.mxu1 %v270_v20  ;;  %v205_v30 = vld [vmem:[%s1894_s19 + $0x110] sm:$0xff]  ;;  %v172_v31 = vld [vmem:[%s1894_s19 + $0x8] sm:$0xff]  ;;  %v174_v32 = vld [vmem:[%s1894_s19 + $0x18] sm:$0xff] }
  0x18   : > { %463 = vmatpush1.msra.mxu0 %v267_v21  ;;  %534 = vmatpush1.msra.mxu1 %v269_v22  ;;  %v171_v33 = vld [vmem:[%s1894_s19] sm:$0xff]  ;;  %v173_v34 = vld [vmem:[%s1894_s19 + $0x10] sm:$0xff]  ;;  %v400_v36 = vld [vmem:[%s1894_s19 + $0x728] sm:$0xff] }
  0x19   : > { %464 = vmatprep.subr.mxu0 %v236_v23  ;;  %535 = vmatprep.subr.mxu1 %v238_v24  ;;  %v402_v37 = vld [vmem:[%s1894_s19 + $0x738] sm:$0xff]  ;;  %v399_v38 = vld [vmem:[%s1894_s19 + $0x720] sm:$0xff]  ;;  %v401_v39 = vld [vmem:[%s1894_s19 + $0x730] sm:$0xff] }
  0x1a   : > { %465 = vmatpush1.msra.mxu0 %v235_v25  ;;  %536 = vmatpush1.msra.mxu1 %v237_v26  ;;  %v368_v40 = vld [vmem:[%s1894_s19 + $0x628] sm:$0xff]  ;;  %v370_v41 = vld [vmem:[%s1894_s19 + $0x638] sm:$0xff]  ;;  %v367_v42 = vld [vmem:[%s1894_s19 + $0x620] sm:$0xff] }
  0x1b   : > { %466 = vmatprep.subr.mxu0 %v204_v27  ;;  %537 = vmatprep.subr.mxu1 %v206_v28  ;;  %v369_v43 = vld [vmem:[%s1894_s19 + $0x630] sm:$0xff]  ;;  %v336_v44 = vld [vmem:[%s1894_s19 + $0x528] sm:$0xff]  ;;  %v338_v45 = vld [vmem:[%s1894_s19 + $0x538] sm:$0xff] }
  0x1c   : > { %467 = vmatpush1.msra.mxu0 %v203_v29  ;;  %538 = vmatpush1.msra.mxu1 %v205_v30  ;;  %v335_v46 = vld [vmem:[%s1894_s19 + $0x520] sm:$0xff]  ;;  %v337_v47 = vld [vmem:[%s1894_s19 + $0x530] sm:$0xff]  ;;  %v304_v48 = vld [vmem:[%s1894_s19 + $0x428] sm:$0xff] }
  0x1d   : > { %468 = vmatprep.subr.mxu0 %v172_v31  ;;  %539 = vmatprep.subr.mxu1 %v174_v32  ;;  %v306_v49 = vld [vmem:[%s1894_s19 + $0x438] sm:$0xff]  ;;  %v303_v50 = vld [vmem:[%s1894_s19 + $0x420] sm:$0xff]  ;;  %v305_v51 = vld [vmem:[%s1894_s19 + $0x430] sm:$0xff] }
  0x1e   : > { %469 = vmatpush1.msra.mxu0 %v171_v33  ;;  %540 = vmatpush1.msra.mxu1 %v173_v34  ;;  %v272_v52 = vld [vmem:[%s1894_s19 + $0x328] sm:$0xff]  ;;  %v274_v53 = vld [vmem:[%s1894_s19 + $0x338] sm:$0xff]  ;;  %v271_v54 = vld [vmem:[%s1894_s19 + $0x320] sm:$0xff] }
  0x1f   : > { %1814 = vmatmul.mubr.msk.f32.vlgmr.msra.gmra.mxu0 %vm434_vm0, %v1931_v35  ;;  %1815 = vmatmul.mubr.msk.f32.vlgmr.msra.gmra.mxu1 %vm434_vm0, %v1931_v35  ;;  %v273_v55 = vld [vmem:[%s1894_s19 + $0x330] sm:$0xff]  ;;  %v240_v56 = vld [vmem:[%s1894_s19 + $0x228] sm:$0xff]  ;;  %v242_v57 = vld [vmem:[%s1894_s19 + $0x238] sm:$0xff] }
  0x20   : > { %596 = vmatprep.subr.mxu0 %v400_v36  ;;  %667 = vmatprep.subr.mxu1 %v402_v37  ;;  %v239_v58 = vld [vmem:[%s1894_s19 + $0x220] sm:$0xff]  ;;  %v241_v59 = vld [vmem:[%s1894_s19 + $0x230] sm:$0xff]  ;;  %v208_v60 = vld [vmem:[%s1894_s19 + $0x128] sm:$0xff] }
  0x21   : > { %597 = vmatpush1.msra.mxu0 %v399_v38  ;;  %668 = vmatpush1.msra.mxu1 %v401_v39  ;;  %v210_v61 = vld [vmem:[%s1894_s19 + $0x138] sm:$0xff]  ;;  %v207_v62 = vld [vmem:[%s1894_s19 + $0x120] sm:$0xff]  ;;  %v209_v63 = vld [vmem:[%s1894_s19 + $0x130] sm:$0xff] }
  0x22   : > { %598 = vmatprep.subr.mxu0 %v368_v40  ;;  %669 = vmatprep.subr.mxu1 %v370_v41  ;;  %v176_v1 = vld [vmem:[%s1894_s19 + $0x28] sm:$0xff]  ;;  %v178_v2 = vld [vmem:[%s1894_s19 + $0x38] sm:$0xff]  ;;  %v175_v3 = vld [vmem:[%s1894_s19 + $0x20] sm:$0xff] }
  0x23   : > { %599 = vmatpush1.msra.mxu0 %v367_v42  ;;  %670 = vmatpush1.msra.mxu1 %v369_v43  ;;  %v177_v4 = vld [vmem:[%s1894_s19 + $0x30] sm:$0xff]  ;;  %v404_v5 = vld [vmem:[%s1894_s19 + $0x748] sm:$0xff]  ;;  %v406_v6 = vld [vmem:[%s1894_s19 + $0x758] sm:$0xff] }
  0x24   : > { %600 = vmatprep.subr.mxu0 %v336_v44  ;;  %671 = vmatprep.subr.mxu1 %v338_v45  ;;  %v403_v7 = vld [vmem:[%s1894_s19 + $0x740] sm:$0xff]  ;;  %v405_v8 = vld [vmem:[%s1894_s19 + $0x750] sm:$0xff]  ;;  %v372_v9 = vld [vmem:[%s1894_s19 + $0x648] sm:$0xff] }
  0x25   : > { %601 = vmatpush1.msra.mxu0 %v335_v46  ;;  %672 = vmatpush1.msra.mxu1 %v337_v47  ;;  %v374_v10 = vld [vmem:[%s1894_s19 + $0x658] sm:$0xff]  ;;  %v371_v11 = vld [vmem:[%s1894_s19 + $0x640] sm:$0xff]  ;;  %v373_v12 = vld [vmem:[%s1894_s19 + $0x650] sm:$0xff] }
  0x26   : > { %602 = vmatprep.subr.mxu0 %v304_v48  ;;  %673 = vmatprep.subr.mxu1 %v306_v49  ;;  %v340_v13 = vld [vmem:[%s1894_s19 + $0x548] sm:$0xff]  ;;  %v342_v14 = vld [vmem:[%s1894_s19 + $0x558] sm:$0xff]  ;;  %v339_v15 = vld [vmem:[%s1894_s19 + $0x540] sm:$0xff] }
  0x27   : > { %603 = vmatpush1.msra.mxu0 %v303_v50  ;;  %674 = vmatpush1.msra.mxu1 %v305_v51  ;;  %v341_v16 = vld [vmem:[%s1894_s19 + $0x550] sm:$0xff]  ;;  %v308_v17 = vld [vmem:[%s1894_s19 + $0x448] sm:$0xff]  ;;  %v310_v18 = vld [vmem:[%s1894_s19 + $0x458] sm:$0xff] }
  0x28   : > { %604 = vmatprep.subr.mxu0 %v272_v52  ;;  %675 = vmatprep.subr.mxu1 %v274_v53  ;;  %v307_v19 = vld [vmem:[%s1894_s19 + $0x440] sm:$0xff]  ;;  %v309_v20 = vld [vmem:[%s1894_s19 + $0x450] sm:$0xff]  ;;  %v276_v21 = vld [vmem:[%s1894_s19 + $0x348] sm:$0xff] }
  0x29   : > { %605 = vmatpush1.msra.mxu0 %v271_v54  ;;  %676 = vmatpush1.msra.mxu1 %v273_v55  ;;  %v278_v22 = vld [vmem:[%s1894_s19 + $0x358] sm:$0xff]  ;;  %v275_v23 = vld [vmem:[%s1894_s19 + $0x340] sm:$0xff]  ;;  %v277_v24 = vld [vmem:[%s1894_s19 + $0x350] sm:$0xff] }
  0x2a   : > { %606 = vmatprep.subr.mxu0 %v240_v56  ;;  %677 = vmatprep.subr.mxu1 %v242_v57  ;;  %v244_v25 = vld [vmem:[%s1894_s19 + $0x248] sm:$0xff]  ;;  %v246_v26 = vld [vmem:[%s1894_s19 + $0x258] sm:$0xff]  ;;  %v243_v27 = vld [vmem:[%s1894_s19 + $0x240] sm:$0xff] }
  0x2b   : > { %607 = vmatpush1.msra.mxu0 %v239_v58  ;;  %678 = vmatpush1.msra.mxu1 %v241_v59  ;;  %v245_v28 = vld [vmem:[%s1894_s19 + $0x250] sm:$0xff]  ;;  %v212_v29 = vld [vmem:[%s1894_s19 + $0x148] sm:$0xff]  ;;  %v214_v30 = vld [vmem:[%s1894_s19 + $0x158] sm:$0xff] }
  0x2c   : > { %608 = vmatprep.subr.mxu0 %v208_v60  ;;  %679 = vmatprep.subr.mxu1 %v210_v61  ;;  %v211_v31 = vld [vmem:[%s1894_s19 + $0x140] sm:$0xff]  ;;  %v213_v32 = vld [vmem:[%s1894_s19 + $0x150] sm:$0xff]  ;;  %v180_v33 = vld [vmem:[%s1894_s19 + $0x48] sm:$0xff] }
  0x2d   : > { %609 = vmatpush1.msra.mxu0 %v207_v62  ;;  %680 = vmatpush1.msra.mxu1 %v209_v63  ;;  %v182_v34 = vld [vmem:[%s1894_s19 + $0x58] sm:$0xff]  ;;  %v179_v36 = vld [vmem:[%s1894_s19 + $0x40] sm:$0xff]  ;;  %v181_v37 = vld [vmem:[%s1894_s19 + $0x50] sm:$0xff] }
  0x2e   : > { %610 = vmatprep.subr.mxu0 %v176_v1  ;;  %681 = vmatprep.subr.mxu1 %v178_v2  ;;  %v408_v38 = vld [vmem:[%s1894_s19 + $0x768] sm:$0xff]  ;;  %v410_v39 = vld [vmem:[%s1894_s19 + $0x778] sm:$0xff]  ;;  %v407_v40 = vld [vmem:[%s1894_s19 + $0x760] sm:$0xff] }
  0x2f   : > { %611 = vmatpush1.msra.mxu0 %v175_v3  ;;  %644 = vmatprep.mubr.f32.mxu0 %v1853_v0  ;;  %v409_v41 = vld [vmem:[%s1894_s19 + $0x770] sm:$0xff]  ;;  %v376_v42 = vld [vmem:[%s1894_s19 + $0x668] sm:$0xff]  ;;  %v378_v43 = vld [vmem:[%s1894_s19 + $0x678] sm:$0xff] }
  0x30   : > { %682 = vmatpush1.msra.mxu1 %v177_v4  ;;  %715 = vmatprep.mubr.f32.mxu1 %v1853_v0  ;;  %v375_v44 = vld [vmem:[%s1894_s19 + $0x660] sm:$0xff]  ;;  %v377_v45 = vld [vmem:[%s1894_s19 + $0x670] sm:$0xff]  ;;  %v344_v46 = vld [vmem:[%s1894_s19 + $0x568] sm:$0xff] }
  0x31   : > { %1816 = vmatmul.mubr.msk.f32.vlgmr.msra.gmra.mxu0 %vm434_vm0, %v1931_v35  ;;  %1817 = vmatmul.mubr.msk.f32.vlgmr.msra.gmra.mxu1 %vm434_vm0, %v1931_v35  ;;  %v346_v47 = vld [vmem:[%s1894_s19 + $0x578] sm:$0xff]  ;;  %v343_v48 = vld [vmem:[%s1894_s19 + $0x560] sm:$0xff]  ;;  %v345_v49 = vld [vmem:[%s1894_s19 + $0x570] sm:$0xff] }
  0x32   : > { %738 = vmatprep.subr.mxu0 %v404_v5  ;;  %809 = vmatprep.subr.mxu1 %v406_v6  ;;  %v312_v50 = vld [vmem:[%s1894_s19 + $0x468] sm:$0xff]  ;;  %v314_v51 = vld [vmem:[%s1894_s19 + $0x478] sm:$0xff]  ;;  %v311_v52 = vld [vmem:[%s1894_s19 + $0x460] sm:$0xff] }
  0x33   : > { %739 = vmatpush1.msra.mxu0 %v403_v7  ;;  %810 = vmatpush1.msra.mxu1 %v405_v8  ;;  %v313_v53 = vld [vmem:[%s1894_s19 + $0x470] sm:$0xff]  ;;  %v280_v54 = vld [vmem:[%s1894_s19 + $0x368] sm:$0xff]  ;;  %v282_v55 = vld [vmem:[%s1894_s19 + $0x378] sm:$0xff] }
  0x34   : > { %740 = vmatprep.subr.mxu0 %v372_v9  ;;  %811 = vmatprep.subr.mxu1 %v374_v10  ;;  %v279_v56 = vld [vmem:[%s1894_s19 + $0x360] sm:$0xff]  ;;  %v281_v57 = vld [vmem:[%s1894_s19 + $0x370] sm:$0xff]  ;;  %v248_v58 = vld [vmem:[%s1894_s19 + $0x268] sm:$0xff] }
  0x35   : > { %741 = vmatpush1.msra.mxu0 %v371_v11  ;;  %812 = vmatpush1.msra.mxu1 %v373_v12  ;;  %v250_v59 = vld [vmem:[%s1894_s19 + $0x278] sm:$0xff]  ;;  %v247_v60 = vld [vmem:[%s1894_s19 + $0x260] sm:$0xff]  ;;  %v249_v61 = vld [vmem:[%s1894_s19 + $0x270] sm:$0xff] }
  0x36   : > { %742 = vmatprep.subr.mxu0 %v340_v13  ;;  %813 = vmatprep.subr.mxu1 %v342_v14  ;;  %v216_v62 = vld [vmem:[%s1894_s19 + $0x168] sm:$0xff]  ;;  %v218_v63 = vld [vmem:[%s1894_s19 + $0x178] sm:$0xff]  ;;  %v215_v1 = vld [vmem:[%s1894_s19 + $0x160] sm:$0xff] }
  0x37   : > { %743 = vmatpush1.msra.mxu0 %v339_v15  ;;  %814 = vmatpush1.msra.mxu1 %v341_v16  ;;  %v217_v2 = vld [vmem:[%s1894_s19 + $0x170] sm:$0xff]  ;;  %v184_v3 = vld [vmem:[%s1894_s19 + $0x68] sm:$0xff]  ;;  %v186_v4 = vld [vmem:[%s1894_s19 + $0x78] sm:$0xff] }
  0x38   : > { %744 = vmatprep.subr.mxu0 %v308_v17  ;;  %815 = vmatprep.subr.mxu1 %v310_v18  ;;  %v183_v5 = vld [vmem:[%s1894_s19 + $0x60] sm:$0xff]  ;;  %v185_v6 = vld [vmem:[%s1894_s19 + $0x70] sm:$0xff]  ;;  %v412_v7 = vld [vmem:[%s1894_s19 + $0x788] sm:$0xff] }
  0x39   : > { %745 = vmatpush1.msra.mxu0 %v307_v19  ;;  %816 = vmatpush1.msra.mxu1 %v309_v20  ;;  %v414_v8 = vld [vmem:[%s1894_s19 + $0x798] sm:$0xff]  ;;  %v411_v9 = vld [vmem:[%s1894_s19 + $0x780] sm:$0xff]  ;;  %v413_v10 = vld [vmem:[%s1894_s19 + $0x790] sm:$0xff] }
  0x3a   : > { %746 = vmatprep.subr.mxu0 %v276_v21  ;;  %817 = vmatprep.subr.mxu1 %v278_v22  ;;  %v380_v11 = vld [vmem:[%s1894_s19 + $0x688] sm:$0xff]  ;;  %v382_v12 = vld [vmem:[%s1894_s19 + $0x698] sm:$0xff]  ;;  %v379_v13 = vld [vmem:[%s1894_s19 + $0x680] sm:$0xff] }
  0x3b   : > { %747 = vmatpush1.msra.mxu0 %v275_v23  ;;  %818 = vmatpush1.msra.mxu1 %v277_v24  ;;  %v381_v14 = vld [vmem:[%s1894_s19 + $0x690] sm:$0xff]  ;;  %v348_v15 = vld [vmem:[%s1894_s19 + $0x588] sm:$0xff]  ;;  %v350_v16 = vld [vmem:[%s1894_s19 + $0x598] sm:$0xff] }
  0x3c   : > { %748 = vmatprep.subr.mxu0 %v244_v25  ;;  %819 = vmatprep.subr.mxu1 %v246_v26  ;;  %v347_v17 = vld [vmem:[%s1894_s19 + $0x580] sm:$0xff]  ;;  %v349_v18 = vld [vmem:[%s1894_s19 + $0x590] sm:$0xff]  ;;  %v316_v19 = vld [vmem:[%s1894_s19 + $0x488] sm:$0xff] }
  0x3d   : > { %749 = vmatpush1.msra.mxu0 %v243_v27  ;;  %820 = vmatpush1.msra.mxu1 %v245_v28  ;;  %v318_v20 = vld [vmem:[%s1894_s19 + $0x498] sm:$0xff]  ;;  %v315_v21 = vld [vmem:[%s1894_s19 + $0x480] sm:$0xff]  ;;  %v317_v22 = vld [vmem:[%s1894_s19 + $0x490] sm:$0xff] }
  0x3e   : > { %750 = vmatprep.subr.mxu0 %v212_v29  ;;  %821 = vmatprep.subr.mxu1 %v214_v30  ;;  %v284_v23 = vld [vmem:[%s1894_s19 + $0x388] sm:$0xff]  ;;  %v286_v24 = vld [vmem:[%s1894_s19 + $0x398] sm:$0xff]  ;;  %v283_v25 = vld [vmem:[%s1894_s19 + $0x380] sm:$0xff] }
  0x3f   : > { %751 = vmatpush1.msra.mxu0 %v211_v31  ;;  %822 = vmatpush1.msra.mxu1 %v213_v32  ;;  %v285_v26 = vld [vmem:[%s1894_s19 + $0x390] sm:$0xff]  ;;  %v252_v27 = vld [vmem:[%s1894_s19 + $0x288] sm:$0xff]  ;;  %v254_v28 = vld [vmem:[%s1894_s19 + $0x298] sm:$0xff] }
  0x40   : > { %752 = vmatprep.subr.mxu0 %v180_v33  ;;  %823 = vmatprep.subr.mxu1 %v182_v34  ;;  %v251_v29 = vld [vmem:[%s1894_s19 + $0x280] sm:$0xff]  ;;  %v253_v30 = vld [vmem:[%s1894_s19 + $0x290] sm:$0xff]  ;;  %v220_v31 = vld [vmem:[%s1894_s19 + $0x188] sm:$0xff] }
  0x41   : > { %753 = vmatpush1.msra.mxu0 %v179_v36  ;;  %786 = vmatprep.mubr.f32.mxu0 %v1853_v0  ;;  %v222_v32 = vld [vmem:[%s1894_s19 + $0x198] sm:$0xff]  ;;  %v219_v33 = vld [vmem:[%s1894_s19 + $0x180] sm:$0xff]  ;;  %v221_v34 = vld [vmem:[%s1894_s19 + $0x190] sm:$0xff] }
  0x42   : > { %824 = vmatpush1.msra.mxu1 %v181_v37  ;;  %857 = vmatprep.mubr.f32.mxu1 %v1853_v0  ;;  %v188_v36 = vld [vmem:[%s1894_s19 + $0x88] sm:$0xff]  ;;  %v190_v37 = vld [vmem:[%s1894_s19 + $0x98] sm:$0xff] }
  0x43   : > { %1818 = vmatmul.mubr.msk.f32.vlgmr.msra.gmra.mxu0 %vm434_vm0, %v1931_v35  ;;  %1819 = vmatmul.mubr.msk.f32.vlgmr.msra.gmra.mxu1 %vm434_vm0, %v1931_v35 }
  0x44   : > { %880 = vmatprep.subr.mxu0 %v408_v38  ;;  %951 = vmatprep.subr.mxu1 %v410_v39  ;;  %v187_v38 = vld [vmem:[%s1894_s19 + $0x80] sm:$0xff]  ;;  %v189_v39 = vld [vmem:[%s1894_s19 + $0x90] sm:$0xff] }
  0x45   : > { %881 = vmatpush1.msra.mxu0 %v407_v40  ;;  %952 = vmatpush1.msra.mxu1 %v409_v41  ;;  %v416_v40 = vld [vmem:[%s1894_s19 + $0x7a8] sm:$0xff]  ;;  %v418_v41 = vld [vmem:[%s1894_s19 + $0x7b8] sm:$0xff] }
  0x46   : > { %882 = vmatprep.subr.mxu0 %v376_v42  ;;  %953 = vmatprep.subr.mxu1 %v378_v43  ;;  %v415_v42 = vld [vmem:[%s1894_s19 + $0x7a0] sm:$0xff]  ;;  %v417_v43 = vld [vmem:[%s1894_s19 + $0x7b0] sm:$0xff] }
  0x47   : > { %883 = vmatpush1.msra.mxu0 %v375_v44  ;;  %954 = vmatpush1.msra.mxu1 %v377_v45  ;;  %v384_v44 = vld [vmem:[%s1894_s19 + $0x6a8] sm:$0xff]  ;;  %v386_v45 = vld [vmem:[%s1894_s19 + $0x6b8] sm:$0xff] }
  0x48   : > { %884 = vmatprep.subr.mxu0 %v344_v46  ;;  %955 = vmatprep.subr.mxu1 %v346_v47  ;;  %v383_v46 = vld [vmem:[%s1894_s19 + $0x6a0] sm:$0xff]  ;;  %v385_v47 = vld [vmem:[%s1894_s19 + $0x6b0] sm:$0xff] }
  0x49   : > { %885 = vmatpush1.msra.mxu0 %v343_v48  ;;  %956 = vmatpush1.msra.mxu1 %v345_v49  ;;  %v352_v48 = vld [vmem:[%s1894_s19 + $0x5a8] sm:$0xff]  ;;  %v354_v49 = vld [vmem:[%s1894_s19 + $0x5b8] sm:$0xff] }
  0x4a   : > { %886 = vmatprep.subr.mxu0 %v312_v50  ;;  %957 = vmatprep.subr.mxu1 %v314_v51  ;;  %v351_v50 = vld [vmem:[%s1894_s19 + $0x5a0] sm:$0xff]  ;;  %v353_v51 = vld [vmem:[%s1894_s19 + $0x5b0] sm:$0xff] }
  0x4b   : > { %887 = vmatpush1.msra.mxu0 %v311_v52  ;;  %958 = vmatpush1.msra.mxu1 %v313_v53  ;;  %v320_v52 = vld [vmem:[%s1894_s19 + $0x4a8] sm:$0xff]  ;;  %v322_v53 = vld [vmem:[%s1894_s19 + $0x4b8] sm:$0xff] }
  0x4c   : > { %888 = vmatprep.subr.mxu0 %v280_v54  ;;  %959 = vmatprep.subr.mxu1 %v282_v55  ;;  %v319_v54 = vld [vmem:[%s1894_s19 + $0x4a0] sm:$0xff]  ;;  %v321_v55 = vld [vmem:[%s1894_s19 + $0x4b0] sm:$0xff] }
  0x4d   : > { %889 = vmatpush1.msra.mxu0 %v279_v56  ;;  %960 = vmatpush1.msra.mxu1 %v281_v57  ;;  %v288_v56 = vld [vmem:[%s1894_s19 + $0x3a8] sm:$0xff]  ;;  %v290_v57 = vld [vmem:[%s1894_s19 + $0x3b8] sm:$0xff] }
  0x4e   : > { %890 = vmatprep.subr.mxu0 %v248_v58  ;;  %961 = vmatprep.subr.mxu1 %v250_v59  ;;  %v287_v58 = vld [vmem:[%s1894_s19 + $0x3a0] sm:$0xff]  ;;  %v289_v59 = vld [vmem:[%s1894_s19 + $0x3b0] sm:$0xff] }
  0x4f   : > { %891 = vmatpush1.msra.mxu0 %v247_v60  ;;  %962 = vmatpush1.msra.mxu1 %v249_v61  ;;  %v256_v60 = vld [vmem:[%s1894_s19 + $0x2a8] sm:$0xff]  ;;  %v258_v61 = vld [vmem:[%s1894_s19 + $0x2b8] sm:$0xff] }
  0x50   : > { %892 = vmatprep.subr.mxu0 %v216_v62  ;;  %963 = vmatprep.subr.mxu1 %v218_v63  ;;  %v255_v62 = vld [vmem:[%s1894_s19 + $0x2a0] sm:$0xff]  ;;  %v257_v63 = vld [vmem:[%s1894_s19 + $0x2b0] sm:$0xff] }
  0x51   : > { %893 = vmatpush1.msra.mxu0 %v215_v1  ;;  %964 = vmatpush1.msra.mxu1 %v217_v2  ;;  %v224_v1 = vld [vmem:[%s1894_s19 + $0x1a8] sm:$0xff]  ;;  %v226_v2 = vld [vmem:[%s1894_s19 + $0x1b8] sm:$0xff] }
  0x52   : > { %894 = vmatprep.subr.mxu0 %v184_v3  ;;  %965 = vmatprep.subr.mxu1 %v186_v4  ;;  %v223_v3 = vld [vmem:[%s1894_s19 + $0x1a0] sm:$0xff]  ;;  %v225_v4 = vld [vmem:[%s1894_s19 + $0x1b0] sm:$0xff] }
  0x53   : > { %895 = vmatpush1.msra.mxu0 %v183_v5  ;;  %928 = vmatprep.mubr.f32.mxu0 %v1853_v0  ;;  %v192_v5 = vld [vmem:[%s1894_s19 + $0xa8] sm:$0xff] }
  0x54   : > { %966 = vmatpush1.msra.mxu1 %v185_v6  ;;  %999 = vmatprep.mubr.f32.mxu1 %v1853_v0  ;;  %v194_v6 = vld [vmem:[%s1894_s19 + $0xb8] sm:$0xff] }
  0x55   : > { %1820 = vmatmul.mubr.msk.f32.vlgmr.msra.gmra.mxu0 %vm434_vm0, %v1931_v35  ;;  %1821 = vmatmul.mubr.msk.f32.vlgmr.msra.gmra.mxu1 %vm434_vm0, %v1931_v35 }
  0x56   : > { %1022 = vmatprep.subr.mxu0 %v412_v7  ;;  %1093 = vmatprep.subr.mxu1 %v414_v8  ;;  %v191_v7 = vld [vmem:[%s1894_s19 + $0xa0] sm:$0xff]  ;;  %v193_v8 = vld [vmem:[%s1894_s19 + $0xb0] sm:$0xff] }
  0x57   : > { %1023 = vmatpush1.msra.mxu0 %v411_v9  ;;  %1094 = vmatpush1.msra.mxu1 %v413_v10  ;;  %v420_v9 = vld [vmem:[%s1894_s19 + $0x7c8] sm:$0xff]  ;;  %v422_v10 = vld [vmem:[%s1894_s19 + $0x7d8] sm:$0xff] }
  0x58   : > { %1024 = vmatprep.subr.mxu0 %v380_v11  ;;  %1095 = vmatprep.subr.mxu1 %v382_v12  ;;  %v419_v11 = vld [vmem:[%s1894_s19 + $0x7c0] sm:$0xff]  ;;  %v421_v12 = vld [vmem:[%s1894_s19 + $0x7d0] sm:$0xff] }
  0x59   : > { %1025 = vmatpush1.msra.mxu0 %v379_v13  ;;  %1096 = vmatpush1.msra.mxu1 %v381_v14  ;;  %v388_v13 = vld [vmem:[%s1894_s19 + $0x6c8] sm:$0xff]  ;;  %v390_v14 = vld [vmem:[%s1894_s19 + $0x6d8] sm:$0xff] }
  0x5a   : > { %1026 = vmatprep.subr.mxu0 %v348_v15  ;;  %1097 = vmatprep.subr.mxu1 %v350_v16  ;;  %v387_v15 = vld [vmem:[%s1894_s19 + $0x6c0] sm:$0xff]  ;;  %v389_v16 = vld [vmem:[%s1894_s19 + $0x6d0] sm:$0xff] }
  0x5b   : > { %1027 = vmatpush1.msra.mxu0 %v347_v17  ;;  %1098 = vmatpush1.msra.mxu1 %v349_v18  ;;  %v356_v17 = vld [vmem:[%s1894_s19 + $0x5c8] sm:$0xff]  ;;  %v358_v18 = vld [vmem:[%s1894_s19 + $0x5d8] sm:$0xff] }
  0x5c   : > { %1028 = vmatprep.subr.mxu0 %v316_v19  ;;  %1099 = vmatprep.subr.mxu1 %v318_v20  ;;  %v355_v19 = vld [vmem:[%s1894_s19 + $0x5c0] sm:$0xff]  ;;  %v357_v20 = vld [vmem:[%s1894_s19 + $0x5d0] sm:$0xff] }
  0x5d   : > { %1029 = vmatpush1.msra.mxu0 %v315_v21  ;;  %1100 = vmatpush1.msra.mxu1 %v317_v22  ;;  %v324_v21 = vld [vmem:[%s1894_s19 + $0x4c8] sm:$0xff]  ;;  %v326_v22 = vld [vmem:[%s1894_s19 + $0x4d8] sm:$0xff] }
  0x5e   : > { %1030 = vmatprep.subr.mxu0 %v284_v23  ;;  %1101 = vmatprep.subr.mxu1 %v286_v24  ;;  %v323_v23 = vld [vmem:[%s1894_s19 + $0x4c0] sm:$0xff]  ;;  %v325_v24 = vld [vmem:[%s1894_s19 + $0x4d0] sm:$0xff] }
  0x5f   : > { %1031 = vmatpush1.msra.mxu0 %v283_v25  ;;  %1102 = vmatpush1.msra.mxu1 %v285_v26  ;;  %v292_v25 = vld [vmem:[%s1894_s19 + $0x3c8] sm:$0xff]  ;;  %v294_v26 = vld [vmem:[%s1894_s19 + $0x3d8] sm:$0xff] }
  0x60   : > { %1032 = vmatprep.subr.mxu0 %v252_v27  ;;  %1103 = vmatprep.subr.mxu1 %v254_v28  ;;  %v291_v27 = vld [vmem:[%s1894_s19 + $0x3c0] sm:$0xff]  ;;  %v293_v28 = vld [vmem:[%s1894_s19 + $0x3d0] sm:$0xff] }
  0x61   : > { %1033 = vmatpush1.msra.mxu0 %v251_v29  ;;  %1104 = vmatpush1.msra.mxu1 %v253_v30  ;;  %v260_v29 = vld [vmem:[%s1894_s19 + $0x2c8] sm:$0xff]  ;;  %v262_v30 = vld [vmem:[%s1894_s19 + $0x2d8] sm:$0xff] }
  0x62   : > { %1034 = vmatprep.subr.mxu0 %v220_v31  ;;  %1105 = vmatprep.subr.mxu1 %v222_v32  ;;  %v259_v31 = vld [vmem:[%s1894_s19 + $0x2c0] sm:$0xff]  ;;  %v261_v32 = vld [vmem:[%s1894_s19 + $0x2d0] sm:$0xff] }
  0x63   : > { %1035 = vmatpush1.msra.mxu0 %v219_v33  ;;  %1106 = vmatpush1.msra.mxu1 %v221_v34  ;;  %v228_v33 = vld [vmem:[%s1894_s19 + $0x1c8] sm:$0xff]  ;;  %v230_v34 = vld [vmem:[%s1894_s19 + $0x1d8] sm:$0xff] }
  0x64   : > { %1036 = vmatprep.subr.mxu0 %v188_v36  ;;  %1107 = vmatprep.subr.mxu1 %v190_v37  ;;  %v227_v36 = vld [vmem:[%s1894_s19 + $0x1c0] sm:$0xff]  ;;  %v229_v37 = vld [vmem:[%s1894_s19 + $0x1d0] sm:$0xff] }
  0x65   : > { %1037 = vmatpush1.msra.mxu0 %v187_v38  ;;  %1070 = vmatprep.mubr.f32.mxu0 %v1853_v0  ;;  %v196_v38 = vld [vmem:[%s1894_s19 + $0xc8] sm:$0xff] }
  0x66   : > { %1108 = vmatpush1.msra.mxu1 %v189_v39  ;;  %1141 = vmatprep.mubr.f32.mxu1 %v1853_v0  ;;  %v198_v39 = vld [vmem:[%s1894_s19 + $0xd8] sm:$0xff] }
  0x67   : > { %1822 = vmatmul.mubr.msk.f32.vlgmr.msra.gmra.mxu0 %vm434_vm0, %v1931_v35  ;;  %1823 = vmatmul.mubr.msk.f32.vlgmr.msra.gmra.mxu1 %vm434_vm0, %v1931_v35 }
  0x68   : > { %1164 = vmatprep.subr.mxu0 %v416_v40  ;;  %1235 = vmatprep.subr.mxu1 %v418_v41  ;;  %v195_v40 = vld [vmem:[%s1894_s19 + $0xc0] sm:$0xff]  ;;  %v197_v41 = vld [vmem:[%s1894_s19 + $0xd0] sm:$0xff] }
  0x69   : > { %1165 = vmatpush1.msra.mxu0 %v415_v42  ;;  %1236 = vmatpush1.msra.mxu1 %v417_v43  ;;  %v424_v42 = vld [vmem:[%s1894_s19 + $0x7e8] sm:$0xff]  ;;  %v426_v43 = vld [vmem:[%s1894_s19 + $0x7f8] sm:$0xff] }
  0x6a   : > { %1166 = vmatprep.subr.mxu0 %v384_v44  ;;  %1237 = vmatprep.subr.mxu1 %v386_v45  ;;  %v423_v44 = vld [vmem:[%s1894_s19 + $0x7e0] sm:$0xff]  ;;  %v425_v45 = vld [vmem:[%s1894_s19 + $0x7f0] sm:$0xff] }
  0x6b   : > { %1167 = vmatpush1.msra.mxu0 %v383_v46  ;;  %1238 = vmatpush1.msra.mxu1 %v385_v47  ;;  %v392_v46 = vld [vmem:[%s1894_s19 + $0x6e8] sm:$0xff]  ;;  %v394_v47 = vld [vmem:[%s1894_s19 + $0x6f8] sm:$0xff] }
  0x6c   : > { %1168 = vmatprep.subr.mxu0 %v352_v48  ;;  %1239 = vmatprep.subr.mxu1 %v354_v49  ;;  %v391_v48 = vld [vmem:[%s1894_s19 + $0x6e0] sm:$0xff]  ;;  %v393_v49 = vld [vmem:[%s1894_s19 + $0x6f0] sm:$0xff] }
  0x6d   : > { %1169 = vmatpush1.msra.mxu0 %v351_v50  ;;  %1240 = vmatpush1.msra.mxu1 %v353_v51  ;;  %v360_v50 = vld [vmem:[%s1894_s19 + $0x5e8] sm:$0xff]  ;;  %v362_v51 = vld [vmem:[%s1894_s19 + $0x5f8] sm:$0xff] }
  0x6e   : > { %1170 = vmatprep.subr.mxu0 %v320_v52  ;;  %1241 = vmatprep.subr.mxu1 %v322_v53  ;;  %v359_v52 = vld [vmem:[%s1894_s19 + $0x5e0] sm:$0xff]  ;;  %v361_v53 = vld [vmem:[%s1894_s19 + $0x5f0] sm:$0xff] }
  0x6f   : > { %1171 = vmatpush1.msra.mxu0 %v319_v54  ;;  %1242 = vmatpush1.msra.mxu1 %v321_v55  ;;  %v328_v54 = vld [vmem:[%s1894_s19 + $0x4e8] sm:$0xff]  ;;  %v330_v55 = vld [vmem:[%s1894_s19 + $0x4f8] sm:$0xff] }
  0x70   : > { %1172 = vmatprep.subr.mxu0 %v288_v56  ;;  %1243 = vmatprep.subr.mxu1 %v290_v57  ;;  %v327_v56 = vld [vmem:[%s1894_s19 + $0x4e0] sm:$0xff]  ;;  %v329_v57 = vld [vmem:[%s1894_s19 + $0x4f0] sm:$0xff] }
  0x71   : > { %1173 = vmatpush1.msra.mxu0 %v287_v58  ;;  %1244 = vmatpush1.msra.mxu1 %v289_v59  ;;  %v296_v58 = vld [vmem:[%s1894_s19 + $0x3e8] sm:$0xff]  ;;  %v298_v59 = vld [vmem:[%s1894_s19 + $0x3f8] sm:$0xff] }
  0x72   : > { %1174 = vmatprep.subr.mxu0 %v256_v60  ;;  %1245 = vmatprep.subr.mxu1 %v258_v61  ;;  %v295_v60 = vld [vmem:[%s1894_s19 + $0x3e0] sm:$0xff]  ;;  %v297_v61 = vld [vmem:[%s1894_s19 + $0x3f0] sm:$0xff] }
  0x73   : > { %1175 = vmatpush1.msra.mxu0 %v255_v62  ;;  %1246 = vmatpush1.msra.mxu1 %v257_v63  ;;  %v264_v62 = vld [vmem:[%s1894_s19 + $0x2e8] sm:$0xff]  ;;  %v266_v63 = vld [vmem:[%s1894_s19 + $0x2f8] sm:$0xff] }
  0x74   : > { %1176 = vmatprep.subr.mxu0 %v224_v1  ;;  %1247 = vmatprep.subr.mxu1 %v226_v2  ;;  %v263_v1 = vld [vmem:[%s1894_s19 + $0x2e0] sm:$0xff]  ;;  %v265_v2 = vld [vmem:[%s1894_s19 + $0x2f0] sm:$0xff] }
  0x75   : > { %1177 = vmatpush1.msra.mxu0 %v223_v3  ;;  %1248 = vmatpush1.msra.mxu1 %v225_v4  ;;  %v232_v3 = vld [vmem:[%s1894_s19 + $0x1e8] sm:$0xff]  ;;  %v234_v4 = vld [vmem:[%s1894_s19 + $0x1f8] sm:$0xff] }
  0x76   : > { %1178 = vmatprep.subr.mxu0 %v192_v5  ;;  %1249 = vmatprep.subr.mxu1 %v194_v6  ;;  %v231_v5 = vld [vmem:[%s1894_s19 + $0x1e0] sm:$0xff]  ;;  %v233_v6 = vld [vmem:[%s1894_s19 + $0x1f0] sm:$0xff] }
  0x77   : > { %1179 = vmatpush1.msra.mxu0 %v191_v7  ;;  %1212 = vmatprep.mubr.f32.mxu0 %v1853_v0  ;;  %v200_v7 = vld [vmem:[%s1894_s19 + $0xe8] sm:$0xff] }
  0x78   : > { %1250 = vmatpush1.msra.mxu1 %v193_v8  ;;  %1283 = vmatprep.mubr.f32.mxu1 %v1853_v0  ;;  %v202_v8 = vld [vmem:[%s1894_s19 + $0xf8] sm:$0xff] }
  0x79   : > { %1824 = vmatmul.mubr.msk.f32.vlgmr.msra.gmra.mxu0 %vm434_vm0, %v1931_v35  ;;  %1825 = vmatmul.mubr.msk.f32.vlgmr.msra.gmra.mxu1 %vm434_vm0, %v1931_v35 }
  0x7a   : > { %1306 = vmatprep.subr.mxu0 %v420_v9  ;;  %1377 = vmatprep.subr.mxu1 %v422_v10  ;;  %v199_v9 = vld [vmem:[%s1894_s19 + $0xe0] sm:$0xff]  ;;  %v201_v10 = vld [vmem:[%s1894_s19 + $0xf0] sm:$0xff] }
  0x7b   : > { %1307 = vmatpush1.msra.mxu0 %v419_v11  ;;  %1378 = vmatpush1.msra.mxu1 %v421_v12 }
  0x7c   : > { %1308 = vmatprep.subr.mxu0 %v388_v13  ;;  %1379 = vmatprep.subr.mxu1 %v390_v14 }
  0x7d   : > { %1309 = vmatpush1.msra.mxu0 %v387_v15  ;;  %1380 = vmatpush1.msra.mxu1 %v389_v16 }
  0x7e   : > { %1310 = vmatprep.subr.mxu0 %v356_v17  ;;  %1381 = vmatprep.subr.mxu1 %v358_v18 }
  0x7f   : > { %1311 = vmatpush1.msra.mxu0 %v355_v19  ;;  %1382 = vmatpush1.msra.mxu1 %v357_v20 }
  0x80   : > { %1312 = vmatprep.subr.mxu0 %v324_v21  ;;  %1383 = vmatprep.subr.mxu1 %v326_v22 }
  0x81   : > { %1313 = vmatpush1.msra.mxu0 %v323_v23  ;;  %1384 = vmatpush1.msra.mxu1 %v325_v24 }
  0x82   : > { %1314 = vmatprep.subr.mxu0 %v292_v25  ;;  %1385 = vmatprep.subr.mxu1 %v294_v26 }
  0x83   : > { %1315 = vmatpush1.msra.mxu0 %v291_v27  ;;  %1386 = vmatpush1.msra.mxu1 %v293_v28 }
  0x84   : > { %1316 = vmatprep.subr.mxu0 %v260_v29  ;;  %1387 = vmatprep.subr.mxu1 %v262_v30 }
  0x85   : > { %1317 = vmatpush1.msra.mxu0 %v259_v31  ;;  %1388 = vmatpush1.msra.mxu1 %v261_v32 }
  0x86   : > { %1318 = vmatprep.subr.mxu0 %v228_v33  ;;  %1389 = vmatprep.subr.mxu1 %v230_v34 }
  0x87   : > { %1319 = vmatpush1.msra.mxu0 %v227_v36  ;;  %1390 = vmatpush1.msra.mxu1 %v229_v37 }
  0x88   : > { %1320 = vmatprep.subr.mxu0 %v196_v38  ;;  %1391 = vmatprep.subr.mxu1 %v198_v39 }
  0x89   : > { %1321 = vmatpush1.msra.mxu0 %v195_v40  ;;  %1354 = vmatprep.mubr.f32.mxu0 %v1853_v0  ;;  %v2203_v11 = vpop.permute.xlu0 %431 }
  0x8a   : > { %1392 = vmatpush1.msra.mxu1 %v197_v41  ;;  %1425 = vmatprep.mubr.f32.mxu1 %v1853_v0 }
  0x8b   : > { %1826 = vmatmul.mubr.msk.f32.vlgmr.msra.gmra.mxu0 %vm434_vm0, %v1931_v35  ;;  %1827 = vmatmul.mubr.msk.f32.vlgmr.msra.gmra.mxu1 %vm434_vm0, %v1931_v35 }
  0x8c   : > { %1448 = vmatprep.subr.mxu0 %v424_v42  ;;  %1519 = vmatprep.subr.mxu1 %v426_v43 }
  0x8d   : > { %1449 = vmatpush1.msra.mxu0 %v423_v44  ;;  %1520 = vmatpush1.msra.mxu1 %v425_v45 }
  0x8e   : > { %1450 = vmatprep.subr.mxu0 %v392_v46  ;;  %1521 = vmatprep.subr.mxu1 %v394_v47 }
  0x8f   : > { %1451 = vmatpush1.msra.mxu0 %v391_v48  ;;  %1522 = vmatpush1.msra.mxu1 %v393_v49 }
  0x90   : > { %1452 = vmatprep.subr.mxu0 %v360_v50  ;;  %1523 = vmatprep.subr.mxu1 %v362_v51 }
  0x91   : > { %1453 = vmatpush1.msra.mxu0 %v359_v52  ;;  %1524 = vmatpush1.msra.mxu1 %v361_v53 }
  0x92   : > { %1454 = vmatprep.subr.mxu0 %v328_v54  ;;  %1525 = vmatprep.subr.mxu1 %v330_v55 }
  0x93   : > { %1455 = vmatpush1.msra.mxu0 %v327_v56  ;;  %1526 = vmatpush1.msra.mxu1 %v329_v57 }
  0x94   : > { %1456 = vmatprep.subr.mxu0 %v296_v58  ;;  %1527 = vmatprep.subr.mxu1 %v298_v59 }
  0x95   : > { %1457 = vmatpush1.msra.mxu0 %v295_v60  ;;  %1528 = vmatpush1.msra.mxu1 %v297_v61 }
  0x96   : > { %1458 = vmatprep.subr.mxu0 %v264_v62  ;;  %1529 = vmatprep.subr.mxu1 %v266_v63 }
  0x97   : > { %1459 = vmatpush1.msra.mxu0 %v263_v1  ;;  %1530 = vmatpush1.msra.mxu1 %v265_v2 }
  0x98   : > { %1460 = vmatprep.subr.mxu0 %v232_v3  ;;  %1531 = vmatprep.subr.mxu1 %v234_v4 }
  0x99   : > { %1461 = vmatpush1.msra.mxu0 %v231_v5  ;;  %1532 = vmatpush1.msra.mxu1 %v233_v6 }
  0x9a   : > { %1462 = vmatprep.subr.mxu0 %v200_v7  ;;  %1533 = vmatprep.subr.mxu1 %v202_v8 }
  0x9b   : > { %1463 = vmatpush1.msra.mxu0 %v199_v9  ;;  %1496 = vmatprep.mubr.f32.mxu0 %v1853_v0 }
  0x9c   : > { %1534 = vmatpush1.msra.mxu1 %v201_v10  ;;  %1567 = vmatprep.mubr.f32.mxu1 %v1853_v0 }
  0x9d   : > { %1828 = vmatmul.mubr.msk.f32.vlgmr.msra.gmra.mxu0 %vm434_vm0, %v1931_v35  ;;  %1829 = vmatmul.mubr.msk.f32.vlgmr.msra.gmra.mxu1 %vm434_vm0, %v1931_v35 }
  0xdf   : > { %v504_v12 = vpop.f32.mrf.mxu0  ;;  %v575_v13 = vpop.f32.mrf.mxu1 }
  0xe0   : > { %v505_v14 = vadd.f32 %v504_v12, %v2203_v11  ;;  %v576_v15 = vadd.f32 %v575_v13, %v2203_v11 }
  0xe1   : > { %v506_v16 = vpop.f32.mrf.mxu0  ;;  %v577_v17 = vpop.f32.mrf.mxu1 }
  0xe2   : > { %v1606_v18 = vmul.f32 0.2, %v505_v14  ;;  %v1608_v19 = vmul.f32 0.2, %v576_v15  ;;  %v507_v0 = vadd.f32 %v506_v16, %v2203_v11  ;;  %v578_v20 = vadd.f32 %v577_v17, %v2203_v11 }
  0xe3   : > { %vm1574_vm1 = vcmp.ge.f32.partialorder %v505_v14, 0.0  ;;  %vm1576_vm2 = vcmp.ge.f32.partialorder %v576_v15, 0.0 }
  0xe4   : > { %vm1575_vm3 = vcmp.ge.f32.partialorder %v507_v0, 0.0  ;;  %v1607_v35 = vmul.f32 0.2, %v507_v0  ;;  %vm1577_vm4 = vcmp.ge.f32.partialorder %v578_v20, 0.0  ;;  %v1609_v21 = vmul.f32 0.2, %v578_v20 }
  0xe5   : > { %v1638_v22 = vsel %vm1574_vm1, %v505_v14, %v1606_v18  ;;  %v1640_v23 = vsel %vm1576_vm2, %v576_v15, %v1608_v19 }
  0xe6   : > { %v1639_v24 = vsel %vm1575_vm3, %v507_v0, %v1607_v35  ;;  %v1641_v25 = vsel %vm1577_vm4, %v578_v20, %v1609_v21 }
  0xe7   : > { %v1702_v26 = vcombine.low %v1638_v22, %v1639_v24  ;;  %v1703_v27 = vcombine.low %v1640_v23, %v1641_v25 }
  0xe9   : > { %1734 = vst [vmem:[%s2213_s25] sm:$0xff] %v1702_v26  ;;  %1735 = vst [vmem:[%s2213_s25 + $0x8] sm:$0xff] %v1703_v27 }
  0xf1   : > { %v646_v28 = vpop.f32.mrf.mxu0  ;;  %v717_v29 = vpop.f32.mrf.mxu1 }
  0xf2   : > { %v647_v30 = vadd.f32 %v646_v28, %v2203_v11  ;;  %v718_v31 = vadd.f32 %v717_v29, %v2203_v11 }
  0xf3   : > { %v648_v32 = vpop.f32.mrf.mxu0  ;;  %v719_v33 = vpop.f32.mrf.mxu1 }
  0xf4   : > { %v1610_v34 = vmul.f32 0.2, %v647_v30  ;;  %v1612_v36 = vmul.f32 0.2, %v718_v31  ;;  %v649_v37 = vadd.f32 %v648_v32, %v2203_v11  ;;  %v720_v38 = vadd.f32 %v719_v33, %v2203_v11 }
  0xf5   : > { %vm1578_vm5 = vcmp.ge.f32.partialorder %v647_v30, 0.0  ;;  %vm1580_vm6 = vcmp.ge.f32.partialorder %v718_v31, 0.0 }
  0xf6   : > { %vm1579_vm7 = vcmp.ge.f32.partialorder %v649_v37, 0.0  ;;  %v1611_v39 = vmul.f32 0.2, %v649_v37  ;;  %vm1581_vm8 = vcmp.ge.f32.partialorder %v720_v38, 0.0  ;;  %v1613_v40 = vmul.f32 0.2, %v720_v38 }
  0xf7   : > { %v1642_v41 = vsel %vm1578_vm5, %v647_v30, %v1610_v34  ;;  %v1644_v42 = vsel %vm1580_vm6, %v718_v31, %v1612_v36 }
  0xf8   : > { %v1643_v43 = vsel %vm1579_vm7, %v649_v37, %v1611_v39  ;;  %v1645_v44 = vsel %vm1581_vm8, %v720_v38, %v1613_v40 }
  0xf9   : > { %v1704_v45 = vcombine.low %v1642_v41, %v1643_v43  ;;  %v1705_v46 = vcombine.low %v1644_v42, %v1645_v44 }
  0xfb   : > { %1736 = vst [vmem:[%s2213_s25 + $0x10] sm:$0xff] %v1704_v45  ;;  %1737 = vst [vmem:[%s2213_s25 + $0x18] sm:$0xff] %v1705_v46 }
 0x103   : > { %v788_v47 = vpop.f32.mrf.mxu0  ;;  %v859_v48 = vpop.f32.mrf.mxu1 }
 0x104   : > { %v789_v49 = vadd.f32 %v788_v47, %v2203_v11  ;;  %v860_v50 = vadd.f32 %v859_v48, %v2203_v11 }
 0x105   : > { %v790_v51 = vpop.f32.mrf.mxu0  ;;  %v861_v52 = vpop.f32.mrf.mxu1 }
 0x106   : > { %v1614_v53 = vmul.f32 0.2, %v789_v49  ;;  %v1616_v54 = vmul.f32 0.2, %v860_v50  ;;  %v791_v55 = vadd.f32 %v790_v51, %v2203_v11  ;;  %v862_v56 = vadd.f32 %v861_v52, %v2203_v11 }
 0x107   : > { %vm1582_vm9 = vcmp.ge.f32.partialorder %v789_v49, 0.0  ;;  %vm1584_vm10 = vcmp.ge.f32.partialorder %v860_v50, 0.0 }
 0x108   : > { %vm1583_vm11 = vcmp.ge.f32.partialorder %v791_v55, 0.0  ;;  %v1615_v57 = vmul.f32 0.2, %v791_v55  ;;  %vm1585_vm12 = vcmp.ge.f32.partialorder %v862_v56, 0.0  ;;  %v1617_v58 = vmul.f32 0.2, %v862_v56 }
 0x109   : > { %v1646_v59 = vsel %vm1582_vm9, %v789_v49, %v1614_v53  ;;  %v1648_v60 = vsel %vm1584_vm10, %v860_v50, %v1616_v54 }
 0x10a   : > { %v1647_v61 = vsel %vm1583_vm11, %v791_v55, %v1615_v57  ;;  %v1649_v62 = vsel %vm1585_vm12, %v862_v56, %v1617_v58 }
 0x10b   : > { %v1706_v63 = vcombine.low %v1646_v59, %v1647_v61  ;;  %v1707_v1 = vcombine.low %v1648_v60, %v1649_v62 }
 0x10d   : > { %1738 = vst [vmem:[%s2213_s25 + $0x20] sm:$0xff] %v1706_v63  ;;  %1739 = vst [vmem:[%s2213_s25 + $0x28] sm:$0xff] %v1707_v1 }
 0x115   : > { %v930_v2 = vpop.f32.mrf.mxu0  ;;  %v1001_v3 = vpop.f32.mrf.mxu1 }
 0x116   : > { %v931_v4 = vadd.f32 %v930_v2, %v2203_v11  ;;  %v1002_v5 = vadd.f32 %v1001_v3, %v2203_v11 }
 0x117   : > { %v932_v6 = vpop.f32.mrf.mxu0  ;;  %v1003_v7 = vpop.f32.mrf.mxu1 }
 0x118   : > { %v1618_v8 = vmul.f32 0.2, %v931_v4  ;;  %v1620_v9 = vmul.f32 0.2, %v1002_v5  ;;  %v933_v10 = vadd.f32 %v932_v6, %v2203_v11  ;;  %v1004_v12 = vadd.f32 %v1003_v7, %v2203_v11 }
 0x119   : > { %vm1586_vm13 = vcmp.ge.f32.partialorder %v931_v4, 0.0  ;;  %vm1588_vm14 = vcmp.ge.f32.partialorder %v1002_v5, 0.0 }
 0x11a   : > { %vm1587_vm15 = vcmp.ge.f32.partialorder %v933_v10, 0.0  ;;  %v1619_v13 = vmul.f32 0.2, %v933_v10  ;;  %vm1589_vm0 = vcmp.ge.f32.partialorder %v1004_v12, 0.0  ;;  %v1621_v14 = vmul.f32 0.2, %v1004_v12 }
 0x11b   : > { %v1650_v15 = vsel %vm1586_vm13, %v931_v4, %v1618_v8  ;;  %v1652_v16 = vsel %vm1588_vm14, %v1002_v5, %v1620_v9 }
 0x11c   : > { %v1651_v17 = vsel %vm1587_vm15, %v933_v10, %v1619_v13  ;;  %v1653_v18 = vsel %vm1589_vm0, %v1004_v12, %v1621_v14 }
 0x11d   : > { %v1708_v19 = vcombine.low %v1650_v15, %v1651_v17  ;;  %v1709_v0 = vcombine.low %v1652_v16, %v1653_v18 }
 0x11f   : > { %1740 = vst [vmem:[%s2213_s25 + $0x30] sm:$0xff] %v1708_v19  ;;  %1741 = vst [vmem:[%s2213_s25 + $0x38] sm:$0xff] %v1709_v0 }
 0x127   : > { %v1072_v20 = vpop.f32.mrf.mxu0  ;;  %v1143_v35 = vpop.f32.mrf.mxu1 }
 0x128   : > { %v1073_v21 = vadd.f32 %v1072_v20, %v2203_v11  ;;  %v1144_v22 = vadd.f32 %v1143_v35, %v2203_v11 }
 0x129   : > { %v1074_v23 = vpop.f32.mrf.mxu0  ;;  %v1145_v24 = vpop.f32.mrf.mxu1 }
 0x12a   : > { %v1622_v25 = vmul.f32 0.2, %v1073_v21  ;;  %v1624_v26 = vmul.f32 0.2, %v1144_v22  ;;  %v1075_v27 = vadd.f32 %v1074_v23, %v2203_v11  ;;  %v1146_v28 = vadd.f32 %v1145_v24, %v2203_v11 }
 0x12b   : > { %vm1590_vm1 = vcmp.ge.f32.partialorder %v1073_v21, 0.0  ;;  %vm1592_vm2 = vcmp.ge.f32.partialorder %v1144_v22, 0.0 }
 0x12c   : > { %vm1591_vm3 = vcmp.ge.f32.partialorder %v1075_v27, 0.0  ;;  %v1623_v29 = vmul.f32 0.2, %v1075_v27  ;;  %vm1593_vm4 = vcmp.ge.f32.partialorder %v1146_v28, 0.0  ;;  %v1625_v30 = vmul.f32 0.2, %v1146_v28 }
 0x12d   : > { %v1654_v31 = vsel %vm1590_vm1, %v1073_v21, %v1622_v25  ;;  %v1656_v32 = vsel %vm1592_vm2, %v1144_v22, %v1624_v26 }
 0x12e   : > { %v1655_v33 = vsel %vm1591_vm3, %v1075_v27, %v1623_v29  ;;  %v1657_v34 = vsel %vm1593_vm4, %v1146_v28, %v1625_v30 }
 0x12f   : > { %v1710_v36 = vcombine.low %v1654_v31, %v1655_v33  ;;  %v1711_v37 = vcombine.low %v1656_v32, %v1657_v34 }
 0x131   : > { %1742 = vst [vmem:[%s2213_s25 + $0x40] sm:$0xff] %v1710_v36  ;;  %1743 = vst [vmem:[%s2213_s25 + $0x48] sm:$0xff] %v1711_v37 }
 0x139   : > { %v1214_v38 = vpop.f32.mrf.mxu0  ;;  %v1285_v39 = vpop.f32.mrf.mxu1 }
 0x13a   : > { %v1215_v40 = vadd.f32 %v1214_v38, %v2203_v11  ;;  %v1286_v41 = vadd.f32 %v1285_v39, %v2203_v11 }
 0x13b   : > { %v1216_v42 = vpop.f32.mrf.mxu0  ;;  %v1287_v43 = vpop.f32.mrf.mxu1 }
 0x13c   : > { %v1626_v44 = vmul.f32 0.2, %v1215_v40  ;;  %v1628_v45 = vmul.f32 0.2, %v1286_v41  ;;  %v1217_v46 = vadd.f32 %v1216_v42, %v2203_v11  ;;  %v1288_v47 = vadd.f32 %v1287_v43, %v2203_v11 }
 0x13d   : > { %vm1594_vm5 = vcmp.ge.f32.partialorder %v1215_v40, 0.0  ;;  %vm1596_vm6 = vcmp.ge.f32.partialorder %v1286_v41, 0.0 }
 0x13e   : > { %vm1595_vm7 = vcmp.ge.f32.partialorder %v1217_v46, 0.0  ;;  %v1627_v48 = vmul.f32 0.2, %v1217_v46  ;;  %vm1597_vm8 = vcmp.ge.f32.partialorder %v1288_v47, 0.0  ;;  %v1629_v49 = vmul.f32 0.2, %v1288_v47 }
 0x13f   : > { %v1658_v50 = vsel %vm1594_vm5, %v1215_v40, %v1626_v44  ;;  %v1660_v51 = vsel %vm1596_vm6, %v1286_v41, %v1628_v45 }
 0x140   : > { %v1659_v52 = vsel %vm1595_vm7, %v1217_v46, %v1627_v48  ;;  %v1661_v53 = vsel %vm1597_vm8, %v1288_v47, %v1629_v49 }
 0x141   : > { %v1712_v54 = vcombine.low %v1658_v50, %v1659_v52  ;;  %v1713_v55 = vcombine.low %v1660_v51, %v1661_v53 }
 0x143   : > { %1744 = vst [vmem:[%s2213_s25 + $0x50] sm:$0xff] %v1712_v54  ;;  %1745 = vst [vmem:[%s2213_s25 + $0x58] sm:$0xff] %v1713_v55 }
 0x14b   : > { %v1356_v56 = vpop.f32.mrf.mxu0  ;;  %v1427_v57 = vpop.f32.mrf.mxu1 }
 0x14c   : > { %v1357_v58 = vadd.f32 %v1356_v56, %v2203_v11  ;;  %v1428_v59 = vadd.f32 %v1427_v57, %v2203_v11 }
 0x14d   : > { %v1358_v60 = vpop.f32.mrf.mxu0  ;;  %v1429_v61 = vpop.f32.mrf.mxu1 }
 0x14e   : > { %v1630_v62 = vmul.f32 0.2, %v1357_v58  ;;  %v1632_v63 = vmul.f32 0.2, %v1428_v59  ;;  %v1359_v1 = vadd.f32 %v1358_v60, %v2203_v11  ;;  %v1430_v2 = vadd.f32 %v1429_v61, %v2203_v11 }
 0x14f   : > { %vm1598_vm9 = vcmp.ge.f32.partialorder %v1357_v58, 0.0  ;;  %vm1600_vm10 = vcmp.ge.f32.partialorder %v1428_v59, 0.0 }
 0x150   : > { %vm1599_vm11 = vcmp.ge.f32.partialorder %v1359_v1, 0.0  ;;  %v1631_v3 = vmul.f32 0.2, %v1359_v1  ;;  %vm1601_vm12 = vcmp.ge.f32.partialorder %v1430_v2, 0.0  ;;  %v1633_v4 = vmul.f32 0.2, %v1430_v2 }
 0x151   : > { %v1662_v5 = vsel %vm1598_vm9, %v1357_v58, %v1630_v62  ;;  %v1664_v6 = vsel %vm1600_vm10, %v1428_v59, %v1632_v63 }
 0x152   : > { %v1663_v7 = vsel %vm1599_vm11, %v1359_v1, %v1631_v3  ;;  %v1665_v8 = vsel %vm1601_vm12, %v1430_v2, %v1633_v4 }
 0x153   : > { %v1714_v9 = vcombine.low %v1662_v5, %v1663_v7  ;;  %v1715_v10 = vcombine.low %v1664_v6, %v1665_v8 }
 0x155   : > { %1746 = vst [vmem:[%s2213_s25 + $0x60] sm:$0xff] %v1714_v9  ;;  %1747 = vst [vmem:[%s2213_s25 + $0x68] sm:$0xff] %v1715_v10 }
 0x15d   : > { %v1498_v12 = vpop.f32.mrf.mxu0  ;;  %v1569_v13 = vpop.f32.mrf.mxu1 }
 0x15e   : > { %v1499_v14 = vadd.f32 %v1498_v12, %v2203_v11  ;;  %v1570_v15 = vadd.f32 %v1569_v13, %v2203_v11 }
 0x15f   : > { %v1500_v16 = vpop.f32.mrf.mxu0  ;;  %v1571_v17 = vpop.f32.mrf.mxu1 }
 0x160   : > { %v1634_v18 = vmul.f32 0.2, %v1499_v14  ;;  %v1636_v19 = vmul.f32 0.2, %v1570_v15  ;;  %v1501_v0 = vadd.f32 %v1500_v16, %v2203_v11  ;;  %v1572_v20 = vadd.f32 %v1571_v17, %v2203_v11 }
 0x161   : > { %vm1602_vm13 = vcmp.ge.f32.partialorder %v1499_v14, 0.0  ;;  %vm1604_vm14 = vcmp.ge.f32.partialorder %v1570_v15, 0.0 }
 0x162   : > { %vm1603_vm15 = vcmp.ge.f32.partialorder %v1501_v0, 0.0  ;;  %v1635_v35 = vmul.f32 0.2, %v1501_v0  ;;  %vm1605_vm0 = vcmp.ge.f32.partialorder %v1572_v20, 0.0  ;;  %v1637_v21 = vmul.f32 0.2, %v1572_v20 }
 0x163   : > { %v1666_v22 = vsel %vm1602_vm13, %v1499_v14, %v1634_v18  ;;  %v1668_v23 = vsel %vm1604_vm14, %v1570_v15, %v1636_v19 }
 0x164   : > { %v1667_v24 = vsel %vm1603_vm15, %v1501_v0, %v1635_v35  ;;  %v1669_v25 = vsel %vm1605_vm0, %v1572_v20, %v1637_v21 }
 0x165   : > { %v1716_v26 = vcombine.low %v1666_v22, %v1667_v24  ;;  %v1717_v27 = vcombine.low %v1668_v23, %v1669_v25 }
 0x167   : > { %1748 = vst [vmem:[%s2213_s25 + $0x70] sm:$0xff] %v1716_v26  ;;  %1749 = vst [vmem:[%s2213_s25 + $0x78] sm:$0xff] %v1717_v27 }
 0x168 PF: > { %s13_s12 = sadd.s32 1, %s1851_s12  }
 0x169   : > { %p10_p4 = scmp.ge.s32.totalorder %s13_s12, 4  }
 0x16b   :  { %12 = sbr.rel (!%p10_p4) target bundleno = 1 (0x1), region = 62 }

// kernel: netd_forward.6
= control target key start
LH: loop header
LB: loop body
LE: loop exit
PB: predicated region body
PF: predicated region fallthrough
CT: control target
= control target key end

     0   :  { %s724_s12 = smov 0   ;;  %s839_s0 = inlined_call_operand.vmem [shape: f32[2,64,1024], index: 0, kind: input, shape index: {}]   ;;  %s840_s1 = inlined_call_operand.vmem [shape: f32[8,64], index: 1, kind: input, shape index: {}]   ;;  %s841_s2 = inlined_call_operand.vmem [shape: f32[8,1], index: 2, kind: input, shape index: {}]   ;;  %s842_s3 = inlined_call_operand.vmem [shape: f32[2,8,1024], index: 3, kind: output, shape index: {}]  }
   0x1 LB: > { %s664_s13 = sadd.s32 4294967295, %s700_s12   ;;  %p668_p0 = scmp.ge.s32.totalorder %s700_s12, 1  ;;  %s700_s12 = sphi %s724_s12, %s13_s12  }
   0x2   : > { %p137_p1 = scmp.lt.s32.totalorder %s700_s12, 3 }
   0x4   : > { %p138_p2 = pnand %p668_p0, %p137_p1 }
   0x5   : > { %p161_p3 = scmp.lt.s32.totalorder (!%p138_p2), %s664_s13, 1 }
   0x6   : > { %141 = sbr.rel (%p138_p2) target bundleno = 578 (0x242), region = 32 }
   0xb   : > { %v236_v0 = vld [vmem:[%s841_s2] sm:$0xff]  ;;  %v702_v1 = vmov 0.0   ;;  %s844_s13 = smov (!%p161_p3, %s664_s13), 1  ;;  %v703_v2 = vmov 0   ;;  %vm242_vm0 = vcmask 523264  }
   0xc   : > { %310 = vmatprep.mubr.f32.mxu0 %v702_v1  ;;  %381 = vmatprep.mubr.f32.mxu1 %v702_v1  ;;  %s679_s16 = sshll.u32 %s844_s13, 9  ;;  %v780_v35 = vld [vmem:[%s840_s1] sm:$0xff]  ;;  %s680_s22 = sshll.u32 %s844_s13, 6 }
   0xd   : > { %691 = vset.pattern.permute.xlu0 %v703_v2  ;;  %s743_s19 = scalar_lea.vmem %s839_s0, %s679_s16  ;;  %s170_s25 = scalar_lea.vmem %s842_s3, %s680_s22 }
   0xe   : > { %239 = vperm.xlu0 %691, %v236_v0   ;;  %v228_v3 = vld [vmem:[%s743_s19 + $0x1c8] sm:$0xff]  ;;  %v230_v4 = vld [vmem:[%s743_s19 + $0x1d8] sm:$0xff]  ;;  %v227_v5 = vld [vmem:[%s743_s19 + $0x1c0] sm:$0xff] }
   0xf   : > { %262 = vmatprep.subr.mxu0 %v228_v3  ;;  %333 = vmatprep.subr.mxu1 %v230_v4  ;;  %v229_v6 = vld [vmem:[%s743_s19 + $0x1d0] sm:$0xff]  ;;  %v220_v7 = vld [vmem:[%s743_s19 + $0x188] sm:$0xff]  ;;  %v222_v8 = vld [vmem:[%s743_s19 + $0x198] sm:$0xff] }
  0x10   : > { %263 = vmatpush1.msra.mxu0 %v227_v5  ;;  %334 = vmatpush1.msra.mxu1 %v229_v6  ;;  %v219_v9 = vld [vmem:[%s743_s19 + $0x180] sm:$0xff]  ;;  %v221_v10 = vld [vmem:[%s743_s19 + $0x190] sm:$0xff]  ;;  %v212_v11 = vld [vmem:[%s743_s19 + $0x148] sm:$0xff] }
  0x11   : > { %264 = vmatprep.subr.mxu0 %v220_v7  ;;  %335 = vmatprep.subr.mxu1 %v222_v8  ;;  %v214_v12 = vld [vmem:[%s743_s19 + $0x158] sm:$0xff]  ;;  %v211_v13 = vld [vmem:[%s743_s19 + $0x140] sm:$0xff]  ;;  %v213_v14 = vld [vmem:[%s743_s19 + $0x150] sm:$0xff] }
  0x12   : > { %265 = vmatpush1.msra.mxu0 %v219_v9  ;;  %336 = vmatpush1.msra.mxu1 %v221_v10  ;;  %v204_v15 = vld [vmem:[%s743_s19 + $0x108] sm:$0xff]  ;;  %v206_v16 = vld [vmem:[%s743_s19 + $0x118] sm:$0xff]  ;;  %v203_v17 = vld [vmem:[%s743_s19 + $0x100] sm:$0xff] }
  0x13   : > { %266 = vmatprep.subr.mxu0 %v212_v11  ;;  %337 = vmatprep.subr.mxu1 %v214_v12  ;;  %v205_v18 = vld [vmem:[%s743_s19 + $0x110] sm:$0xff]  ;;  %v196_v19 = vld [vmem:[%s743_s19 + $0xc8] sm:$0xff]  ;;  %v198_v20 = vld [vmem:[%s743_s19 + $0xd8] sm:$0xff] }
  0x14   : > { %267 = vmatpush1.msra.mxu0 %v211_v13  ;;  %338 = vmatpush1.msra.mxu1 %v213_v14  ;;  %v195_v21 = vld [vmem:[%s743_s19 + $0xc0] sm:$0xff]  ;;  %v197_v22 = vld [vmem:[%s743_s19 + $0xd0] sm:$0xff]  ;;  %v188_v23 = vld [vmem:[%s743_s19 + $0x88] sm:$0xff] }
  0x15   : > { %268 = vmatprep.subr.mxu0 %v204_v15  ;;  %339 = vmatprep.subr.mxu1 %v206_v16  ;;  %v190_v24 = vld [vmem:[%s743_s19 + $0x98] sm:$0xff]  ;;  %v187_v25 = vld [vmem:[%s743_s19 + $0x80] sm:$0xff]  ;;  %v189_v26 = vld [vmem:[%s743_s19 + $0x90] sm:$0xff] }
  0x16   : > { %269 = vmatpush1.msra.mxu0 %v203_v17  ;;  %340 = vmatpush1.msra.mxu1 %v205_v18  ;;  %v180_v27 = vld [vmem:[%s743_s19 + $0x48] sm:$0xff]  ;;  %v182_v28 = vld [vmem:[%s743_s19 + $0x58] sm:$0xff]  ;;  %v179_v29 = vld [vmem:[%s743_s19 + $0x40] sm:$0xff] }
  0x17   : > { %270 = vmatprep.subr.mxu0 %v196_v19  ;;  %341 = vmatprep.subr.mxu1 %v198_v20  ;;  %v181_v30 = vld [vmem:[%s743_s19 + $0x50] sm:$0xff]  ;;  %v172_v31 = vld [vmem:[%s743_s19 + $0x8] sm:$0xff]  ;;  %v174_v32 = vld [vmem:[%s743_s19 + $0x18] sm:$0xff] }
  0x18   : > { %271 = vmatpush1.msra.mxu0 %v195_v21  ;;  %342 = vmatpush1.msra.mxu1 %v197_v22  ;;  %v171_v33 = vld [vmem:[%s743_s19] sm:$0xff]  ;;  %v173_v34 = vld [vmem:[%s743_s19 + $0x10] sm:$0xff]  ;;  %v232_v36 = vld [vmem:[%s743_s19 + $0x1e8] sm:$0xff] }
  0x19   : > { %272 = vmatprep.subr.mxu0 %v188_v23  ;;  %343 = vmatprep.subr.mxu1 %v190_v24  ;;  %v234_v37 = vld [vmem:[%s743_s19 + $0x1f8] sm:$0xff]  ;;  %v231_v38 = vld [vmem:[%s743_s19 + $0x1e0] sm:$0xff]  ;;  %v233_v39 = vld [vmem:[%s743_s19 + $0x1f0] sm:$0xff] }
  0x1a   : > { %273 = vmatpush1.msra.mxu0 %v187_v25  ;;  %344 = vmatpush1.msra.mxu1 %v189_v26  ;;  %v224_v40 = vld [vmem:[%s743_s19 + $0x1a8] sm:$0xff]  ;;  %v226_v41 = vld [vmem:[%s743_s19 + $0x1b8] sm:$0xff]  ;;  %v223_v42 = vld [vmem:[%s743_s19 + $0x1a0] sm:$0xff] }
  0x1b   : > { %274 = vmatprep.subr.mxu0 %v180_v27  ;;  %345 = vmatprep.subr.mxu1 %v182_v28  ;;  %v225_v43 = vld [vmem:[%s743_s19 + $0x1b0] sm:$0xff]  ;;  %v216_v44 = vld [vmem:[%s743_s19 + $0x168] sm:$0xff]  ;;  %v218_v45 = vld [vmem:[%s743_s19 + $0x178] sm:$0xff] }
  0x1c   : > { %275 = vmatpush1.msra.mxu0 %v179_v29  ;;  %346 = vmatpush1.msra.mxu1 %v181_v30  ;;  %v215_v46 = vld [vmem:[%s743_s19 + $0x160] sm:$0xff]  ;;  %v217_v47 = vld [vmem:[%s743_s19 + $0x170] sm:$0xff]  ;;  %v208_v48 = vld [vmem:[%s743_s19 + $0x128] sm:$0xff] }
  0x1d   : > { %276 = vmatprep.subr.mxu0 %v172_v31  ;;  %347 = vmatprep.subr.mxu1 %v174_v32  ;;  %v210_v49 = vld [vmem:[%s743_s19 + $0x138] sm:$0xff]  ;;  %v207_v50 = vld [vmem:[%s743_s19 + $0x120] sm:$0xff]  ;;  %v209_v51 = vld [vmem:[%s743_s19 + $0x130] sm:$0xff] }
  0x1e   : > { %277 = vmatpush1.msra.mxu0 %v171_v33  ;;  %348 = vmatpush1.msra.mxu1 %v173_v34  ;;  %v200_v52 = vld [vmem:[%s743_s19 + $0xe8] sm:$0xff]  ;;  %v202_v53 = vld [vmem:[%s743_s19 + $0xf8] sm:$0xff]  ;;  %v199_v54 = vld [vmem:[%s743_s19 + $0xe0] sm:$0xff] }
  0x1f   : > { %673 = vmatmul.mubr.msk.f32.vlgmr.msra.gmra.mxu0 %vm242_vm0, %v780_v35  ;;  %404 = vmatprep.subr.mxu0 %v232_v36  ;;  %v201_v55 = vld [vmem:[%s743_s19 + $0xf0] sm:$0xff]  ;;  %v192_v56 = vld [vmem:[%s743_s19 + $0xa8] sm:$0xff]  ;;  %v194_v57 = vld [vmem:[%s743_s19 + $0xb8] sm:$0xff] }
  0x20   : > { %475 = vmatprep.subr.mxu1 %v234_v37  ;;  %674 = vmatmul.mubr.msk.f32.vlgmr.msra.gmra.mxu1 %vm242_vm0, %v780_v35  ;;  %v191_v58 = vld [vmem:[%s743_s19 + $0xa0] sm:$0xff]  ;;  %v193_v59 = vld [vmem:[%s743_s19 + $0xb0] sm:$0xff]  ;;  %v184_v60 = vld [vmem:[%s743_s19 + $0x68] sm:$0xff] }
  0x21   : > { %405 = vmatpush1.msra.mxu0 %v231_v38  ;;  %476 = vmatpush1.msra.mxu1 %v233_v39  ;;  %v186_v61 = vld [vmem:[%s743_s19 + $0x78] sm:$0xff]  ;;  %v183_v62 = vld [vmem:[%s743_s19 + $0x60] sm:$0xff]  ;;  %v185_v63 = vld [vmem:[%s743_s19 + $0x70] sm:$0xff] }
  0x22   : > { %406 = vmatprep.subr.mxu0 %v224_v40  ;;  %477 = vmatprep.subr.mxu1 %v226_v41  ;;  %v176_v0 = vld [vmem:[%s743_s19 + $0x28] sm:$0xff]  ;;  %v178_v2 = vld [vmem:[%s743_s19 + $0x38] sm:$0xff]  ;;  %v175_v3 = vld [vmem:[%s743_s19 + $0x20] sm:$0xff] }
  0x23   : > { %407 = vmatpush1.msra.mxu0 %v223_v42  ;;  %478 = vmatpush1.msra.mxu1 %v225_v43  ;;  %v177_v4 = vld [vmem:[%s743_s19 + $0x30] sm:$0xff] }
  0x24   : > { %408 = vmatprep.subr.mxu0 %v216_v44  ;;  %479 = vmatprep.subr.mxu1 %v218_v45 }
  0x25   : > { %409 = vmatpush1.msra.mxu0 %v215_v46  ;;  %480 = vmatpush1.msra.mxu1 %v217_v47 }
  0x26   : > { %410 = vmatprep.subr.mxu0 %v208_v48  ;;  %481 = vmatprep.subr.mxu1 %v210_v49 }
  0x27   : > { %411 = vmatpush1.msra.mxu0 %v207_v50  ;;  %482 = vmatpush1.msra.mxu1 %v209_v51 }
  0x28   : > { %412 = vmatprep.subr.mxu0 %v200_v52  ;;  %483 = vmatprep.subr.mxu1 %v202_v53 }
  0x29   : > { %413 = vmatpush1.msra.mxu0 %v199_v54  ;;  %484 = vmatpush1.msra.mxu1 %v201_v55 }
  0x2a   : > { %414 = vmatprep.subr.mxu0 %v192_v56  ;;  %485 = vmatprep.subr.mxu1 %v194_v57 }
  0x2b   : > { %415 = vmatpush1.msra.mxu0 %v191_v58  ;;  %486 = vmatpush1.msra.mxu1 %v193_v59 }
  0x2c   : > { %416 = vmatprep.subr.mxu0 %v184_v60  ;;  %487 = vmatprep.subr.mxu1 %v186_v61 }
  0x2d   : > { %417 = vmatpush1.msra.mxu0 %v183_v62  ;;  %488 = vmatpush1.msra.mxu1 %v185_v63 }
  0x2e   : > { %418 = vmatprep.subr.mxu0 %v176_v0  ;;  %489 = vmatprep.subr.mxu1 %v178_v2 }
  0x2f   : > { %419 = vmatpush1.msra.mxu0 %v175_v3  ;;  %452 = vmatprep.mubr.f32.mxu0 %v702_v1 }
  0x30   : > { %490 = vmatpush1.msra.mxu1 %v177_v4  ;;  %523 = vmatprep.mubr.f32.mxu1 %v702_v1 }
  0x31   : > { %675 = vmatmul.mubr.msk.f32.vlgmr.msra.gmra.mxu0 %vm242_vm0, %v780_v35  ;;  %676 = vmatmul.mubr.msk.f32.vlgmr.msra.gmra.mxu1 %vm242_vm0, %v780_v35 }
  0x89   : > { %v240_v6 = vpop.permute.xlu0 %239 }
  0xdf   : > { %v312_v5 = vpop.f32.mrf.mxu0 }
  0xe0   : > { %v313_v8 = vadd.f32 %v312_v5, %v240_v6  ;;  %v383_v10 = vpop.f32.mrf.mxu1 }
  0xe1   : > { %v314_v7 = vpop.f32.mrf.mxu0  ;;  %v384_v12 = vadd.f32 %v383_v10, %v240_v6 }
  0xe2   : > { %v315_v9 = vadd.f32 %v314_v7, %v240_v6  ;;  %v385_v13 = vpop.f32.mrf.mxu1 }
  0xe3   : > { %v386_v15 = vadd.f32 %v385_v13, %v240_v6 }
  0xe4   : > { %v530_v11 = vadd.f32 %v315_v9, %v313_v8 }
  0xe6   : > { %v531_v14 = vadd.f32 %v530_v11, %v384_v12 }
  0xe8   : > { %v532_v1 = vadd.f32 %v531_v14, %v386_v15 }
  0xf1   : > { %v454_v16 = vpop.f32.mrf.mxu0  ;;  %v525_v17 = vpop.f32.mrf.mxu1 }
  0xf2   : > { %v455_v18 = vadd.f32 %v454_v16, %v240_v6  ;;  %v526_v23 = vadd.f32 %v525_v17, %v240_v6 }
  0xf3   : > { %v456_v19 = vpop.f32.mrf.mxu0  ;;  %v527_v22 = vpop.f32.mrf.mxu1 }
  0xf4   : > { %v533_v20 = vadd.f32 %v532_v1, %v455_v18  ;;  %v457_v21 = vadd.f32 %v456_v19, %v240_v6  ;;  %v528_v25 = vadd.f32 %v527_v22, %v240_v6 }
  0xf6   : > { %v534_v24 = vadd.f32 %v533_v20, %v457_v21 }
  0xf8   : > { %v535_v26 = vadd.f32 %v534_v24, %v526_v23 }
  0xfa   : > { %v536_v27 = vadd.f32 %v535_v26, %v528_v25 }
  0xfc   : > { %537 = vadd.xlane.f32.xlu0 %v536_v27 }
 0x185   : > { %v538_v28 = vpop.xlane.xlu0 %537 }
 0x186   : > { %v540_v29 = vmul.f32 0.0009765625, %v538_v28 }
 0x188   : > { %v541_v30 = vsub.f32 %v313_v8, %v540_v29  ;;  %v542_v31 = vsub.f32 %v315_v9, %v540_v29  ;;  %v543_v32 = vsub.f32 %v384_v12, %v540_v29  ;;  %v544_v33 = vsub.f32 %v386_v15, %v540_v29 }
 0x189   : > { %v545_v36 = vsub.f32 %v455_v18, %v540_v29  ;;  %v546_v39 = vsub.f32 %v457_v21, %v540_v29  ;;  %v547_v42 = vsub.f32 %v526_v23, %v540_v29  ;;  %v548_v45 = vsub.f32 %v528_v25, %v540_v29 }
 0x18a   : > { %v549_v34 = vmul.f32 %v541_v30, %v541_v30  ;;  %v550_v35 = vmul.f32 %v542_v31, %v542_v31  ;;  %v551_v37 = vmul.f32 %v543_v32, %v543_v32  ;;  %v552_v40 = vmul.f32 %v544_v33, %v544_v33 }
 0x18b   : > { %v553_v43 = vmul.f32 %v545_v36, %v545_v36  ;;  %v554_v46 = vmul.f32 %v546_v39, %v546_v39  ;;  %v555_v48 = vmul.f32 %v547_v42, %v547_v42  ;;  %v556_v50 = vmul.f32 %v548_v45, %v548_v45 }
 0x18c   : > { %v557_v38 = vadd.f32 %v550_v35, %v549_v34 }
 0x18e   : > { %v558_v41 = vadd.f32 %v557_v38, %v551_v37 }
 0x190   : > { %v559_v44 = vadd.f32 %v558_v41, %v552_v40 }
 0x192   : > { %v560_v47 = vadd.f32 %v559_v44, %v553_v43 }
 0x194   : > { %v561_v49 = vadd.f32 %v560_v47, %v554_v46 }
 0x196   : > { %v562_v51 = vadd.f32 %v561_v49, %v555_v48 }
 0x198   : > { %v563_v52 = vadd.f32 %v562_v51, %v556_v50 }
 0x19a   : > { %564 = vadd.xlane.f32.xlu1 %v563_v52 }
 0x223   : > { %v565_v53 = vpop.xlane.xlu1 %564 }
 0x224   : > { %v566_v54 = vmul.f32 0.0009765625, %v565_v53 }
 0x226   : > { %v567_v55 = vadd.f32 1e-05, %v566_v54 }
 0x228   : > { %692 = vrsqrt.f32 %v567_v55 }
 0x235   : > { %v693_v56 = vpop.eup %692 }
 0x236   : > { %v569_v57 = vmul.f32 %v693_v56, %v541_v30  ;;  %v570_v58 = vmul.f32 %v693_v56, %v542_v31  ;;  %v571_v59 = vmul.f32 %v693_v56, %v543_v32  ;;  %v572_v60 = vmul.f32 %v693_v56, %v544_v33 }
 0x237   : > { %v573_v61 = vmul.f32 %v693_v56, %v545_v36  ;;  %v574_v62 = vmul.f32 %v693_v56, %v546_v39  ;;  %v575_v63 = vmul.f32 %v693_v56, %v547_v42  ;;  %v576_v0 = vmul.f32 %v693_v56, %v548_v45 }
 0x238   : > { %vm577_vm1 = vcmp.ge.f32.partialorder %v569_v57, 0.0  ;;  %vm578_vm2 = vcmp.ge.f32.partialorder %v570_v58, 0.0  ;;  %vm579_vm3 = vcmp.ge.f32.partialorder %v571_v59, 0.0  ;;  %vm580_vm4 = vcmp.ge.f32.partialorder %v572_v60, 0.0 }
 0x239   : > { %vm581_vm5 = vcmp.ge.f32.partialorder %v573_v61, 0.0  ;;  %vm582_vm6 = vcmp.ge.f32.partialorder %v574_v62, 0.0  ;;  %vm583_vm7 = vcmp.ge.f32.partialorder %v575_v63, 0.0  ;;  %vm584_vm8 = vcmp.ge.f32.partialorder %v576_v0, 0.0 }
 0x23a   : > { %v585_v2 = vmul.f32 0.2, %v569_v57  ;;  %v586_v3 = vmul.f32 0.2, %v570_v58  ;;  %v587_v4 = vmul.f32 0.2, %v571_v59 }
 0x23b   : > { %v588_v5 = vmul.f32 0.2, %v572_v60  ;;  %v589_v6 = vmul.f32 0.2, %v573_v61  ;;  %v590_v7 = vmul.f32 0.2, %v574_v62 }
 0x23c   : > { %v591_v8 = vmul.f32 0.2, %v575_v63  ;;  %v592_v9 = vmul.f32 0.2, %v576_v0  ;;  %v593_v10 = vsel %vm577_vm1, %v569_v57, %v585_v2  ;;  %v594_v11 = vsel %vm578_vm2, %v570_v58, %v586_v3 }
 0x23d   : > { %v595_v12 = vsel %vm579_vm3, %v571_v59, %v587_v4  ;;  %v596_v13 = vsel %vm580_vm4, %v572_v60, %v588_v5  ;;  %v597_v14 = vsel %vm581_vm5, %v573_v61, %v589_v6  ;;  %v598_v15 = vsel %vm582_vm6, %v574_v62, %v590_v7  ;;  %601 = vst [vmem:[%s170_s25] sm:$0xff] %v593_v10 }
 0x23e   : > { %602 = vst [vmem:[%s170_s25 + $0x8] sm:$0xff] %v594_v11  ;;  %v599_v16 = vsel %vm583_vm7, %v575_v63, %v591_v8  ;;  %v600_v17 = vsel %vm584_vm8, %v576_v0, %v592_v9  ;;  %603 = vst [vmem:[%s170_s25 + $0x10] sm:$0xff] %v595_v12 }
 0x23f   : > { %604 = vst [vmem:[%s170_s25 + $0x18] sm:$0xff] %v596_v13  ;;  %605 = vst [vmem:[%s170_s25 + $0x20] sm:$0xff] %v597_v14 }
 0x240   : > { %606 = vst [vmem:[%s170_s25 + $0x28] sm:$0xff] %v598_v15  ;;  %607 = vst [vmem:[%s170_s25 + $0x30] sm:$0xff] %v599_v16 }
 0x241   : > { %608 = vst [vmem:[%s170_s25 + $0x38] sm:$0xff] %v600_v17 }
 0x242 PF: > { %s13_s12 = sadd.s32 1, %s700_s12  }
 0x243   : > { %p10_p4 = scmp.ge.s32.totalorder %s13_s12, 4  }
 0x245   :  { %12 = sbr.rel (!%p10_p4) target bundleno = 1 (0x1), region = 62 }

// kernel: netd_forward.7
= control target key start
LH: loop header
LB: loop body
LE: loop exit
PB: predicated region body
PF: predicated region fallthrough
CT: control target
= control target key end

     0   :  { %s488_s12 = smov 0   ;;  %s555_s0 = inlined_call_operand.vmem [shape: f32[2,128,256], index: 0, kind: input, shape index: {}]   ;;  %s556_s1 = inlined_call_operand.vmem [shape: f32[16,128], index: 1, kind: input, shape index: {}]   ;;  %s557_s2 = inlined_call_operand.vmem [shape: f32[16,1], index: 2, kind: input, shape index: {}]   ;;  %s558_s3 = inlined_call_operand.vmem [shape: f32[2,16,256], index: 3, kind: output, shape index: {}]  }
   0x1 LB: > { %s398_s13 = sadd.s32 4294967295, %s464_s12   ;;  %p402_p0 = scmp.ge.s32.totalorder %s464_s12, 1  ;;  %s464_s12 = sphi %s488_s12, %s13_s12  }
   0x2   : > { %p137_p1 = scmp.lt.s32.totalorder %s464_s12, 3 }
   0x4   : > { %p138_p2 = pnand %p402_p0, %p137_p1 }
   0x5   : > { %p161_p3 = scmp.lt.s32.totalorder (!%p138_p2), %s398_s13, 1 }
   0x6   : > { %141 = sbr.rel (%p138_p2) target bundleno = 558 (0x22e), region = 32 }
   0xb   : > { %v205_v0 = vld [vmem:[%s557_s2] sm:$0xff]  ;;  %v466_v1 = vmov 0.0   ;;  %s560_s13 = smov (!%p161_p3, %s398_s13), 1  ;;  %v467_v2 = vmov 0   ;;  %v204_v36 = vld [vmem:[%s556_s1 + $0x8] sm:$0xff] }
   0xc   : > { %281 = vmatprep.mubr.f32.mxu0 %v466_v1  ;;  %287 = vmatprep.mubr.f32.mxu1 %v466_v1  ;;  %s409_s16 = sshll.u32 %s560_s13, 8  ;;  %v203_v35 = vld [vmem:[%s556_s1] sm:$0xff]  ;;  %v206_v37 = vld [vmem:[%s557_s2 + $0x8] sm:$0xff]  ;;  %s410_s26 = sshll.u32 %s560_s13, 5 }
   0xd   : > { %453 = vset.pattern.permute.xlu0 %v467_v2  ;;  %s505_s19 = scalar_lea.vmem %s555_s0, %s409_s16  ;;  %s170_s29 = scalar_lea.vmem %s558_s3, %s410_s26 }
   0xe   : > { %209 = vperm.xlu0 %453, %v205_v0   ;;  %v202_v3 = vld [vmem:[%s505_s19 + $0xf8] sm:$0xff]  ;;  %v201_v4 = vld [vmem:[%s505_s19 + $0xf0] sm:$0xff]  ;;  %v200_v5 = vld [vmem:[%s505_s19 + $0xe8] sm:$0xff] }
   0xf   : > { %217 = vmatprep.subr.mxu0 %v202_v3  ;;  %411 = vmatprep.subr.mxu1 %v202_v3  ;;  %v199_v6 = vld [vmem:[%s505_s19 + $0xe0] sm:$0xff]  ;;  %v198_v7 = vld [vmem:[%s505_s19 + $0xd8] sm:$0xff]  ;;  %v197_v8 = vld [vmem:[%s505_s19 + $0xd0] sm:$0xff] }
  0x10   : > { %218 = vmatpush1.msra.mxu0 %v201_v4  ;;  %427 = vmatpush1.msra.mxu1 %v201_v4  ;;  %v196_v9 = vld [vmem:[%s505_s19 + $0xc8] sm:$0xff]  ;;  %v195_v10 = vld [vmem:[%s505_s19 + $0xc0] sm:$0xff]  ;;  %v194_v11 = vld [vmem:[%s505_s19 + $0xb8] sm:$0xff] }
  0x11   : > { %219 = vmatprep.subr.mxu0 %v200_v5  ;;  %412 = vmatprep.subr.mxu1 %v200_v5  ;;  %v193_v12 = vld [vmem:[%s505_s19 + $0xb0] sm:$0xff]  ;;  %v192_v13 = vld [vmem:[%s505_s19 + $0xa8] sm:$0xff]  ;;  %v191_v14 = vld [vmem:[%s505_s19 + $0xa0] sm:$0xff] }
  0x12   : > { %220 = vmatpush1.msra.mxu0 %v199_v6  ;;  %428 = vmatpush1.msra.mxu1 %v199_v6  ;;  %v190_v15 = vld [vmem:[%s505_s19 + $0x98] sm:$0xff]  ;;  %v189_v16 = vld [vmem:[%s505_s19 + $0x90] sm:$0xff]  ;;  %v188_v17 = vld [vmem:[%s505_s19 + $0x88] sm:$0xff] }
  0x13   : > { %221 = vmatprep.subr.mxu0 %v198_v7  ;;  %413 = vmatprep.subr.mxu1 %v198_v7  ;;  %v187_v18 = vld [vmem:[%s505_s19 + $0x80] sm:$0xff]  ;;  %v186_v19 = vld [vmem:[%s505_s19 + $0x78] sm:$0xff]  ;;  %v185_v20 = vld [vmem:[%s505_s19 + $0x70] sm:$0xff] }
  0x14   : > { %222 = vmatpush1.msra.mxu0 %v197_v8  ;;  %429 = vmatpush1.msra.mxu1 %v197_v8  ;;  %v184_v21 = vld [vmem:[%s505_s19 + $0x68] sm:$0xff]  ;;  %v183_v22 = vld [vmem:[%s505_s19 + $0x60] sm:$0xff]  ;;  %v182_v23 = vld [vmem:[%s505_s19 + $0x58] sm:$0xff] }
  0x15   : > { %223 = vmatprep.subr.mxu0 %v196_v9  ;;  %414 = vmatprep.subr.mxu1 %v196_v9  ;;  %v181_v24 = vld [vmem:[%s505_s19 + $0x50] sm:$0xff]  ;;  %v180_v25 = vld [vmem:[%s505_s19 + $0x48] sm:$0xff]  ;;  %v179_v26 = vld [vmem:[%s505_s19 + $0x40] sm:$0xff] }
  0x16   : > { %224 = vmatpush1.msra.mxu0 %v195_v10  ;;  %430 = vmatpush1.msra.mxu1 %v195_v10  ;;  %v178_v27 = vld [vmem:[%s505_s19 + $0x38] sm:$0xff]  ;;  %v177_v28 = vld [vmem:[%s505_s19 + $0x30] sm:$0xff]  ;;  %v176_v29 = vld [vmem:[%s505_s19 + $0x28] sm:$0xff] }
  0x17   : > { %225 = vmatprep.subr.mxu0 %v194_v11  ;;  %415 = vmatprep.subr.mxu1 %v194_v11  ;;  %v175_v30 = vld [vmem:[%s505_s19 + $0x20] sm:$0xff]  ;;  %v174_v31 = vld [vmem:[%s505_s19 + $0x18] sm:$0xff]  ;;  %v173_v32 = vld [vmem:[%s505_s19 + $0x10] sm:$0xff] }
  0x18   : > { %226 = vmatpush1.msra.mxu0 %v193_v12  ;;  %431 = vmatpush1.msra.mxu1 %v193_v12  ;;  %v172_v33 = vld [vmem:[%s505_s19 + $0x8] sm:$0xff]  ;;  %v171_v34 = vld [vmem:[%s505_s19] sm:$0xff] }
  0x19   : > { %227 = vmatprep.subr.mxu0 %v192_v13  ;;  %416 = vmatprep.subr.mxu1 %v192_v13 }
  0x1a   : > { %228 = vmatpush1.msra.mxu0 %v191_v14  ;;  %432 = vmatpush1.msra.mxu1 %v191_v14 }
  0x1b   : > { %229 = vmatprep.subr.mxu0 %v190_v15  ;;  %417 = vmatprep.subr.mxu1 %v190_v15 }
  0x1c   : > { %230 = vmatpush1.msra.mxu0 %v189_v16  ;;  %433 = vmatpush1.msra.mxu1 %v189_v16 }
  0x1d   : > { %231 = vmatprep.subr.mxu0 %v188_v17  ;;  %418 = vmatprep.subr.mxu1 %v188_v17 }
  0x1e   : > { %232 = vmatpush1.msra.mxu0 %v187_v18  ;;  %434 = vmatpush1.msra.mxu1 %v187_v18 }
  0x1f   : > { %233 = vmatprep.subr.mxu0 %v186_v19  ;;  %419 = vmatprep.subr.mxu1 %v186_v19 }
  0x20   : > { %234 = vmatpush1.msra.mxu0 %v185_v20  ;;  %435 = vmatpush1.msra.mxu1 %v185_v20 }
  0x21   : > { %235 = vmatprep.subr.mxu0 %v184_v21  ;;  %420 = vmatprep.subr.mxu1 %v184_v21 }
  0x22   : > { %236 = vmatpush1.msra.mxu0 %v183_v22  ;;  %436 = vmatpush1.msra.mxu1 %v183_v22 }
  0x23   : > { %237 = vmatprep.subr.mxu0 %v182_v23  ;;  %421 = vmatprep.subr.mxu1 %v182_v23 }
  0x24   : > { %238 = vmatpush1.msra.mxu0 %v181_v24  ;;  %437 = vmatpush1.msra.mxu1 %v181_v24 }
  0x25   : > { %239 = vmatprep.subr.mxu0 %v180_v25  ;;  %422 = vmatprep.subr.mxu1 %v180_v25 }
  0x26   : > { %240 = vmatpush1.msra.mxu0 %v179_v26  ;;  %438 = vmatpush1.msra.mxu1 %v179_v26 }
  0x27   : > { %241 = vmatprep.subr.mxu0 %v178_v27  ;;  %423 = vmatprep.subr.mxu1 %v178_v27 }
  0x28   : > { %242 = vmatpush1.msra.mxu0 %v177_v28  ;;  %439 = vmatpush1.msra.mxu1 %v177_v28 }
  0x29   : > { %243 = vmatprep.subr.mxu0 %v176_v29  ;;  %424 = vmatprep.subr.mxu1 %v176_v29 }
  0x2a   : > { %244 = vmatpush1.msra.mxu0 %v175_v30  ;;  %440 = vmatpush1.msra.mxu1 %v175_v30 }
  0x2b   : > { %245 = vmatprep.subr.mxu0 %v174_v31  ;;  %425 = vmatprep.subr.mxu1 %v174_v31 }
  0x2c   : > { %246 = vmatpush1.msra.mxu0 %v173_v32  ;;  %441 = vmatpush1.msra.mxu1 %v173_v32 }
  0x2d   : > { %247 = vmatprep.subr.mxu0 %v172_v33  ;;  %426 = vmatprep.subr.mxu1 %v172_v33 }
  0x2e   : > { %248 = vmatpush1.msra.mxu0 %v171_v34  ;;  %442 = vmatpush1.msra.mxu1 %v171_v34 }
  0x2f   : > { %282 = vmatmul.mubr.f32.vlgmr.msra.gmra.mxu0 %v203_v35  ;;  %288 = vmatmul.mubr.f32.vlgmr.msra.gmra.mxu1 %v204_v36 }
  0x30   : > { %214 = vperm.xlu0 %453, %v206_v37  }
  0x89   : > { %v210_v38 = vpop.permute.xlu0 %209 }
  0xab   : > { %v215_v41 = vpop.permute.xlu0 %214 }
  0xef   : > { %v283_v39 = vpop.f32.mrf.mxu0  ;;  %v289_v40 = vpop.f32.mrf.mxu1 }
  0xf0   : > { %v284_v44 = vadd.f32 %v283_v39, %v210_v38  ;;  %v290_v46 = vadd.f32 %v289_v40, %v215_v41 }
  0xf1   : > { %v285_v42 = vpop.f32.mrf.mxu0  ;;  %v291_v43 = vpop.f32.mrf.mxu1 }
  0xf2   : > { %v286_v45 = vadd.f32 %v285_v42, %v210_v38  ;;  %v292_v47 = vadd.f32 %v291_v43, %v215_v41 }
  0xf4   : > { %v294_v48 = vadd.f32 %v286_v45, %v284_v44  ;;  %v297_v49 = vadd.f32 %v292_v47, %v290_v46 }
  0xf6   : > { %295 = vadd.xlane.f32.xlu1 %v294_v48 }
  0xfa   : > { %298 = vadd.xlane.f32.xlu1 %v297_v49 }
 0x17f   : > { %v296_v50 = vpop.xlane.xlu1 %295 }
 0x180   : > { %v301_v51 = vmul.f32 0.00390625, %v296_v50 }
 0x182   : > { %v303_v52 = vsub.f32 %v284_v44, %v301_v51  ;;  %v304_v53 = vsub.f32 %v286_v45, %v301_v51 }
 0x183   : > { %v299_v54 = vpop.xlane.xlu1 %298 }
 0x184   : > { %v302_v55 = vmul.f32 0.00390625, %v299_v54  ;;  %v307_v56 = vmul.f32 %v303_v52, %v303_v52  ;;  %v308_v57 = vmul.f32 %v304_v53, %v304_v53 }
 0x186   : > { %v305_v58 = vsub.f32 %v290_v46, %v302_v55  ;;  %v306_v59 = vsub.f32 %v292_v47, %v302_v55  ;;  %v311_v60 = vadd.f32 %v308_v57, %v307_v56 }
 0x188   : > { %312 = vadd.xlane.f32.xlu0 %v311_v60  ;;  %v309_v61 = vmul.f32 %v305_v58, %v305_v58  ;;  %v310_v62 = vmul.f32 %v306_v59, %v306_v59 }
 0x18a   : > { %v314_v63 = vadd.f32 %v310_v62, %v309_v61 }
 0x18c   : > { %315 = vadd.xlane.f32.xlu1 %v314_v63 }
 0x211   : > { %v313_v0 = vpop.xlane.xlu0 %312 }
 0x212   : > { %v317_v1 = vmul.f32 0.00390625, %v313_v0 }
 0x214   : > { %v319_v2 = vadd.f32 1e-05, %v317_v1 }
 0x215   : > { %v316_v3 = vpop.xlane.xlu1 %315 }
 0x216   : > { %454 = vrsqrt.f32 %v319_v2  ;;  %v318_v4 = vmul.f32 0.00390625, %v316_v3 }
 0x218   : > { %v320_v5 = vadd.f32 1e-05, %v318_v4 }
 0x21a   : > { %456 = vrsqrt.f32 %v320_v5 }
 0x223   : > { %v455_v6 = vpop.eup %454 }
 0x224   : > { %v323_v7 = vmul.f32 %v455_v6, %v303_v52  ;;  %v324_v8 = vmul.f32 %v455_v6, %v304_v53 }
 0x226   : > { %vm327_vm0 = vcmp.ge.f32.partialorder %v323_v7, 0.0  ;;  %vm328_vm1 = vcmp.ge.f32.partialorder %v324_v8, 0.0  ;;  %v331_v9 = vmul.f32 0.2, %v323_v7  ;;  %v332_v10 = vmul.f32 0.2, %v324_v8 }
 0x227   : > { %v457_v11 = vpop.eup %456 }
 0x228   : > { %v335_v12 = vsel %vm327_vm0, %v323_v7, %v331_v9  ;;  %v336_v13 = vsel %vm328_vm1, %v324_v8, %v332_v10  ;;  %v325_v14 = vmul.f32 %v457_v11, %v305_v58  ;;  %v326_v15 = vmul.f32 %v457_v11, %v306_v59 }
 0x229   : > { %339 = vst [vmem:[%s170_s29] sm:$0xff] %v335_v12  ;;  %340 = vst [vmem:[%s170_s29 + $0x8] sm:$0xff] %v336_v13 }
 0x22a   : > { %vm329_vm2 = vcmp.ge.f32.partialorder %v325_v14, 0.0  ;;  %vm330_vm3 = vcmp.ge.f32.partialorder %v326_v15, 0.0  ;;  %v333_v16 = vmul.f32 0.2, %v325_v14  ;;  %v334_v17 = vmul.f32 0.2, %v326_v15 }
 0x22c   : > { %v337_v18 = vsel %vm329_vm2, %v325_v14, %v333_v16  ;;  %v338_v19 = vsel %vm330_vm3, %v326_v15, %v334_v17 }
 0x22d   : > { %341 = vst [vmem:[%s170_s29 + $0x10] sm:$0xff] %v337_v18  ;;  %342 = vst [vmem:[%s170_s29 + $0x18] sm:$0xff] %v338_v19 }
 0x22e PF: > { %s13_s12 = sadd.s32 1, %s464_s12  }
 0x22f   : > { %p10_p4 = scmp.ge.s32.totalorder %s13_s12, 4  }
 0x231   :  { %12 = sbr.rel (!%p10_p4) target bundleno = 1 (0x1), region = 62 }

// kernel: netd_forward.8
= control target key start
LH: loop header
LB: loop body
LE: loop exit
PB: predicated region body
PF: predicated region fallthrough
CT: control target
= control target key end

     0   :  { %s582_s12 = smov 0   ;;  %s685_s0 = inlined_call_operand.vmem [shape: f32[2,256,64], index: 0, kind: input, shape index: {}]   ;;  %s686_s1 = inlined_call_operand.vmem [shape: f32[32,256], index: 1, kind: input, shape index: {}]   ;;  %s687_s2 = inlined_call_operand.vmem [shape: f32[32,1], index: 2, kind: input, shape index: {}]   ;;  %s688_s3 = inlined_call_operand.vmem [shape: f32[2,32,64], index: 3, kind: output, shape index: {}]  }
   0x1 LB: > { %s445_s13 = sadd.s32 4294967295, %s559_s12   ;;  %p449_p0 = scmp.ge.s32.totalorder %s559_s12, 1  ;;  %s559_s12 = sphi %s582_s12, %s13_s12  }
   0x2   : > { %p137_p1 = scmp.lt.s32.totalorder %s559_s12, 3 }
   0x4   : > { %p138_p2 = pnand %p449_p0, %p137_p1 }
   0x5   : > { %p161_p3 = scmp.lt.s32.totalorder (!%p138_p2), %s445_s13, 1 }
   0x6   : > { %141 = sbr.rel (%p138_p2) target bundleno = 562 (0x232), region = 32 }
   0xb   : > { %v204_v0 = vld [vmem:[%s686_s1 + $0x8] sm:$0xff]  ;;  %s690_s13 = smov (!%p161_p3, %s445_s13), 1  ;;  %v561_v2 = vmov 0   ;;  %v211_v3 = vld [vmem:[%s687_s2] sm:$0xff]  ;;  %v213_v4 = vld [vmem:[%s687_s2 + $0x10] sm:$0xff]  ;;  %vm320_vm0 = vcmask 523264  }
   0xc   : > { %v208_v1 = vld [vmem:[%s686_s1 + $0x28] sm:$0xff]  ;;  %299 = vmatprep.mubr.f32.mxu0 %v204_v0  ;;  %543 = vset.pattern.permute.xlu0 %v561_v2  ;;  %s456_s22 = sshll.u32 %s690_s13, 8  ;;  %v203_v37 = vld [vmem:[%s686_s1] sm:$0xff]  ;;  %v206_v39 = vld [vmem:[%s686_s1 + $0x18] sm:$0xff]  ;;  %s457_s17 = sshll.u32 %s690_s13, 5 }
   0xd   : > { %309 = vmatprep.mubr.f32.mxu1 %v208_v1  ;;  %544 = vset.pattern.permute.xlu1 %v561_v2  ;;  %s608_s25 = scalar_lea.vmem %s685_s0, %s456_s22  ;;  %v207_v38 = vld [vmem:[%s686_s1 + $0x20] sm:$0xff]  ;;  %v210_v40 = vld [vmem:[%s686_s1 + $0x38] sm:$0xff]  ;;  %v212_v41 = vld [vmem:[%s687_s2 + $0x8] sm:$0xff]  ;;  %s170_s20 = scalar_lea.vmem %s688_s3, %s457_s17 }
   0xe   : > { %217 = vperm.xlu0 %543, %v211_v3   ;;  %227 = vperm.xlu1 %544, %v213_v4   ;;  %v202_v5 = vld [vmem:[%s608_s25 + $0xf8] sm:$0xff]  ;;  %v201_v7 = vld [vmem:[%s608_s25 + $0xf0] sm:$0xff]  ;;  %v200_v9 = vld [vmem:[%s608_s25 + $0xe8] sm:$0xff] }
   0xf   : > { %v186_v6 = vld [vmem:[%s608_s25 + $0x78] sm:$0xff]  ;;  %458 = vmatprep.subr.mxu0 %v202_v5  ;;  %502 = vmatprep.subr.mxu1 %v202_v5  ;;  %v185_v8 = vld [vmem:[%s608_s25 + $0x70] sm:$0xff]  ;;  %v184_v10 = vld [vmem:[%s608_s25 + $0x68] sm:$0xff] }
  0x10   : > { %459 = vmatpush3.msra.mxu0 %v186_v6  ;;  %518 = vmatpush3.msra.mxu1 %v186_v6  ;;  %v199_v11 = vld [vmem:[%s608_s25 + $0xe0] sm:$0xff]  ;;  %v198_v13 = vld [vmem:[%s608_s25 + $0xd8] sm:$0xff]  ;;  %v197_v15 = vld [vmem:[%s608_s25 + $0xd0] sm:$0xff] }
  0x11   : > { %460 = vmatprep.subr.mxu0 %v201_v7  ;;  %503 = vmatprep.subr.mxu1 %v201_v7  ;;  %v183_v12 = vld [vmem:[%s608_s25 + $0x60] sm:$0xff]  ;;  %v182_v14 = vld [vmem:[%s608_s25 + $0x58] sm:$0xff]  ;;  %v181_v16 = vld [vmem:[%s608_s25 + $0x50] sm:$0xff] }
  0x12   : > { %461 = vmatpush3.msra.mxu0 %v185_v8  ;;  %519 = vmatpush3.msra.mxu1 %v185_v8  ;;  %v196_v17 = vld [vmem:[%s608_s25 + $0xc8] sm:$0xff]  ;;  %v195_v19 = vld [vmem:[%s608_s25 + $0xc0] sm:$0xff]  ;;  %v194_v21 = vld [vmem:[%s608_s25 + $0xb8] sm:$0xff] }
  0x13   : > { %462 = vmatprep.subr.mxu0 %v200_v9  ;;  %504 = vmatprep.subr.mxu1 %v200_v9  ;;  %v180_v18 = vld [vmem:[%s608_s25 + $0x48] sm:$0xff]  ;;  %v179_v20 = vld [vmem:[%s608_s25 + $0x40] sm:$0xff]  ;;  %v178_v22 = vld [vmem:[%s608_s25 + $0x38] sm:$0xff] }
  0x14   : > { %463 = vmatpush3.msra.mxu0 %v184_v10  ;;  %520 = vmatpush3.msra.mxu1 %v184_v10  ;;  %v193_v23 = vld [vmem:[%s608_s25 + $0xb0] sm:$0xff]  ;;  %v192_v25 = vld [vmem:[%s608_s25 + $0xa8] sm:$0xff]  ;;  %v191_v27 = vld [vmem:[%s608_s25 + $0xa0] sm:$0xff] }
  0x15   : > { %464 = vmatprep.subr.mxu0 %v199_v11  ;;  %505 = vmatprep.subr.mxu1 %v199_v11  ;;  %v177_v24 = vld [vmem:[%s608_s25 + $0x30] sm:$0xff]  ;;  %v176_v26 = vld [vmem:[%s608_s25 + $0x28] sm:$0xff]  ;;  %v175_v28 = vld [vmem:[%s608_s25 + $0x20] sm:$0xff] }
  0x16   : > { %465 = vmatpush3.msra.mxu0 %v183_v12  ;;  %521 = vmatpush3.msra.mxu1 %v183_v12  ;;  %v190_v29 = vld [vmem:[%s608_s25 + $0x98] sm:$0xff]  ;;  %v189_v31 = vld [vmem:[%s608_s25 + $0x90] sm:$0xff]  ;;  %v188_v33 = vld [vmem:[%s608_s25 + $0x88] sm:$0xff] }
  0x17   : > { %466 = vmatprep.subr.mxu0 %v198_v13  ;;  %506 = vmatprep.subr.mxu1 %v198_v13  ;;  %v174_v30 = vld [vmem:[%s608_s25 + $0x18] sm:$0xff]  ;;  %v173_v32 = vld [vmem:[%s608_s25 + $0x10] sm:$0xff]  ;;  %v172_v34 = vld [vmem:[%s608_s25 + $0x8] sm:$0xff] }
  0x18   : > { %467 = vmatpush3.msra.mxu0 %v182_v14  ;;  %522 = vmatpush3.msra.mxu1 %v182_v14  ;;  %v187_v35 = vld [vmem:[%s608_s25 + $0x80] sm:$0xff]  ;;  %v214_v42 = vld [vmem:[%s687_s2 + $0x18] sm:$0xff]  ;;  %v205_v43 = vld [vmem:[%s686_s1 + $0x10] sm:$0xff] }
  0x19   : > { %468 = vmatprep.subr.mxu0 %v197_v15  ;;  %507 = vmatprep.subr.mxu1 %v197_v15  ;;  %v171_v36 = vld [vmem:[%s608_s25] sm:$0xff]  ;;  %v209_v44 = vld [vmem:[%s686_s1 + $0x30] sm:$0xff] }
  0x1a   : > { %469 = vmatpush3.msra.mxu0 %v181_v16  ;;  %523 = vmatpush3.msra.mxu1 %v181_v16 }
  0x1b   : > { %470 = vmatprep.subr.mxu0 %v196_v17  ;;  %508 = vmatprep.subr.mxu1 %v196_v17 }
  0x1c   : > { %471 = vmatpush3.msra.mxu0 %v180_v18  ;;  %524 = vmatpush3.msra.mxu1 %v180_v18 }
  0x1d   : > { %472 = vmatprep.subr.mxu0 %v195_v19  ;;  %509 = vmatprep.subr.mxu1 %v195_v19 }
  0x1e   : > { %473 = vmatpush3.msra.mxu0 %v179_v20  ;;  %525 = vmatpush3.msra.mxu1 %v179_v20 }
  0x1f   : > { %474 = vmatprep.subr.mxu0 %v194_v21  ;;  %510 = vmatprep.subr.mxu1 %v194_v21 }
  0x20   : > { %475 = vmatpush3.msra.mxu0 %v178_v22  ;;  %526 = vmatpush3.msra.mxu1 %v178_v22 }
  0x21   : > { %476 = vmatprep.subr.mxu0 %v193_v23  ;;  %511 = vmatprep.subr.mxu1 %v193_v23 }
  0x22   : > { %477 = vmatpush3.msra.mxu0 %v177_v24  ;;  %527 = vmatpush3.msra.mxu1 %v177_v24 }
  0x23   : > { %478 = vmatprep.subr.mxu0 %v192_v25  ;;  %512 = vmatprep.subr.mxu1 %v192_v25 }
  0x24   : > { %479 = vmatpush3.msra.mxu0 %v176_v26  ;;  %528 = vmatpush3.msra.mxu1 %v176_v26 }
  0x25   : > { %480 = vmatprep.subr.mxu0 %v191_v27  ;;  %513 = vmatprep.subr.mxu1 %v191_v27 }
  0x26   : > { %481 = vmatpush3.msra.mxu0 %v175_v28  ;;  %529 = vmatpush3.msra.mxu1 %v175_v28 }
  0x27   : > { %482 = vmatprep.subr.mxu0 %v190_v29  ;;  %514 = vmatprep.subr.mxu1 %v190_v29 }
  0x28   : > { %483 = vmatpush3.msra.mxu0 %v174_v30  ;;  %530 = vmatpush3.msra.mxu1 %v174_v30 }
  0x29   : > { %484 = vmatprep.subr.mxu0 %v189_v31  ;;  %515 = vmatprep.subr.mxu1 %v189_v31 }
  0x2a   : > { %485 = vmatpush3.msra.mxu0 %v173_v32  ;;  %531 = vmatpush3.msra.mxu1 %v173_v32 }
  0x2b   : > { %486 = vmatprep.subr.mxu0 %v188_v33  ;;  %516 = vmatprep.subr.mxu1 %v188_v33 }
  0x2c   : > { %487 = vmatpush3.msra.mxu0 %v172_v34  ;;  %532 = vmatpush3.msra.mxu1 %v172_v34 }
  0x2d   : > { %488 = vmatprep.subr.mxu0 %v187_v35  ;;  %517 = vmatprep.subr.mxu1 %v187_v35 }
  0x2e   : > { %489 = vmatpush3.msra.mxu0 %v171_v36  ;;  %533 = vmatpush3.msra.mxu1 %v171_v36 }
  0x2f   : > { %300 = vmatmul.mubr.f32.vlgmr.msra.gmra.mxu0 %v203_v37  ;;  %310 = vmatmul.mubr.f32.vlgmr.msra.gmra.mxu1 %v207_v38 }
  0x30   : > { %304 = vmatprep.mubr.f32.mxu0 %v206_v39  ;;  %314 = vmatprep.mubr.f32.mxu1 %v210_v40 }
  0x31   : > { %222 = vperm.xlu0 %543, %v212_v41   ;;  %232 = vperm.xlu1 %544, %v214_v42  }
  0x33   : > { %305 = vmatmul.mubr.f32.gmra.mxu0 %v205_v43  ;;  %315 = vmatmul.mubr.f32.gmra.mxu1 %v209_v44 }
  0x89   : > { %v218_v47 = vpop.permute.xlu0 %217  ;;  %v228_v48 = vpop.permute.xlu1 %227 }
  0xac   : > { %v223_v62 = vpop.permute.xlu0 %222  ;;  %v233_v63 = vpop.permute.xlu1 %232 }
  0xef   : > { %v490_v45 = vpop.f32.mrf.mxu0  ;;  %v496_v46 = vpop.f32.mrf.mxu1 }
  0xf1   : > { %v491_v49 = vpop.f32.mrf.mxu0  ;;  %v497_v50 = vpop.f32.mrf.mxu1 }
  0xf2   : > { %v492_v51 = vadd.f32 %v491_v49, %v490_v45  ;;  %v498_v52 = vadd.f32 %v497_v50, %v496_v46 }
  0xf3   : > { %v493_v53 = vpop.f32.mrf.mxu0  ;;  %v499_v54 = vpop.f32.mrf.mxu1 }
  0xf4   : > { %v302_v55 = vadd.f32 %v492_v51, %v218_v47  ;;  %v312_v58 = vadd.f32 %v498_v52, %v228_v48 }
  0xf5   : > { %v494_v56 = vpop.f32.mrf.mxu0  ;;  %v500_v57 = vpop.f32.mrf.mxu1 }
  0xf6   : > { %v495_v59 = vadd.f32 %v494_v56, %v493_v53  ;;  %v501_v60 = vadd.f32 %v500_v57, %v499_v54  ;;  %v321_v61 = vsel %vm320_vm0, %v302_v55, 0.0  ;;  %v327_v3 = vsel %vm320_vm0, %v312_v58, 0.0 }
  0xf7   : > { %322 = vadd.xlane.f32.xlu0 %v321_v61 }
  0xf8   : > { %v307_v0 = vadd.f32 %v495_v59, %v223_v62  ;;  %v317_v1 = vadd.f32 %v501_v60, %v233_v63 }
  0xfa   : > { %v324_v2 = vsel %vm320_vm0, %v307_v0, 0.0  ;;  %v330_v4 = vsel %vm320_vm0, %v317_v1, 0.0 }
  0xfb   : > { %325 = vadd.xlane.f32.xlu1 %v324_v2  ;;  %328 = vadd.xlane.f32.xlu0 %v327_v3 }
  0xff   : > { %331 = vadd.xlane.f32.xlu0 %v330_v4 }
 0x180   : > { %v323_v5 = vpop.xlane.xlu0 %322 }
 0x181   : > { %v334_v6 = vmul.f32 0.015625, %v323_v5 }
 0x183   : > { %v338_v7 = vsub.f32 %v302_v55, %v334_v6 }
 0x184   : > { %v326_v8 = vpop.xlane.xlu1 %325  ;;  %v329_v9 = vpop.xlane.xlu0 %328 }
 0x185   : > { %v335_v10 = vmul.f32 0.015625, %v326_v8  ;;  %v336_v11 = vmul.f32 0.015625, %v329_v9  ;;  %v342_v12 = vmul.f32 %v338_v7, %v338_v7 }
 0x187   : > { %v339_v13 = vsub.f32 %v307_v0, %v335_v10  ;;  %v340_v14 = vsub.f32 %v312_v58, %v336_v11  ;;  %v346_v15 = vsel %vm320_vm0, %v342_v12, 0.0 }
 0x188   : > { %347 = vadd.xlane.f32.xlu1 %v346_v15  ;;  %v332_v16 = vpop.xlane.xlu0 %331 }
 0x189   : > { %v337_v17 = vmul.f32 0.015625, %v332_v16  ;;  %v343_v18 = vmul.f32 %v339_v13, %v339_v13  ;;  %v344_v19 = vmul.f32 %v340_v14, %v340_v14 }
 0x18b   : > { %v341_v20 = vsub.f32 %v317_v1, %v337_v17  ;;  %v349_v21 = vsel %vm320_vm0, %v343_v18, 0.0  ;;  %v352_v22 = vsel %vm320_vm0, %v344_v19, 0.0 }
 0x18c   : > { %350 = vadd.xlane.f32.xlu0 %v349_v21  ;;  %353 = vadd.xlane.f32.xlu1 %v352_v22 }
 0x18d   : > { %v345_v23 = vmul.f32 %v341_v20, %v341_v20 }
 0x18f   : > { %v355_v24 = vsel %vm320_vm0, %v345_v23, 0.0 }
 0x190   : > { %356 = vadd.xlane.f32.xlu0 %v355_v24 }
 0x211   : > { %v348_v25 = vpop.xlane.xlu1 %347 }
 0x212   : > { %v358_v26 = vmul.f32 0.015625, %v348_v25 }
 0x214   : > { %v362_v27 = vadd.f32 1e-05, %v358_v26 }
 0x215   : > { %v354_v28 = vpop.xlane.xlu1 %353  ;;  %v351_v29 = vpop.xlane.xlu0 %350 }
 0x216   : > { %545 = vrsqrt.f32 %v362_v27  ;;  %v360_v30 = vmul.f32 0.015625, %v354_v28  ;;  %v359_v31 = vmul.f32 0.015625, %v351_v29 }
 0x218   : > { %v364_v32 = vadd.f32 1e-05, %v360_v30  ;;  %v363_v33 = vadd.f32 1e-05, %v359_v31 }
 0x219   : > { %v357_v34 = vpop.xlane.xlu0 %356 }
 0x21a   : > { %547 = vrsqrt.f32 %v364_v32  ;;  %v361_v35 = vmul.f32 0.015625, %v357_v34 }
 0x21b   : > { %549 = vrsqrt.f32 %v363_v33 }
 0x21c   : > { %v365_v36 = vadd.f32 1e-05, %v361_v35 }
 0x21e   : > { %551 = vrsqrt.f32 %v365_v36 }
 0x223   : > { %v546_v37 = vpop.eup %545 }
 0x224   : > { %v370_v38 = vmul.f32 %v546_v37, %v338_v7 }
 0x226   : > { %vm374_vm1 = vcmp.ge.f32.partialorder %v370_v38, 0.0  ;;  %v378_v39 = vmul.f32 0.2, %v370_v38 }
 0x227   : > { %v548_v40 = vpop.eup %547 }
 0x228   : > { %v550_v41 = vpop.eup %549  ;;  %v382_v42 = vsel %vm374_vm1, %v370_v38, %v378_v39  ;;  %v372_v43 = vmul.f32 %v548_v40, %v340_v14 }
 0x229   : > { %386 = vst.msk [vmem:[%s170_s20] sm:$0xff] %vm320_vm0, %v382_v42  ;;  %v371_v44 = vmul.f32 %v550_v41, %v339_v13 }
 0x22a   : > { %vm376_vm2 = vcmp.ge.f32.partialorder %v372_v43, 0.0  ;;  %v380_v45 = vmul.f32 0.2, %v372_v43 }
 0x22b   : > { %v552_v46 = vpop.eup %551  ;;  %vm375_vm3 = vcmp.ge.f32.partialorder %v371_v44, 0.0  ;;  %v379_v47 = vmul.f32 0.2, %v371_v44 }
 0x22c   : > { %v384_v48 = vsel %vm376_vm2, %v372_v43, %v380_v45  ;;  %v373_v49 = vmul.f32 %v552_v46, %v341_v20 }
 0x22d   : > { %388 = vst.msk [vmem:[%s170_s20 + $0x10] sm:$0xff] %vm320_vm0, %v384_v48  ;;  %v383_v50 = vsel %vm375_vm3, %v371_v44, %v379_v47 }
 0x22e   : > { %387 = vst.msk [vmem:[%s170_s20 + $0x8] sm:$0xff] %vm320_vm0, %v383_v50  ;;  %vm377_vm4 = vcmp.ge.f32.partialorder %v373_v49, 0.0  ;;  %v381_v51 = vmul.f32 0.2, %v373_v49 }
 0x230   : > { %v385_v52 = vsel %vm377_vm4, %v373_v49, %v381_v51 }
 0x231   : > { %389 = vst.msk [vmem:[%s170_s20 + $0x18] sm:$0xff] %vm320_vm0, %v385_v52 }
 0x232 PF: > { %s13_s12 = sadd.s32 1, %s559_s12  }
 0x233   : > { %p10_p4 = scmp.ge.s32.totalorder %s13_s12, 4  }
 0x235   :  { %12 = sbr.rel (!%p10_p4) target bundleno = 1 (0x1), region = 62 }

// kernel: netd_forward.9
= control target key start
LH: loop header
LB: loop body
LE: loop exit
PB: predicated region body
PF: predicated region fallthrough
CT: control target
= control target key end

     0   :  { %s1002_s20 = smov 0   ;;  %s1309_s0 = inlined_call_operand.vmem [shape: f32[2,512,16], index: 0, kind: input, shape index: {}]   ;;  %s1310_s1 = inlined_call_operand.vmem [shape: f32[64,512], index: 1, kind: input, shape index: {}]   ;;  %s1311_s2 = inlined_call_operand.vmem [shape: f32[64,1], index: 2, kind: input, shape index: {}]   ;;  %s1312_s3 = inlined_call_operand.vmem [shape: f32[64,16], index: 3, kind: input, shape index: {}]   ;;  %s1313_s4 = inlined_call_operand.<no memory space> [shape: f32[1,1], index: 4, kind: input, shape index: {}]   ;;  %s1314_s5 = inlined_call_operand.vmem [shape: f32[2,1,1], index: 5, kind: output, shape index: {}]  }
   0x1   :  { %v10_v0 = vstv %s1313_s4 }
   0x2   :  { %11 = vst [vmem:[#allocation2] sm:$0x1] %v10_v0 }
   0x3 LB: > { %s811_s21 = sadd.s32 4294967295, %s966_s20   ;;  %p815_p0 = scmp.ge.s32.totalorder %s966_s20, 1  ;;  %s966_s20 = sphi %s1002_s20, %s17_s20  }
   0x4   : > { %p189_p1 = scmp.lt.s32.totalorder %s966_s20, 3 }
   0x6   : > { %p190_p2 = pnand %p815_p0, %p189_p1 }
   0x7   : > { %p215_p3 = scmp.lt.s32.totalorder (!%p190_p2), %s811_s21, 1 }
   0x8   : > { %193 = sbr.rel (%p190_p2) target bundleno = 744 (0x2e8), region = 40 }
   0xd   : > { %v288_v1 = vld [vmem:[%s1310_s1 + $0x8] sm:$0xff]  ;;  %v290_v2 = vld [vmem:[%s1310_s1 + $0x18] sm:$0xff]  ;;  %s1316_s21 = smov (!%p215_p3, %s811_s21), 1  ;;  %v968_v3 = vmov 0   ;;  %vm577_vm0 = vcmask 130048   ;;  %vm762_vm9 = vcmask 0  }
   0xe   : > { %431 = vmatprep.mubr.f32.mxu0 %v288_v1  ;;  %536 = vmatprep.mubr.f32.mxu1 %v290_v2  ;;  %s820_s25 = sshll.u32 %s1316_s21, 9  ;;  %s222_s27 = scalar_lea.vmem %s1314_s5, %s1316_s21 }
   0xf   : > { %942 = vset.pattern.permute.xlu0 %v968_v3  ;;  %943 = vset.pattern.permute.xlu1 %v968_v3  ;;  %s1022_s28 = scalar_lea.vmem %s1309_s0, %s820_s25 }
  0x10   : > { %v254_v4 = vld [vmem:[%s1022_s28 + $0xf8] sm:$0xff]  ;;  %v253_v8 = vld [vmem:[%s1022_s28 + $0xf0] sm:$0xff]  ;;  %v252_v12 = vld [vmem:[%s1022_s28 + $0xe8] sm:$0xff] }
  0x11   : > { %v286_v5 = vld [vmem:[%s1022_s28 + $0x1f8] sm:$0xff]  ;;  %821 = vmatprep.subr.mxu0 %v254_v4  ;;  %v285_v9 = vld [vmem:[%s1022_s28 + $0x1f0] sm:$0xff]  ;;  %v284_v13 = vld [vmem:[%s1022_s28 + $0x1e8] sm:$0xff] }
  0x12   : > { %v238_v6 = vld [vmem:[%s1022_s28 + $0x78] sm:$0xff]  ;;  %877 = vmatprep.subr.mxu1 %v286_v5  ;;  %v237_v10 = vld [vmem:[%s1022_s28 + $0x70] sm:$0xff]  ;;  %v236_v14 = vld [vmem:[%s1022_s28 + $0x68] sm:$0xff] }
  0x13   : > { %v270_v7 = vld [vmem:[%s1022_s28 + $0x178] sm:$0xff]  ;;  %822 = vmatpush3.msra.mxu0 %v238_v6  ;;  %v269_v11 = vld [vmem:[%s1022_s28 + $0x170] sm:$0xff]  ;;  %v268_v15 = vld [vmem:[%s1022_s28 + $0x168] sm:$0xff] }
  0x14   : > { %878 = vmatpush3.msra.mxu1 %v270_v7  ;;  %823 = vmatprep.subr.mxu0 %v253_v8  ;;  %v251_v16 = vld [vmem:[%s1022_s28 + $0xe0] sm:$0xff]  ;;  %v250_v20 = vld [vmem:[%s1022_s28 + $0xd8] sm:$0xff]  ;;  %v249_v24 = vld [vmem:[%s1022_s28 + $0xd0] sm:$0xff] }
  0x15   : > { %879 = vmatprep.subr.mxu1 %v285_v9  ;;  %824 = vmatpush3.msra.mxu0 %v237_v10  ;;  %v283_v17 = vld [vmem:[%s1022_s28 + $0x1e0] sm:$0xff]  ;;  %v282_v21 = vld [vmem:[%s1022_s28 + $0x1d8] sm:$0xff]  ;;  %v281_v25 = vld [vmem:[%s1022_s28 + $0x1d0] sm:$0xff] }
  0x16   : > { %880 = vmatpush3.msra.mxu1 %v269_v11  ;;  %825 = vmatprep.subr.mxu0 %v252_v12  ;;  %v235_v18 = vld [vmem:[%s1022_s28 + $0x60] sm:$0xff]  ;;  %v234_v22 = vld [vmem:[%s1022_s28 + $0x58] sm:$0xff]  ;;  %v233_v26 = vld [vmem:[%s1022_s28 + $0x50] sm:$0xff] }
  0x17   : > { %881 = vmatprep.subr.mxu1 %v284_v13  ;;  %v267_v19 = vld [vmem:[%s1022_s28 + $0x160] sm:$0xff]  ;;  %826 = vmatpush3.msra.mxu0 %v236_v14  ;;  %v266_v23 = vld [vmem:[%s1022_s28 + $0x158] sm:$0xff]  ;;  %v265_v27 = vld [vmem:[%s1022_s28 + $0x150] sm:$0xff] }
  0x18   : > { %882 = vmatpush3.msra.mxu1 %v268_v15  ;;  %827 = vmatprep.subr.mxu0 %v251_v16  ;;  %v248_v28 = vld [vmem:[%s1022_s28 + $0xc8] sm:$0xff]  ;;  %v247_v32 = vld [vmem:[%s1022_s28 + $0xc0] sm:$0xff]  ;;  %v246_v36 = vld [vmem:[%s1022_s28 + $0xb8] sm:$0xff] }
  0x19   : > { %883 = vmatprep.subr.mxu1 %v283_v17  ;;  %828 = vmatpush3.msra.mxu0 %v235_v18  ;;  %v280_v29 = vld [vmem:[%s1022_s28 + $0x1c8] sm:$0xff]  ;;  %v279_v33 = vld [vmem:[%s1022_s28 + $0x1c0] sm:$0xff]  ;;  %v278_v37 = vld [vmem:[%s1022_s28 + $0x1b8] sm:$0xff] }
  0x1a   : > { %884 = vmatpush3.msra.mxu1 %v267_v19  ;;  %829 = vmatprep.subr.mxu0 %v250_v20  ;;  %v232_v30 = vld [vmem:[%s1022_s28 + $0x48] sm:$0xff]  ;;  %v231_v34 = vld [vmem:[%s1022_s28 + $0x40] sm:$0xff]  ;;  %v230_v38 = vld [vmem:[%s1022_s28 + $0x38] sm:$0xff] }
  0x1b   : > { %885 = vmatprep.subr.mxu1 %v282_v21  ;;  %830 = vmatpush3.msra.mxu0 %v234_v22  ;;  %v264_v31 = vld [vmem:[%s1022_s28 + $0x148] sm:$0xff]  ;;  %v263_v35 = vld [vmem:[%s1022_s28 + $0x140] sm:$0xff]  ;;  %v262_v39 = vld [vmem:[%s1022_s28 + $0x138] sm:$0xff] }
  0x1c   : > { %886 = vmatpush3.msra.mxu1 %v266_v23  ;;  %831 = vmatprep.subr.mxu0 %v249_v24  ;;  %v245_v40 = vld [vmem:[%s1022_s28 + $0xb0] sm:$0xff]  ;;  %v244_v44 = vld [vmem:[%s1022_s28 + $0xa8] sm:$0xff]  ;;  %v243_v48 = vld [vmem:[%s1022_s28 + $0xa0] sm:$0xff] }
  0x1d   : > { %887 = vmatprep.subr.mxu1 %v281_v25  ;;  %832 = vmatpush3.msra.mxu0 %v233_v26  ;;  %v277_v41 = vld [vmem:[%s1022_s28 + $0x1b0] sm:$0xff]  ;;  %v276_v45 = vld [vmem:[%s1022_s28 + $0x1a8] sm:$0xff]  ;;  %v275_v49 = vld [vmem:[%s1022_s28 + $0x1a0] sm:$0xff] }
  0x1e   : > { %888 = vmatpush3.msra.mxu1 %v265_v27  ;;  %833 = vmatprep.subr.mxu0 %v248_v28  ;;  %v229_v42 = vld [vmem:[%s1022_s28 + $0x30] sm:$0xff]  ;;  %v228_v46 = vld [vmem:[%s1022_s28 + $0x28] sm:$0xff]  ;;  %v227_v50 = vld [vmem:[%s1022_s28 + $0x20] sm:$0xff] }
  0x1f   : > { %889 = vmatprep.subr.mxu1 %v280_v29  ;;  %834 = vmatpush3.msra.mxu0 %v232_v30  ;;  %v261_v43 = vld [vmem:[%s1022_s28 + $0x130] sm:$0xff]  ;;  %v260_v47 = vld [vmem:[%s1022_s28 + $0x128] sm:$0xff]  ;;  %v259_v51 = vld [vmem:[%s1022_s28 + $0x120] sm:$0xff] }
  0x20   : > { %890 = vmatpush3.msra.mxu1 %v264_v31  ;;  %835 = vmatprep.subr.mxu0 %v247_v32  ;;  %v242_v52 = vld [vmem:[%s1022_s28 + $0x98] sm:$0xff]  ;;  %v241_v56 = vld [vmem:[%s1022_s28 + $0x90] sm:$0xff]  ;;  %v240_v60 = vld [vmem:[%s1022_s28 + $0x88] sm:$0xff] }
  0x21   : > { %891 = vmatprep.subr.mxu1 %v279_v33  ;;  %836 = vmatpush3.msra.mxu0 %v231_v34  ;;  %v274_v53 = vld [vmem:[%s1022_s28 + $0x198] sm:$0xff]  ;;  %v273_v57 = vld [vmem:[%s1022_s28 + $0x190] sm:$0xff]  ;;  %v272_v61 = vld [vmem:[%s1022_s28 + $0x188] sm:$0xff] }
  0x22   : > { %892 = vmatpush3.msra.mxu1 %v263_v35  ;;  %837 = vmatprep.subr.mxu0 %v246_v36  ;;  %v226_v54 = vld [vmem:[%s1022_s28 + $0x18] sm:$0xff]  ;;  %v225_v58 = vld [vmem:[%s1022_s28 + $0x10] sm:$0xff]  ;;  %v224_v62 = vld [vmem:[%s1022_s28 + $0x8] sm:$0xff] }
  0x23   : > { %893 = vmatprep.subr.mxu1 %v278_v37  ;;  %838 = vmatpush3.msra.mxu0 %v230_v38  ;;  %v258_v55 = vld [vmem:[%s1022_s28 + $0x118] sm:$0xff]  ;;  %v257_v59 = vld [vmem:[%s1022_s28 + $0x110] sm:$0xff]  ;;  %v256_v63 = vld [vmem:[%s1022_s28 + $0x108] sm:$0xff] }
  0x24   : > { %894 = vmatpush3.msra.mxu1 %v262_v39  ;;  %839 = vmatprep.subr.mxu0 %v245_v40  ;;  %v239_v0 = vld [vmem:[%s1022_s28 + $0x80] sm:$0xff]  ;;  %v289_v5 = vld [vmem:[%s1310_s1 + $0x10] sm:$0xff]  ;;  %v292_v6 = vld [vmem:[%s1310_s1 + $0x28] sm:$0xff] }
  0x25   : > { %895 = vmatprep.subr.mxu1 %v277_v41  ;;  %840 = vmatpush3.msra.mxu0 %v229_v42  ;;  %v271_v1 = vld [vmem:[%s1022_s28 + $0x180] sm:$0xff]  ;;  %v294_v7 = vld [vmem:[%s1310_s1 + $0x38] sm:$0xff]  ;;  %v321_v9 = vld [vmem:[%s1311_s2 + $0x10] sm:$0xff] }
  0x26   : > { %896 = vmatpush3.msra.mxu1 %v261_v43  ;;  %841 = vmatprep.subr.mxu0 %v244_v44  ;;  %v223_v2 = vld [vmem:[%s1022_s28] sm:$0xff]  ;;  %v293_v11 = vld [vmem:[%s1310_s1 + $0x30] sm:$0xff]  ;;  %v296_v12 = vld [vmem:[%s1310_s1 + $0x48] sm:$0xff] }
  0x27   : > { %897 = vmatprep.subr.mxu1 %v276_v45  ;;  %842 = vmatpush3.msra.mxu0 %v228_v46  ;;  %v255_v3 = vld [vmem:[%s1022_s28 + $0x100] sm:$0xff]  ;;  %v298_v13 = vld [vmem:[%s1310_s1 + $0x58] sm:$0xff]  ;;  %v320_v14 = vld [vmem:[%s1311_s2 + $0x8] sm:$0xff] }
  0x28   : > { %898 = vmatpush3.msra.mxu1 %v260_v47  ;;  %843 = vmatprep.subr.mxu0 %v243_v48  ;;  %v287_v4 = vld [vmem:[%s1310_s1] sm:$0xff]  ;;  %v322_v15 = vld [vmem:[%s1311_s2 + $0x18] sm:$0xff]  ;;  %v297_v17 = vld [vmem:[%s1310_s1 + $0x50] sm:$0xff] }
  0x29   : > { %899 = vmatprep.subr.mxu1 %v275_v49  ;;  %844 = vmatpush3.msra.mxu0 %v227_v50  ;;  %v319_v8 = vld [vmem:[%s1311_s2] sm:$0xff]  ;;  %v300_v18 = vld [vmem:[%s1310_s1 + $0x68] sm:$0xff]  ;;  %v302_v19 = vld [vmem:[%s1310_s1 + $0x78] sm:$0xff] }
  0x2a   : > { %900 = vmatpush3.msra.mxu1 %v259_v51  ;;  %845 = vmatprep.subr.mxu0 %v242_v52  ;;  %v291_v10 = vld [vmem:[%s1310_s1 + $0x20] sm:$0xff]  ;;  %v324_v21 = vld [vmem:[%s1311_s2 + $0x28] sm:$0xff]  ;;  %v301_v23 = vld [vmem:[%s1310_s1 + $0x70] sm:$0xff] }
  0x2b   : > { %901 = vmatprep.subr.mxu1 %v274_v53  ;;  %846 = vmatpush3.msra.mxu0 %v226_v54  ;;  %v295_v16 = vld [vmem:[%s1310_s1 + $0x40] sm:$0xff]  ;;  %v304_v24 = vld [vmem:[%s1310_s1 + $0x88] sm:$0xff]  ;;  %v306_v25 = vld [vmem:[%s1310_s1 + $0x98] sm:$0xff] }
  0x2c   : > { %902 = vmatpush3.msra.mxu1 %v258_v55  ;;  %847 = vmatprep.subr.mxu0 %v241_v56  ;;  %v323_v20 = vld [vmem:[%s1311_s2 + $0x20] sm:$0xff]  ;;  %v325_v26 = vld [vmem:[%s1311_s2 + $0x30] sm:$0xff]  ;;  %v326_v27 = vld [vmem:[%s1311_s2 + $0x38] sm:$0xff] }
  0x2d   : > { %903 = vmatprep.subr.mxu1 %v273_v57  ;;  %848 = vmatpush3.msra.mxu0 %v225_v58  ;;  %v299_v22 = vld [vmem:[%s1310_s1 + $0x60] sm:$0xff]  ;;  %v305_v29 = vld [vmem:[%s1310_s1 + $0x90] sm:$0xff]  ;;  %v308_v30 = vld [vmem:[%s1310_s1 + $0xa8] sm:$0xff] }
  0x2e   : > { %904 = vmatpush3.msra.mxu1 %v257_v59  ;;  %849 = vmatprep.subr.mxu0 %v240_v60  ;;  %v303_v28 = vld [vmem:[%s1310_s1 + $0x80] sm:$0xff]  ;;  %v310_v31 = vld [vmem:[%s1310_s1 + $0xb8] sm:$0xff]  ;;  %v309_v33 = vld [vmem:[%s1310_s1 + $0xb0] sm:$0xff] }
  0x2f   : > { %905 = vmatprep.subr.mxu1 %v272_v61  ;;  %850 = vmatpush3.msra.mxu0 %v224_v62  ;;  %v307_v32 = vld [vmem:[%s1310_s1 + $0xa0] sm:$0xff]  ;;  %v312_v34 = vld [vmem:[%s1310_s1 + $0xc8] sm:$0xff]  ;;  %v314_v35 = vld [vmem:[%s1310_s1 + $0xd8] sm:$0xff] }
  0x30   : > { %906 = vmatpush3.msra.mxu1 %v256_v63  ;;  %851 = vmatprep.subr.mxu0 %v239_v0  ;;  %v311_v36 = vld [vmem:[%s1310_s1 + $0xc0] sm:$0xff]  ;;  %v313_v37 = vld [vmem:[%s1310_s1 + $0xd0] sm:$0xff]  ;;  %v316_v38 = vld [vmem:[%s1310_s1 + $0xe8] sm:$0xff] }
  0x31   : > { %907 = vmatprep.subr.mxu1 %v271_v1  ;;  %852 = vmatpush3.msra.mxu0 %v223_v2  ;;  %v318_v39 = vld [vmem:[%s1310_s1 + $0xf8] sm:$0xff]  ;;  %v315_v40 = vld [vmem:[%s1310_s1 + $0xe0] sm:$0xff]  ;;  %v317_v41 = vld [vmem:[%s1310_s1 + $0xf0] sm:$0xff] }
  0x32   : > { %908 = vmatpush3.msra.mxu1 %v255_v3  ;;  %432 = vmatmul.mubr.f32.vlgmr.msra.gmra.mxu0 %v287_v4 }
  0x33   : > { %537 = vmatmul.mubr.f32.vlgmr.msra.gmra.mxu1 %v289_v5  ;;  %436 = vmatprep.mubr.f32.mxu0 %v292_v6 }
  0x34   : > { %541 = vmatprep.mubr.f32.mxu1 %v294_v7  ;;  %329 = vperm.xlu0 %942, %v319_v8  }
  0x35   : > { %339 = vperm.xlu1 %943, %v321_v9  }
  0x36   : > { %437 = vmatmul.mubr.f32.gmra.mxu0 %v291_v10 }
  0x37   : > { %542 = vmatmul.mubr.f32.gmra.mxu1 %v293_v11  ;;  %441 = vmatprep.mubr.f32.mxu0 %v296_v12 }
  0x38   : > { %546 = vmatprep.mubr.f32.mxu1 %v298_v13  ;;  %334 = vperm.xlu0 %942, %v320_v14  }
  0x39   : > { %344 = vperm.xlu1 %943, %v322_v15  }
  0x3a   : > { %442 = vmatmul.mubr.f32.gmra.mxu0 %v295_v16 }
  0x3b   : > { %547 = vmatmul.mubr.f32.gmra.mxu1 %v297_v17  ;;  %446 = vmatprep.mubr.f32.mxu0 %v300_v18 }
  0x3c   : > { %551 = vmatprep.mubr.f32.mxu1 %v302_v19  ;;  %349 = vperm.xlu0 %942, %v323_v20  }
  0x3d   : > { %354 = vperm.xlu1 %943, %v324_v21  }
  0x3e   : > { %447 = vmatmul.mubr.f32.gmra.mxu0 %v299_v22 }
  0x3f   : > { %552 = vmatmul.mubr.f32.gmra.mxu1 %v301_v23  ;;  %451 = vmatprep.mubr.f32.mxu0 %v304_v24 }
  0x40   : > { %556 = vmatprep.mubr.f32.mxu1 %v306_v25  ;;  %359 = vperm.xlu0 %942, %v325_v26  }
  0x41   : > { %364 = vperm.xlu1 %943, %v326_v27  }
  0x42   : > { %452 = vmatmul.mubr.f32.gmra.mxu0 %v303_v28 }
  0x43   : > { %557 = vmatmul.mubr.f32.gmra.mxu1 %v305_v29  ;;  %456 = vmatprep.mubr.f32.mxu0 %v308_v30 }
  0x44   : > { %561 = vmatprep.mubr.f32.mxu1 %v310_v31 }
  0x46   : > { %457 = vmatmul.mubr.f32.gmra.mxu0 %v307_v32 }
  0x47   : > { %562 = vmatmul.mubr.f32.gmra.mxu1 %v309_v33  ;;  %461 = vmatprep.mubr.f32.mxu0 %v312_v34 }
  0x48   : > { %566 = vmatprep.mubr.f32.mxu1 %v314_v35 }
  0x4a   : > { %462 = vmatmul.mubr.f32.gmra.mxu0 %v311_v36 }
  0x4b   : > { %567 = vmatmul.mubr.f32.gmra.mxu1 %v313_v37  ;;  %466 = vmatprep.mubr.f32.mxu0 %v316_v38 }
  0x4c   : > { %571 = vmatprep.mubr.f32.mxu1 %v318_v39 }
  0x4e   : > { %467 = vmatmul.mubr.f32.gmra.mxu0 %v315_v40 }
  0x4f   : > { %572 = vmatmul.mubr.f32.gmra.mxu1 %v317_v41 }
  0xaf   : > { %v330_v42 = vpop.permute.xlu0 %329 }
  0xb0   : > { %v340_v60 = vpop.permute.xlu1 %339 }
  0xb3   : > { %v335_v52 = vpop.permute.xlu0 %334 }
  0xb4   : > { %v345_v10 = vpop.permute.xlu1 %344 }
  0xb7   : > { %v350_v20 = vpop.permute.xlu0 %349 }
  0xb8   : > { %v355_v30 = vpop.permute.xlu1 %354 }
  0xbb   : > { %v360_v40 = vpop.permute.xlu0 %359 }
  0xf2   : > { %v853_v43 = vpop.f32.mrf.mxu0 }
  0xf3   : > { %v909_v44 = vpop.f32.mrf.mxu1 }
  0xf4   : > { %v854_v45 = vpop.f32.mrf.mxu0 }
  0xf5   : > { %v910_v46 = vpop.f32.mrf.mxu1  ;;  %v855_v47 = vadd.f32 %v854_v45, %v853_v43 }
  0xf6   : > { %v856_v48 = vpop.f32.mrf.mxu0  ;;  %v911_v50 = vadd.f32 %v910_v46, %v909_v44 }
  0xf7   : > { %v912_v49 = vpop.f32.mrf.mxu1  ;;  %v434_v51 = vadd.f32 %v855_v47, %v330_v42 }
  0xf8   : > { %v857_v53 = vpop.f32.mrf.mxu0 }
  0xf9   : > { %v913_v54 = vpop.f32.mrf.mxu1  ;;  %v858_v55 = vadd.f32 %v857_v53, %v856_v48  ;;  %v1202_v56 = vadd.f32 %v911_v50, %v434_v51 }
  0xfa   : > { %v859_v57 = vpop.f32.mrf.mxu0  ;;  %v914_v59 = vadd.f32 %v913_v54, %v912_v49 }
  0xfb   : > { %v915_v58 = vpop.f32.mrf.mxu1  ;;  %v439_v61 = vadd.f32 %v858_v55, %v335_v52  ;;  %v578_v62 = vsel %vm577_vm0, %v1202_v56, 0.0  ;;  %v365_v52 = vpop.permute.xlu1 %364 }
  0xfc   : > { %v860_v63 = vpop.f32.mrf.mxu0  ;;  %579 = vadd.xlane.f32.xlu0 %v578_v62 }
  0xfd   : > { %v916_v0 = vpop.f32.mrf.mxu1  ;;  %v861_v1 = vadd.f32 %v860_v63, %v859_v57  ;;  %v1206_v2 = vadd.f32 %v914_v59, %v439_v61 }
  0xfe   : > { %v862_v3 = vpop.f32.mrf.mxu0  ;;  %v917_v6 = vadd.f32 %v916_v0, %v915_v58 }
  0xff   : > { %v918_v4 = vpop.f32.mrf.mxu1  ;;  %v444_v5 = vadd.f32 %v861_v1, %v340_v60  ;;  %v581_v7 = vsel %vm577_vm0, %v1206_v2, 0.0 }
 0x100   : > { %v863_v8 = vpop.f32.mrf.mxu0  ;;  %582 = vadd.xlane.f32.xlu1 %v581_v7 }
 0x101   : > { %v919_v9 = vpop.f32.mrf.mxu1  ;;  %v864_v11 = vadd.f32 %v863_v8, %v862_v3  ;;  %v1210_v12 = vadd.f32 %v917_v6, %v444_v5 }
 0x102   : > { %v865_v13 = vpop.f32.mrf.mxu0  ;;  %v920_v16 = vadd.f32 %v919_v9, %v918_v4 }
 0x103   : > { %v921_v14 = vpop.f32.mrf.mxu1  ;;  %v449_v15 = vadd.f32 %v864_v11, %v345_v10  ;;  %v584_v17 = vsel %vm577_vm0, %v1210_v12, 0.0 }
 0x104   : > { %v866_v18 = vpop.f32.mrf.mxu0  ;;  %585 = vadd.xlane.f32.xlu0 %v584_v17 }
 0x105   : > { %v922_v19 = vpop.f32.mrf.mxu1  ;;  %v867_v21 = vadd.f32 %v866_v18, %v865_v13  ;;  %v554_v22 = vadd.f32 %v920_v16, %v449_v15 }
 0x106   : > { %v868_v23 = vpop.f32.mrf.mxu0  ;;  %v923_v26 = vadd.f32 %v922_v19, %v921_v14 }
 0x107   : > { %v924_v24 = vpop.f32.mrf.mxu1  ;;  %v454_v25 = vadd.f32 %v867_v21, %v350_v20  ;;  %v587_v27 = vsel %vm577_vm0, %v554_v22, 0.0 }
 0x108   : > { %v869_v28 = vpop.f32.mrf.mxu0  ;;  %588 = vadd.xlane.f32.xlu0 %v587_v27 }
 0x109   : > { %v925_v29 = vpop.f32.mrf.mxu1  ;;  %v870_v31 = vadd.f32 %v869_v28, %v868_v23  ;;  %v559_v32 = vadd.f32 %v923_v26, %v454_v25 }
 0x10a   : > { %v871_v33 = vpop.f32.mrf.mxu0  ;;  %v926_v36 = vadd.f32 %v925_v29, %v924_v24 }
 0x10b   : > { %v927_v34 = vpop.f32.mrf.mxu1  ;;  %v459_v35 = vadd.f32 %v870_v31, %v355_v30  ;;  %v590_v37 = vsel %vm577_vm0, %v559_v32, 0.0 }
 0x10c   : > { %v872_v38 = vpop.f32.mrf.mxu0  ;;  %591 = vadd.xlane.f32.xlu1 %v590_v37 }
 0x10d   : > { %v928_v39 = vpop.f32.mrf.mxu1  ;;  %v873_v41 = vadd.f32 %v872_v38, %v871_v33  ;;  %v564_v42 = vadd.f32 %v926_v36, %v459_v35 }
 0x10e   : > { %v874_v43 = vpop.f32.mrf.mxu0  ;;  %v929_v46 = vadd.f32 %v928_v39, %v927_v34 }
 0x10f   : > { %v930_v44 = vpop.f32.mrf.mxu1  ;;  %v464_v45 = vadd.f32 %v873_v41, %v360_v40  ;;  %v593_v47 = vsel %vm577_vm0, %v564_v42, 0.0 }
 0x110   : > { %v875_v48 = vpop.f32.mrf.mxu0  ;;  %594 = vadd.xlane.f32.xlu0 %v593_v47 }
 0x111   : > { %v931_v49 = vpop.f32.mrf.mxu1  ;;  %v876_v50 = vadd.f32 %v875_v48, %v874_v43  ;;  %v569_v51 = vadd.f32 %v929_v46, %v464_v45 }
 0x112   : > { %v932_v54 = vadd.f32 %v931_v49, %v930_v44 }
 0x113   : > { %v469_v53 = vadd.f32 %v876_v50, %v365_v52  ;;  %v596_v55 = vsel %vm577_vm0, %v569_v51, 0.0 }
 0x114   : > { %597 = vadd.xlane.f32.xlu1 %v596_v55 }
 0x115   : > { %v574_v57 = vadd.f32 %v932_v54, %v469_v53  ;;  %v707_v54 = vld [vmem:[%s1312_s3] sm:$0xff] }
 0x117   : > { %v599_v58 = vsel %vm577_vm0, %v574_v57, 0.0 }
 0x118   : > { %600 = vadd.xlane.f32.xlu0 %v599_v58 }
 0x185   : > { %v580_v59 = vpop.xlane.xlu0 %579 }
 0x186   : > { %v603_v60 = vmul.f32 0.0625, %v580_v59 }
 0x188   : > { %v1220_v61 = vsub.f32 %v1202_v56, %v603_v60 }
 0x189   : > { %v583_v62 = vpop.xlane.xlu1 %582 }
 0x18a   : > { %v604_v63 = vmul.f32 0.0625, %v583_v62  ;;  %v619_v0 = vmul.f32 %v1220_v61, %v1220_v61 }
 0x18c   : > { %v1225_v1 = vsub.f32 %v1206_v2, %v604_v63  ;;  %v627_v3 = vsel %vm577_vm0, %v619_v0, 0.0  ;;  %v708_v0 = vld [vmem:[%s1312_s3 + $0x8] sm:$0xff] }
 0x18d   : > { %628 = vadd.xlane.f32.xlu1 %v627_v3  ;;  %v586_v4 = vpop.xlane.xlu0 %585 }
 0x18e   : > { %v605_v5 = vmul.f32 0.0625, %v586_v4  ;;  %v620_v6 = vmul.f32 %v1225_v1, %v1225_v1 }
 0x190   : > { %v1231_v7 = vsub.f32 %v1210_v12, %v605_v5  ;;  %v630_v56 = vsel %vm577_vm0, %v620_v6, 0.0 }
 0x191   : > { %631 = vadd.xlane.f32.xlu0 %v630_v56  ;;  %v589_v8 = vpop.xlane.xlu0 %588 }
 0x192   : > { %v606_v9 = vmul.f32 0.0625, %v589_v8  ;;  %v621_v2 = vmul.f32 %v1231_v7, %v1231_v7 }
 0x194   : > { %v1236_v10 = vsub.f32 %v554_v22, %v606_v9  ;;  %v633_v11 = vsel %vm577_vm0, %v621_v2, 0.0 }
 0x195   : > { %v592_v13 = vpop.xlane.xlu1 %591  ;;  %634 = vadd.xlane.f32.xlu1 %v633_v11  ;;  %v709_v11 = vld [vmem:[%s1312_s3 + $0x10] sm:$0xff] }
 0x196   : > { %v607_v14 = vmul.f32 0.0625, %v592_v13  ;;  %v622_v15 = vmul.f32 %v1236_v10, %v1236_v10 }
 0x198   : > { %v1241_v12 = vsub.f32 %v559_v32, %v607_v14  ;;  %v636_v16 = vsel %vm577_vm0, %v622_v15, 0.0 }
 0x199   : > { %637 = vadd.xlane.f32.xlu0 %v636_v16  ;;  %v595_v17 = vpop.xlane.xlu0 %594 }
 0x19a   : > { %v608_v18 = vmul.f32 0.0625, %v595_v17  ;;  %v623_v19 = vmul.f32 %v1241_v12, %v1241_v12 }
 0x19c   : > { %v1246_v20 = vsub.f32 %v564_v42, %v608_v18  ;;  %v639_v21 = vsel %vm577_vm0, %v623_v19, 0.0  ;;  %v710_v19 = vld [vmem:[%s1312_s3 + $0x18] sm:$0xff] }
 0x19d   : > { %v598_v22 = vpop.xlane.xlu1 %597  ;;  %640 = vadd.xlane.f32.xlu1 %v639_v21 }
 0x19e   : > { %v609_v23 = vmul.f32 0.0625, %v598_v22  ;;  %v624_v24 = vmul.f32 %v1246_v20, %v1246_v20 }
 0x1a0   : > { %v1251_v25 = vsub.f32 %v569_v51, %v609_v23  ;;  %v642_v26 = vsel %vm577_vm0, %v624_v24, 0.0 }
 0x1a1   : > { %643 = vadd.xlane.f32.xlu0 %v642_v26  ;;  %v601_v27 = vpop.xlane.xlu0 %600 }
 0x1a2   : > { %v610_v28 = vmul.f32 0.0625, %v601_v27  ;;  %v625_v29 = vmul.f32 %v1251_v25, %v1251_v25 }
 0x1a4   : > { %v1256_v30 = vsub.f32 %v574_v57, %v610_v28  ;;  %v645_v31 = vsel %vm577_vm0, %v625_v29, 0.0 }
 0x1a5   : > { %646 = vadd.xlane.f32.xlu1 %v645_v31 }
 0x1a6   : > { %v626_v32 = vmul.f32 %v1256_v30, %v1256_v30 }
 0x1a8   : > { %v648_v33 = vsel %vm577_vm0, %v626_v32, 0.0 }
 0x1a9   : > { %649 = vadd.xlane.f32.xlu0 %v648_v33 }
 0x216   : > { %v629_v34 = vpop.xlane.xlu1 %628 }
 0x217   : > { %v651_v35 = vmul.f32 0.0625, %v629_v34 }
 0x219   : > { %v659_v36 = vadd.f32 1e-05, %v651_v35 }
 0x21a   : > { %v632_v37 = vpop.xlane.xlu0 %631 }
 0x21b   : > { %944 = vrsqrt.f32 %v659_v36  ;;  %v652_v38 = vmul.f32 0.0625, %v632_v37 }
 0x21d   : > { %v660_v39 = vadd.f32 1e-05, %v652_v38 }
 0x21e   : > { %v635_v40 = vpop.xlane.xlu1 %634 }
 0x21f   : > { %946 = vrsqrt.f32 %v660_v39  ;;  %v653_v41 = vmul.f32 0.0625, %v635_v40 }
 0x221   : > { %v661_v42 = vadd.f32 1e-05, %v653_v41 }
 0x222   : > { %v638_v43 = vpop.xlane.xlu0 %637 }
 0x223   : > { %948 = vrsqrt.f32 %v661_v42  ;;  %v654_v44 = vmul.f32 0.0625, %v638_v43 }
 0x225   : > { %v662_v45 = vadd.f32 1e-05, %v654_v44 }
 0x226   : > { %v641_v46 = vpop.xlane.xlu1 %640 }
 0x227   : > { %950 = vrsqrt.f32 %v662_v45  ;;  %v655_v47 = vmul.f32 0.0625, %v641_v46 }
 0x228   : > { %v945_v48 = vpop.eup %944 }
 0x229   : > { %v663_v49 = vadd.f32 1e-05, %v655_v47  ;;  %v675_v50 = vmul.f32 %v945_v48, %v1220_v61 }
 0x22a   : > { %v644_v51 = vpop.xlane.xlu0 %643 }
 0x22b   : > { %952 = vrsqrt.f32 %v663_v49  ;;  %v656_v52 = vmul.f32 0.0625, %v644_v51  ;;  %vm683_vm1 = vcmp.ge.f32.partialorder %v675_v50, 0.0  ;;  %v691_v53 = vmul.f32 0.2, %v675_v50 }
 0x22c   : > { %v947_v55 = vpop.eup %946 }
 0x22d   : > { %v664_v57 = vadd.f32 1e-05, %v656_v52  ;;  %v699_v58 = vsel %vm683_vm1, %v675_v50, %v691_v53  ;;  %v676_v59 = vmul.f32 %v947_v55, %v1225_v1 }
 0x22e   : > { %v647_v60 = vpop.xlane.xlu1 %646  ;;  %v715_v62 = vmul.f32 %v707_v54, %v699_v58 }
 0x22f   : > { %954 = vrsqrt.f32 %v664_v57  ;;  %v657_v63 = vmul.f32 0.0625, %v647_v60  ;;  %vm684_vm2 = vcmp.ge.f32.partialorder %v676_v59, 0.0  ;;  %v692_v61 = vmul.f32 0.2, %v676_v59 }
 0x230   : > { %v949_v3 = vpop.eup %948  ;;  %v723_v4 = vsel %vm577_vm0, %v715_v62, 0.0 }
 0x231   : > { %v665_v5 = vadd.f32 1e-05, %v657_v63  ;;  %724 = vadd.xlane.f32.xlu1 %v723_v4  ;;  %v700_v6 = vsel %vm684_vm2, %v676_v59, %v692_v61  ;;  %v677_v56 = vmul.f32 %v949_v3, %v1231_v7 }
 0x232   : > { %v650_v8 = vpop.xlane.xlu0 %649  ;;  %v716_v1 = vmul.f32 %v708_v0, %v700_v6 }
 0x233   : > { %956 = vrsqrt.f32 %v665_v5  ;;  %v658_v9 = vmul.f32 0.0625, %v650_v8  ;;  %vm685_vm3 = vcmp.ge.f32.partialorder %v677_v56, 0.0  ;;  %v693_v2 = vmul.f32 0.2, %v677_v56 }
 0x234   : > { %v951_v13 = vpop.eup %950  ;;  %v726_v14 = vsel %vm577_vm0, %v716_v1, 0.0  ;;  %v760_v1 = vld [vmem:[#allocation2] sm:$0x1] }
 0x235   : > { %v666_v15 = vadd.f32 1e-05, %v658_v9  ;;  %727 = vadd.xlane.f32.xlu0 %v726_v14  ;;  %v701_v16 = vsel %vm685_vm3, %v677_v56, %v693_v2  ;;  %v678_v17 = vmul.f32 %v951_v13, %v1236_v10  ;;  %v711_v10 = vld [vmem:[%s1312_s3 + $0x20] sm:$0xff] }
 0x236   : > { %v717_v18 = vmul.f32 %v709_v11, %v701_v16 }
 0x237   : > { %958 = vrsqrt.f32 %v666_v15  ;;  %vm686_vm4 = vcmp.ge.f32.partialorder %v678_v17, 0.0  ;;  %v694_v7 = vmul.f32 0.2, %v678_v17 }
 0x238   : > { %v953_v21 = vpop.eup %952  ;;  %v729_v22 = vsel %vm577_vm0, %v717_v18, 0.0 }
 0x239   : > { %730 = vadd.xlane.f32.xlu1 %v729_v22  ;;  %v702_v23 = vsel %vm686_vm4, %v678_v17, %v694_v7  ;;  %v679_v24 = vmul.f32 %v953_v21, %v1241_v12  ;;  %v712_v12 = vld [vmem:[%s1312_s3 + $0x28] sm:$0xff] }
 0x23a   : > { %v718_v26 = vmul.f32 %v710_v19, %v702_v23 }
 0x23b   : > { %vm687_vm5 = vcmp.ge.f32.partialorder %v679_v24, 0.0  ;;  %v695_v27 = vmul.f32 0.2, %v679_v24 }
 0x23c   : > { %v955_v28 = vpop.eup %954  ;;  %v732_v29 = vsel %vm577_vm0, %v718_v26, 0.0 }
 0x23d   : > { %733 = vadd.xlane.f32.xlu0 %v732_v29  ;;  %v703_v31 = vsel %vm687_vm5, %v679_v24, %v695_v27  ;;  %v680_v32 = vmul.f32 %v955_v28, %v1246_v20  ;;  %v713_v20 = vld [vmem:[%s1312_s3 + $0x30] sm:$0xff] }
 0x23e   : > { %v719_v33 = vmul.f32 %v711_v10, %v703_v31 }
 0x23f   : > { %vm688_vm6 = vcmp.ge.f32.partialorder %v680_v32, 0.0  ;;  %v696_v34 = vmul.f32 0.2, %v680_v32 }
 0x240   : > { %v957_v35 = vpop.eup %956  ;;  %v735_v36 = vsel %vm577_vm0, %v719_v33, 0.0 }
 0x241   : > { %736 = vadd.xlane.f32.xlu1 %v735_v36  ;;  %v704_v37 = vsel %vm688_vm6, %v680_v32, %v696_v34  ;;  %v681_v38 = vmul.f32 %v957_v35, %v1251_v25  ;;  %v714_v25 = vld [vmem:[%s1312_s3 + $0x38] sm:$0xff] }
 0x242   : > { %v720_v39 = vmul.f32 %v712_v12, %v704_v37 }
 0x243   : > { %vm689_vm7 = vcmp.ge.f32.partialorder %v681_v38, 0.0  ;;  %v697_v40 = vmul.f32 0.2, %v681_v38 }
 0x244   : > { %v959_v41 = vpop.eup %958  ;;  %v738_v42 = vsel %vm577_vm0, %v720_v39, 0.0 }
 0x245   : > { %739 = vadd.xlane.f32.xlu0 %v738_v42  ;;  %v705_v43 = vsel %vm689_vm7, %v681_v38, %v697_v40  ;;  %v682_v44 = vmul.f32 %v959_v41, %v1256_v30 }
 0x246   : > { %v721_v45 = vmul.f32 %v713_v20, %v705_v43 }
 0x247   : > { %vm690_vm8 = vcmp.ge.f32.partialorder %v682_v44, 0.0  ;;  %v698_v46 = vmul.f32 0.2, %v682_v44 }
 0x248   : > { %v741_v47 = vsel %vm577_vm0, %v721_v45, 0.0 }
 0x249   : > { %742 = vadd.xlane.f32.xlu1 %v741_v47  ;;  %v706_v48 = vsel %vm690_vm8, %v682_v44, %v698_v46 }
 0x24a   : > { %v722_v49 = vmul.f32 %v714_v25, %v706_v48 }
 0x24c   : > { %v744_v50 = vsel %vm577_vm0, %v722_v49, 0.0 }
 0x24d   : > { %745 = vadd.xlane.f32.xlu0 %v744_v50 }
 0x2ba   : > { %v725_v51 = vpop.xlane.xlu1 %724 }
 0x2be   : > { %v728_v52 = vpop.xlane.xlu0 %727 }
 0x2bf   : > { %v747_v54 = vadd.f32 %v728_v52, %v725_v51 }
 0x2c2   : > { %v731_v53 = vpop.xlane.xlu1 %730 }
 0x2c3   : > { %v748_v55 = vadd.f32 %v747_v54, %v731_v53 }
 0x2c6   : > { %v734_v30 = vpop.xlane.xlu0 %733 }
 0x2c7   : > { %v749_v58 = vadd.f32 %v748_v55, %v734_v30 }
 0x2ca   : > { %v737_v57 = vpop.xlane.xlu1 %736 }
 0x2cb   : > { %v750_v60 = vadd.f32 %v749_v58, %v737_v57 }
 0x2ce   : > { %v740_v59 = vpop.xlane.xlu0 %739 }
 0x2cf   : > { %v751_v63 = vadd.f32 %v750_v60, %v740_v59 }
 0x2d2   : > { %v743_v62 = vpop.xlane.xlu1 %742 }
 0x2d3   : > { %v752_v61 = vadd.f32 %v751_v63, %v743_v62 }
 0x2d6   : > { %v746_v0 = vpop.xlane.xlu0 %745 }
 0x2d7   : > { %v753_v3 = vadd.f32 %v752_v61, %v746_v0 }
 0x2d9   : > { %v754_v4 = vrot.slane %v753_v3, 4 }
 0x2db   : > { %v755_v5 = vadd.f32 %v754_v4, %v753_v3 }
 0x2dd   : > { %v756_v6 = vrot.slane %v755_v5, 2 }
 0x2df   : > { %v757_v56 = vadd.f32 %v756_v6, %v755_v5 }
 0x2e1   : > { %v758_v8 = vrot.slane %v757_v56, 1 }
 0x2e3   : > { %v759_v9 = vadd.f32 %v758_v8, %v757_v56 }
 0x2e5   : > { %v761_v2 = vadd.f32 %v760_v1, %v759_v9 }
 0x2e7   : > { %763 = vst.msk [vmem:[%s222_s27] sm:$0x1] %vm762_vm9, %v761_v2 }
 0x2e8 PF: > { %s17_s20 = sadd.s32 1, %s966_s20  }
 0x2e9   : > { %p14_p4 = scmp.ge.s32.totalorder %s17_s20, 4  }
 0x2eb   :  { %16 = sbr.rel (!%p14_p4) target bundleno = 3 (0x3), region = 70 }

</bundles_post_ra>
